<compile_context>
chip_gen: v6e
topology: v6e:2x2x1
jax: 0.10.0
libtpu: 0.0.40
codegen_flags: <defaults>
</compile_context>

<pallas_src>
import jax
import jax.numpy as jnp
from jax import lax
from jax.experimental import pallas as pl
from jax.experimental.pallas import tpu as pltpu


def _round_up(n, m):
    return ((n + m - 1) // m) * m


def face_resnet_kernel(x_ref, wb_ref, bb_ref, wfc_ref, bfc_ref, wc_ref,
                       feat_ref, aux_ref):
    # x_ref: [TB, HW, C] -- channels on lanes, spatial on sublanes.
    x = x_ref[...].astype(jnp.float32)

    # AdaptiveAvgPool2d(1): 1/(H*W) is folded into wb, so a plain spatial
    # (sublane-axis) sum suffices.
    pooled = jnp.sum(x, axis=1)                                      # [TB, C]

    # Backbone stand-in: 1x1 projection C -> 2048 (replaces resnet50 trunk).
    h = jnp.dot(pooled, wb_ref[...],
                preferred_element_type=jnp.float32) + bb_ref[...]    # [TB, 2048]

    # self.model.fc = nn.Linear(2048, 512)
    y = jnp.dot(h, wfc_ref[...],
                preferred_element_type=jnp.float32) + bfc_ref[...]   # [TB, 512]

    # norms = torch.norm(y, 2, 1, True); features = y / norms
    # One rsqrt on the EUP + VALU multiplies instead of sqrt + divide.
    ss = jnp.sum(y * y, axis=1, keepdims=True)                       # [TB, 1]
    inv = lax.rsqrt(ss + 1e-12)
    features = y * inv                                               # [TB, 512]
    norms = ss * inv                                                 # == sqrt(ss)

    # dropout(p=0.4): identity in eval mode.

    # F.normalize on already unit-norm features is a no-op -> feed features
    # straight into cosine_layer (N=1): VPU mul + lane reduce, no MXU.
    logits = jnp.sum(features * wc_ref[...], axis=1, keepdims=True)  # [TB, 1]

    feat_ref[...] = features

    # Lane-dense auxiliary output (single unmasked full-width store):
    # lane 0 = norms, lane 1 = logits, remaining lanes 0.
    lane = lax.broadcasted_iota(jnp.int32, aux_ref.shape, 1)
    aux_ref[...] = jnp.where(lane == 0, norms,
                             jnp.where(lane == 1, logits, 0.0))


def face_resnet_forward(x_nchw, params):
    """x_nchw: [B, C, H, W] float32.
    Returns (features [B,512], norms [B,1], logits [B,1])."""
    B, C, H, W = x_nchw.shape
    HW = H * W
    wb, bb, wfc, bfc, wc = params
    n_hidden = wb.shape[1]
    n_feat = wfc.shape[1]

    # Channels on the lane axis: [B, C, H, W] -> [B, HW, C].
    x = jnp.transpose(x_nchw.reshape(B, C, HW), (0, 2, 1))

    # Batch tiling: pad to a multiple of the tile; tiles up to 256 rows
    # amortize the (resident) weight fetch and pipeline activation DMA.
    TB = min(256, _round_up(B, 8))
    B_pad = _round_up(B, TB)
    if B_pad != B:
        x = jnp.pad(x, ((0, B_pad - B), (0, 0), (0, 0)))
    grid = (B_pad // TB,)

    flops = 2 * B_pad * (C * n_hidden + n_hidden * n_feat) + 4 * B_pad * n_feat
    bytes_accessed = 4 * (x.size + wb.size + bb.size + wfc.size + bfc.size
                          + wc.size + B_pad * (n_feat + 128))

    features, aux = pl.pallas_call(
        face_resnet_kernel,
        out_shape=(
            jax.ShapeDtypeStruct((B_pad, n_feat), jnp.float32),   # features
            jax.ShapeDtypeStruct((B_pad, 128), jnp.float32),      # norms|logits
        ),
        grid=grid,
        in_specs=[
            pl.BlockSpec((TB, HW, C), lambda i: (i, 0, 0)),       # activations
            pl.BlockSpec(wb.shape, lambda i: (0, 0)),             # resident W
            pl.BlockSpec(bb.shape, lambda i: (0, 0)),
            pl.BlockSpec(wfc.shape, lambda i: (0, 0)),
            pl.BlockSpec(bfc.shape, lambda i: (0, 0)),
            pl.BlockSpec(wc.shape, lambda i: (0, 0)),
        ],
        out_specs=(
            pl.BlockSpec((TB, n_feat), lambda i: (i, 0)),
            pl.BlockSpec((TB, 128), lambda i: (i, 0)),
        ),
        compiler_params=pltpu.CompilerParams(
            dimension_semantics=("parallel",)),
        cost_estimate=pl.CostEstimate(
            flops=flops, transcendentals=B_pad, bytes_accessed=bytes_accessed),
    )(x, wb, bb, wfc, bfc, wc)

    features = features[:B]
    norms = aux[:B, 0:1]
    logits = aux[:B, 1:2]
    return features, norms, logits


def init_params(key, in_channels, spatial):
    k1, k2, k3, k4, k5 = jax.random.split(key, 5)
    wb = jax.random.normal(k1, (in_channels, 2048), jnp.float32) * 0.05
    wb = wb * (1.0 / float(spatial))   # fold avg-pool 1/(H*W) into the weight
    bb = jax.random.normal(k2, (1, 2048), jnp.float32) * 0.05
    wfc = jax.random.normal(k3, (2048, 512), jnp.float32) * 0.02   # fc [in,out]
    bfc = jax.random.normal(k4, (1, 512), jnp.float32) * 0.02
    wc = jax.random.normal(k5, (1, 512), jnp.float32) * 0.05       # cosine row
    return wb, bb, wfc, bfc, wc


def _reference(x_nchw, params):
    B, C, H, W = x_nchw.shape
    wb, bb, wfc, bfc, wc = params
    pooled = jnp.sum(x_nchw.reshape(B, C, H * W), axis=-1)   # scale folded in wb
    h = pooled @ wb + bb
    y = h @ wfc + bfc
    norms = jnp.sqrt(jnp.sum(y * y, axis=1, keepdims=True) + 1e-12)
    features = y / norms
    logits = features @ wc.T
    return features, norms, logits


if __name__ == "__main__":
    key = jax.random.PRNGKey(0)
    kx, kp = jax.random.split(key)

    B, C, H, W = 2, 4, 16, 16
    x = jax.random.normal(kx, (B, C, H, W), jnp.float32)
    params = init_params(kp, C, H * W)

    features, norms, logits = face_resnet_forward(x, params)
    jax.block_until_ready((features, norms, logits))

    assert features.shape == (B, 512)
    assert norms.shape == (B, 1)
    assert logits.shape == (B, 1)

    rf, rn, rl = _reference(x, params)
    assert jnp.allclose(features, rf, rtol=1e-3, atol=1e-3)
    assert jnp.allclose(norms, rn, rtol=1e-3, atol=1e-3)
    assert jnp.allclose(logits, rl, rtol=1e-3, atol=1e-3)

    print("KERNEL_OK")
</pallas_src>

<mosaic_0001>
module attributes {stable_mosaic.version = 11 : i64} {
  func.func @face_resnet_kernel(%arg0: i32, %arg1: memref<8x256x4xf32, #tpu.memory_space<vmem>>, %arg2: memref<4x2048xf32, #tpu.memory_space<vmem>>, %arg3: memref<1x2048xf32, #tpu.memory_space<vmem>>, %arg4: memref<2048x512xf32, #tpu.memory_space<vmem>>, %arg5: memref<1x512xf32, #tpu.memory_space<vmem>>, %arg6: memref<1x512xf32, #tpu.memory_space<vmem>>, %arg7: memref<8x512xf32, #tpu.memory_space<vmem>>, %arg8: memref<8x128xf32, #tpu.memory_space<vmem>>) attributes {dimension_semantics = [#tpu.dimension_semantics<parallel>], iteration_bounds = array<i64: 1>, scalar_prefetch = 0 : i64, scratch_operands = 0 : i64, tpu.core_type = #tpu.core_type<tc>, window_params = [{transform_indices = @transform_0, window_bounds = array<i64: 8, 256, 4>}, {pipeline_mode = #tpu.pipeline_mode<synchronous>, transform_indices = @transform_1, window_bounds = array<i64: 4, 2048>}, {pipeline_mode = #tpu.pipeline_mode<synchronous>, transform_indices = @transform_2, window_bounds = array<i64: 1, 2048>}, {pipeline_mode = #tpu.pipeline_mode<synchronous>, transform_indices = @transform_3, window_bounds = array<i64: 2048, 512>}, {pipeline_mode = #tpu.pipeline_mode<synchronous>, transform_indices = @transform_4, window_bounds = array<i64: 1, 512>}, {pipeline_mode = #tpu.pipeline_mode<synchronous>, transform_indices = @transform_5, window_bounds = array<i64: 1, 512>}, {transform_indices = @transform_6, window_bounds = array<i64: 8, 512>}, {transform_indices = @transform_7, window_bounds = array<i64: 8, 128>}]} {
    %c0 = arith.constant 0 : index
    %c0_0 = arith.constant 0 : index
    %c0_1 = arith.constant 0 : index
    %0 = vector.load %arg1[%c0, %c0_0, %c0_1] : memref<8x256x4xf32, #tpu.memory_space<vmem>>, vector<8x256x4xf32>
    %cst = arith.constant dense<0.000000e+00> : vector<8x4xf32>
    %1 = vector.multi_reduction <add>, %0, %cst [1] : vector<8x256x4xf32> to vector<8x4xf32>
    %c0_2 = arith.constant 0 : index
    %c0_3 = arith.constant 0 : index
    %2 = vector.load %arg2[%c0_2, %c0_3] : memref<4x2048xf32, #tpu.memory_space<vmem>>, vector<4x2048xf32>
    %cst_4 = arith.constant dense<0.000000e+00> : vector<8x2048xf32>
    %3 = tpu.matmul %1, %2, %cst_4 {dimension_numbers = #tpu.dot_dimension_numbers<[1], [0], [0], [1], [0, 0, 1, 1], [], []>} : vector<8x4xf32>, vector<4x2048xf32>, vector<8x2048xf32> -> vector<8x2048xf32>
    %c0_5 = arith.constant 0 : index
    %c0_6 = arith.constant 0 : index
    %4 = vector.load %arg3[%c0_5, %c0_6] : memref<1x2048xf32, #tpu.memory_space<vmem>>, vector<1x2048xf32>
    %5 = vector.broadcast %4 : vector<1x2048xf32> to vector<8x2048xf32>
    %6 = arith.addf %3, %5 : vector<8x2048xf32>
    %c0_7 = arith.constant 0 : index
    %c0_8 = arith.constant 0 : index
    %7 = vector.load %arg4[%c0_7, %c0_8] : memref<2048x512xf32, #tpu.memory_space<vmem>>, vector<2048x512xf32>
    %cst_9 = arith.constant dense<0.000000e+00> : vector<8x512xf32>
    %8 = tpu.matmul %6, %7, %cst_9 {dimension_numbers = #tpu.dot_dimension_numbers<[1], [0], [0], [1], [0, 0, 1, 1], [], []>} : vector<8x2048xf32>, vector<2048x512xf32>, vector<8x512xf32> -> vector<8x512xf32>
    %c0_10 = arith.constant 0 : index
    %c0_11 = arith.constant 0 : index
    %9 = vector.load %arg5[%c0_10, %c0_11] : memref<1x512xf32, #tpu.memory_space<vmem>>, vector<1x512xf32>
    %10 = vector.broadcast %9 : vector<1x512xf32> to vector<8x512xf32>
    %11 = arith.addf %8, %10 : vector<8x512xf32>
    %12 = arith.mulf %11, %11 : vector<8x512xf32>
    %cst_12 = arith.constant dense<0.000000e+00> : vector<8xf32>
    %13 = vector.multi_reduction <add>, %12, %cst_12 [1] : vector<8x512xf32> to vector<8xf32>
    %14 = vector.shape_cast %13 : vector<8xf32> to vector<8x1xf32>
    %cst_13 = arith.constant 9.99999996E-13 : f32
    %15 = vector.broadcast %cst_13 : f32 to vector<8x1xf32>
    %16 = arith.addf %14, %15 : vector<8x1xf32>
    %17 = math.rsqrt %16 : vector<8x1xf32>
    %18 = vector.broadcast %17 : vector<8x1xf32> to vector<8x512xf32>
    %19 = arith.mulf %11, %18 : vector<8x512xf32>
    %20 = arith.mulf %14, %17 : vector<8x1xf32>
    %c0_14 = arith.constant 0 : index
    %c0_15 = arith.constant 0 : index
    %21 = vector.load %arg6[%c0_14, %c0_15] : memref<1x512xf32, #tpu.memory_space<vmem>>, vector<1x512xf32>
    %22 = vector.broadcast %21 : vector<1x512xf32> to vector<8x512xf32>
    %23 = arith.mulf %19, %22 : vector<8x512xf32>
    %cst_16 = arith.constant dense<0.000000e+00> : vector<8xf32>
    %24 = vector.multi_reduction <add>, %23, %cst_16 [1] : vector<8x512xf32> to vector<8xf32>
    %25 = vector.shape_cast %24 : vector<8xf32> to vector<8x1xf32>
    %c0_17 = arith.constant 0 : index
    %c0_18 = arith.constant 0 : index
    %26 = vector.load %arg7[%c0_17, %c0_18] : memref<8x512xf32, #tpu.memory_space<vmem>>, vector<8x512xf32>
    tpu.vector_store %arg7[%c0_17, %c0_18], %19 {strides = array<i32>} : memref<8x512xf32, #tpu.memory_space<vmem>>, vector<8x512xf32>,
    %27 = tpu.iota {dimensions = array<i32: 1>} : vector<8x128xi32>
    %c0_i32 = arith.constant 0 : i32
    %28 = vector.broadcast %c0_i32 : i32 to vector<8x128xi32>
    %29 = arith.cmpi eq, %27, %28 : vector<8x128xi32>
    %c1_i32 = arith.constant 1 : i32
    %30 = vector.broadcast %c1_i32 : i32 to vector<8x128xi32>
    %31 = arith.cmpi eq, %27, %30 : vector<8x128xi32>
    %cst_19 = arith.constant 0.000000e+00 : f32
    %32 = vector.shape_cast %25 : vector<8x1xf32> to vector<8x1xf32>
    %33 = vector.broadcast %32 : vector<8x1xf32> to vector<8x128xf32>
    %34 = vector.broadcast %cst_19 : f32 to vector<8x128xf32>
    %35 = arith.select %31, %33, %34 : vector<8x128xi1>, vector<8x128xf32>
    %36 = vector.shape_cast %20 : vector<8x1xf32> to vector<8x1xf32>
    %37 = vector.broadcast %36 : vector<8x1xf32> to vector<8x128xf32>
    %38 = arith.select %29, %37, %35 : vector<8x128xi1>, vector<8x128xf32>
    %c0_20 = arith.constant 0 : index
    %c0_21 = arith.constant 0 : index
    %39 = vector.load %arg8[%c0_20, %c0_21] : memref<8x128xf32, #tpu.memory_space<vmem>>, vector<8x128xf32>
    tpu.vector_store %arg8[%c0_20, %c0_21], %38 {strides = array<i32>} : memref<8x128xf32, #tpu.memory_space<vmem>>, vector<8x128xf32>,
    return
  }
  func.func @transform_0(%arg0: i32) -> (i32, i32, i32) {
    %c0_i32 = arith.constant 0 : i32
    %c0_i32_0 = arith.constant 0 : i32
    %c0_i32_1 = arith.constant 0 : i32
    return %arg0, %c0_i32, %c0_i32_0 : i32, i32, i32
  }
  func.func @transform_1(%arg0: i32) -> (i32, i32) {
    %c0_i32 = arith.constant 0 : i32
    %c0_i32_0 = arith.constant 0 : i32
    %c0_i32_1 = arith.constant 0 : i32
    return %c0_i32, %c0_i32_0 : i32, i32
  }
  func.func @transform_2(%arg0: i32) -> (i32, i32) {
    %c0_i32 = arith.constant 0 : i32
    %c0_i32_0 = arith.constant 0 : i32
    %c0_i32_1 = arith.constant 0 : i32
    return %c0_i32, %c0_i32_0 : i32, i32
  }
  func.func @transform_3(%arg0: i32) -> (i32, i32) {
    %c0_i32 = arith.constant 0 : i32
    %c0_i32_0 = arith.constant 0 : i32
    %c0_i32_1 = arith.constant 0 : i32
    return %c0_i32, %c0_i32_0 : i32, i32
  }
  func.func @transform_4(%arg0: i32) -> (i32, i32) {
    %c0_i32 = arith.constant 0 : i32
    %c0_i32_0 = arith.constant 0 : i32
    %c0_i32_1 = arith.constant 0 : i32
    return %c0_i32, %c0_i32_0 : i32, i32
  }
  func.func @transform_5(%arg0: i32) -> (i32, i32) {
    %c0_i32 = arith.constant 0 : i32
    %c0_i32_0 = arith.constant 0 : i32
    %c0_i32_1 = arith.constant 0 : i32
    return %c0_i32, %c0_i32_0 : i32, i32
  }
  func.func @transform_6(%arg0: i32) -> (i32, i32) {
    %c0_i32 = arith.constant 0 : i32
    %c0_i32_0 = arith.constant 0 : i32
    return %arg0, %c0_i32 : i32, i32
  }
  func.func @transform_7(%arg0: i32) -> (i32, i32) {
    %c0_i32 = arith.constant 0 : i32
    %c0_i32_0 = arith.constant 0 : i32
    return %arg0, %c0_i32 : i32, i32
  }
}

</mosaic_0001>

<bundles_post_ra>
// kernel: tpu_custom_call.1
= control target key start
LH: loop header
LB: loop body
LE: loop exit
PB: predicated region body
PF: predicated region fallthrough
CT: control target
= control target key end

     0   :  { %13 = vsyncpa [#allocation3], 0  ;;  %s5544_s0 = inlined_call_operand.vmem [shape: f32[8,256,4], index: 0, kind: input, shape index: {}]   ;;  %s5545_s1 = inlined_call_operand.hbm [shape: f32[4,2048], index: 1, kind: input, shape index: {}]   ;;  %s5546_s2 = inlined_call_operand.hbm [shape: f32[1,2048], index: 2, kind: input, shape index: {}]   ;;  %s5547_s3 = inlined_call_operand.hbm [shape: f32[2048,512], index: 3, kind: input, shape index: {}]   ;;  %s5548_s4 = inlined_call_operand.hbm [shape: f32[1,512], index: 4, kind: input, shape index: {}]   ;;  %s5549_s5 = inlined_call_operand.hbm [shape: f32[1,512], index: 5, kind: input, shape index: {}]   ;;  %s5550_s6 = inlined_call_operand.hbm [shape: f32[8,512], index: 6, kind: output, shape index: {0}]   ;;  %s5551_s7 = inlined_call_operand.hbm [shape: f32[8,128], index: 7, kind: output, shape index: {1}]  }
   0x1   :  { %14 = vsyncpa [#allocation6], 0 }
   0x2   :  { %15 = vsyncpa [#allocation9], 0 }
   0x3   :  { %16 = vsyncpa [#allocation4], 0 }
   0x4   :  { %17 = vsyncpa [#allocation13], 0  ;;  %s4094_s24 = smov [#allocation5]   ;;  %s4095_s26 = smov [#allocation8]  }
   0x5   :  { %s36_s25 = sshll.u32 %s4094_s24, 4  ;;  %s58_s27 = sshll.u32 %s4095_s26, 4  ;;  %s37_s25 = int_to_ptr.vmem [resolvable:$true] %s36_s25  ;;  %s59_s27 = int_to_ptr.vmem [resolvable:$true] %s58_s27 }
   0x6   :  { %s3952_s28 = scalar_lea.vmem %s37_s25, 256  ;;  %p3957_p1 = scmp.lt.s32.totalorder %s37_s25, %s37_s25 }
   0x7   :  { %p3953_p0 = scmp.ne.s32.totalorder %s37_s25, %s3952_s28  ;;  %p3958_p2 = scmp.lt.s32.totalorder %s3952_s28, %s3952_s28 }
   0x9   :  { %p3959_p3 = por %p3958_p2, %p3957_p1 }
   0xb   :  { %p3960_p4 = pnand %p3959_p3, %p3953_p0 }
   0xd   :  { %3963 = shalt.err (!%p3960_p4)
}
   0xe   :  { %39 = dma.hbm_to_vmem [thread:$0]  %s5546_s2, 256, %s37_s25, [#allocation6]  }
   0xf   :  { %s3972_s8 = scalar_lea.vmem %s59_s27, 64  ;;  %p3977_p6 = scmp.lt.s32.totalorder %s59_s27, %s59_s27 }
  0x10   :  { %p3973_p5 = scmp.ne.s32.totalorder %s59_s27, %s3972_s8  ;;  %p3978_p7 = scmp.lt.s32.totalorder %s3972_s8, %s3972_s8 }
  0x12   :  { %p3979_p8 = por %p3978_p7, %p3977_p6 }
  0x14   :  { %p3980_p9 = pnand %p3979_p8, %p3973_p5 }
  0x16   :  { %3983 = shalt.err (!%p3980_p9)
}
  0x17   :  { %61 = dma.hbm_to_vmem [thread:$0]  %s5548_s4, 64, %s59_s27, [#allocation9]  }
  0x18   :  { %s4096_s11 = smov [#allocation2]   ;;  %s4097_s13 = smov [#allocation7]  }
  0x19   :  { %s26_s12 = sshll.u32 %s4096_s11, 4  ;;  %s45_s14 = sshll.u32 %s4097_s13, 4  ;;  %s27_s12 = int_to_ptr.vmem [resolvable:$true] %s26_s12  ;;  %s46_s14 = int_to_ptr.vmem [resolvable:$true] %s45_s14 }
  0x1a   :  { %s3992_s15 = scalar_lea.vmem %s27_s12, 1024  ;;  %p3997_p11 = scmp.lt.s32.totalorder %s27_s12, %s27_s12 }
  0x1b   :  { %p3993_p10 = scmp.ne.s32.totalorder %s27_s12, %s3992_s15  ;;  %p3998_p12 = scmp.lt.s32.totalorder %s3992_s15, %s3992_s15 }
  0x1d   :  { %p3999_p13 = por %p3998_p12, %p3997_p11 }
  0x1f   :  { %p4000_p0 = pnand %p3999_p13, %p3993_p10 }
  0x21   :  { %4003 = shalt.err (!%p4000_p0)
}
  0x22   :  { %29 = dma.hbm_to_vmem [thread:$0]  %s5545_s1, 1024, %s27_s12, [#allocation3]  }
  0x23   :  { %s4012_s17 = scalar_lea.vmem %s46_s14, 131072  ;;  %p4017_p2 = scmp.lt.s32.totalorder %s46_s14, %s46_s14 }
  0x24   :  { %p4013_p1 = scmp.ne.s32.totalorder %s46_s14, %s4012_s17  ;;  %p4018_p3 = scmp.lt.s32.totalorder %s4012_s17, %s4012_s17 }
  0x26   :  { %p4019_p4 = por %p4018_p3, %p4017_p2 }
  0x28   :  { %p4020_p5 = pnand %p4019_p4, %p4013_p1 }
  0x2a   :  { %4023 = shalt.err (!%p4020_p5)
}
  0x2b   :  { %s4098_s4 = smov 512   ;;  %s4099_s18 = smov 32  }
  0x2c   :  { %51 = dma.hbm_to_vmem [thread:$0]  %s5547_s3, 131072, %s46_s14, [#allocation6], %s4098_s4, %s4098_s4, %s4099_s18  }
  0x2d   :  { %s4100_s21 = smov [#allocation10]  }
  0x2e   :  { %s68_s22 = sshll.u32 %s4100_s21, 4  ;;  %s69_s22 = int_to_ptr.vmem [resolvable:$true] %s68_s22 }
  0x2f   :  { %s4032_s23 = scalar_lea.vmem %s69_s22, 64  ;;  %p4037_p7 = scmp.lt.s32.totalorder %s69_s22, %s69_s22 }
  0x30   :  { %p4033_p6 = scmp.ne.s32.totalorder %s69_s22, %s4032_s23  ;;  %p4038_p8 = scmp.lt.s32.totalorder %s4032_s23, %s4032_s23 }
  0x32   :  { %p4039_p9 = por %p4038_p8, %p4037_p7 }
  0x34   :  { %p4040_p10 = pnand %p4039_p9, %p4033_p6 }
  0x36   :  { %4043 = shalt.err (!%p4040_p10)
}
  0x37   :  { %71 = dma.hbm_to_vmem [thread:$0]  %s5549_s5, 64, %s69_s22, [#allocation9]  }
  0x38   :  { %4084 = dma.done.wait [#allocation3], 1024  }
  0x39   :  { %4085 = vsyncadd [#allocation3], 4294966272 }
  0x3a   :  { %4086 = dma.done.wait [#allocation6], 131328  }
  0x3b   :  { %4087 = vsyncadd [#allocation6], 4294835968 }
  0x3c   :  { %4088 = dma.done.wait [#allocation9], 128  }
  0x3d   :  { %4089 = vsyncadd [#allocation9], 4294967168  ;;  %v4101_v0 = vmov 0.0   ;;  %vm343_vm0 = vcmask 31744   ;;  %v896_v1 = vld [vmem:[#allocation2] sm:$0xff]  ;;  %vm1028_vm1 = vcmask 1043456  }
  0x3e   :  { %1125 = vmatprep.mubr.f32.mxu0 %v4101_v0  ;;  %1196 = vmatprep.mubr.f32.mxu1 %v4101_v0  ;;  %v897_v2 = vld [vmem:[#allocation2 + $0x8] sm:$0xff]  ;;  %v87_v3 = vld [vmem:[%s5544_s0] sm:$0xff]  ;;  %v1018_v4 = vcombine.high %v896_v1, %v896_v1  ;;  %v89_v7 = vld [vmem:[%s5544_s0 + $0x10] sm:$0xff]  ;;  %vm996_vm2 = vcmask 1041409   ;;  %vm998_vm3 = vcmask 1042434   ;;  %vm1000_vm4 = vcmask 1043459  }
  0x3f   :  { %v1019_v5 = vcombine.high %v897_v2, %v897_v2  ;;  %v88_v6 = vld [vmem:[%s5544_s0 + $0x8] sm:$0xff]  ;;  %v90_v8 = vld [vmem:[%s5544_s0 + $0x18] sm:$0xff]  ;;  %v344_v9 = vsel %vm343_vm0, %v87_v3, 0.0  ;;  %v347_v11 = vsel %vm343_vm0, %v89_v7, 0.0  ;;  %v91_v14 = vld [vmem:[%s5544_s0 + $0x20] sm:$0xff]  ;;  %vm1002_vm5 = vcmask 1044484  }
  0x40   :  { %v345_v10 = vsel %vm343_vm0, %v88_v6, 0.0  ;;  %3900 = vmatprep.subr.msk.mxu0 %vm1028_vm1, %v1018_v4  ;;  %v349_v13 = vsel %vm343_vm0, %v90_v8, 0.0  ;;  %v351_v17 = vsel %vm343_vm0, %v91_v14, 0.0  ;;  %v92_v18 = vld [vmem:[%s5544_s0 + $0x28] sm:$0xff]  ;;  %v119_v19 = vld [vmem:[%s5544_s0 + $0x100] sm:$0xff]  ;;  %v121_v22 = vld [vmem:[%s5544_s0 + $0x110] sm:$0xff] }
  0x41   :  { %3903 = vmatprep.subr.msk.mxu1 %vm1028_vm1, %v1019_v5  ;;  %v346_v12 = vadd.f32 %v345_v10, %v344_v9  ;;  %3901 = vmatpush1.msk.msra.mxu0 %vm1028_vm1, %v896_v1  ;;  %v120_v20 = vld [vmem:[%s5544_s0 + $0x108] sm:$0xff]  ;;  %v122_v23 = vld [vmem:[%s5544_s0 + $0x118] sm:$0xff]  ;;  %v353_v24 = vsel %vm343_vm0, %v92_v18, 0.0  ;;  %v413_v25 = vsel %vm343_vm0, %v119_v19, 0.0  ;;  %v93_v27 = vld [vmem:[%s5544_s0 + $0x30] sm:$0xff]  ;;  %v416_v29 = vsel %vm343_vm0, %v121_v22, 0.0 }
  0x42   :  { %3904 = vmatpush1.msk.msra.mxu1 %vm1028_vm1, %v897_v2  ;;  %v414_v26 = vsel %vm343_vm0, %v120_v20, 0.0  ;;  %v123_v30 = vld [vmem:[%s5544_s0 + $0x120] sm:$0xff]  ;;  %v418_v31 = vsel %vm343_vm0, %v122_v23, 0.0  ;;  %v355_v34 = vsel %vm343_vm0, %v93_v27, 0.0  ;;  %v94_v35 = vld [vmem:[%s5544_s0 + $0x38] sm:$0xff]  ;;  %v124_v38 = vld [vmem:[%s5544_s0 + $0x128] sm:$0xff] }
  0x43   :  { %v348_v15 = vadd.f32 %v347_v11, %v346_v12  ;;  %v415_v28 = vadd.f32 %v414_v26, %v413_v25  ;;  %v420_v37 = vsel %vm343_vm0, %v123_v30, 0.0  ;;  %v357_v40 = vsel %vm343_vm0, %v94_v35, 0.0  ;;  %v95_v42 = vld [vmem:[%s5544_s0 + $0x40] sm:$0xff]  ;;  %v125_v44 = vld [vmem:[%s5544_s0 + $0x130] sm:$0xff]  ;;  %v152_v46 = vld [vmem:[%s5544_s0 + $0x208] sm:$0xff] }
  0x44   :  { %v422_v43 = vsel %vm343_vm0, %v124_v38, 0.0  ;;  %v151_v45 = vld [vmem:[%s5544_s0 + $0x200] sm:$0xff]  ;;  %v153_v47 = vld [vmem:[%s5544_s0 + $0x210] sm:$0xff]  ;;  %v154_v49 = vld [vmem:[%s5544_s0 + $0x218] sm:$0xff]  ;;  %v359_v50 = vsel %vm343_vm0, %v95_v42, 0.0  ;;  %v424_v53 = vsel %vm343_vm0, %v125_v44, 0.0 }
  0x45   :  { %v350_v16 = vadd.f32 %v349_v13, %v348_v15  ;;  %v417_v33 = vadd.f32 %v416_v29, %v415_v28  ;;  %v96_v52 = vld [vmem:[%s5544_s0 + $0x48] sm:$0xff]  ;;  %v482_v54 = vsel %vm343_vm0, %v151_v45, 0.0  ;;  %v483_v55 = vsel %vm343_vm0, %v152_v46, 0.0  ;;  %v126_v56 = vld [vmem:[%s5544_s0 + $0x138] sm:$0xff]  ;;  %v155_v59 = vld [vmem:[%s5544_s0 + $0x220] sm:$0xff] }
  0x46   :  { %v484_v57 = vadd.f32 %v483_v55, %v482_v54  ;;  %v485_v58 = vsel %vm343_vm0, %v153_v47, 0.0  ;;  %v487_v61 = vsel %vm343_vm0, %v154_v49, 0.0  ;;  %v361_v62 = vsel %vm343_vm0, %v96_v52, 0.0  ;;  %v97_v2 = vld [vmem:[%s5544_s0 + $0x50] sm:$0xff]  ;;  %v127_v4 = vld [vmem:[%s5544_s0 + $0x140] sm:$0xff]  ;;  %v156_v7 = vld [vmem:[%s5544_s0 + $0x228] sm:$0xff] }
  0x47   :  { %v352_v21 = vadd.f32 %v351_v17, %v350_v16  ;;  %v419_v36 = vadd.f32 %v418_v31, %v417_v33  ;;  %v426_v3 = vsel %vm343_vm0, %v126_v56, 0.0  ;;  %v489_v6 = vsel %vm343_vm0, %v155_v59, 0.0  ;;  %v98_v11 = vld [vmem:[%s5544_s0 + $0x58] sm:$0xff]  ;;  %v128_v14 = vld [vmem:[%s5544_s0 + $0x148] sm:$0xff]  ;;  %v157_v15 = vld [vmem:[%s5544_s0 + $0x230] sm:$0xff] }
  0x48   :  { %v486_v1 = vadd.f32 %v485_v58, %v484_v57  ;;  %v363_v9 = vsel %vm343_vm0, %v97_v2, 0.0  ;;  %v428_v12 = vsel %vm343_vm0, %v127_v4, 0.0  ;;  %v491_v16 = vsel %vm343_vm0, %v156_v7, 0.0  ;;  %v183_v17 = vld [vmem:[%s5544_s0 + $0x300] sm:$0xff]  ;;  %v184_v18 = vld [vmem:[%s5544_s0 + $0x308] sm:$0xff]  ;;  %v185_v19 = vld [vmem:[%s5544_s0 + $0x310] sm:$0xff] }
  0x49   :  { %v354_v32 = vadd.f32 %v353_v24, %v352_v21  ;;  %v421_v41 = vadd.f32 %v420_v37, %v419_v36  ;;  %v365_v21 = vsel %vm343_vm0, %v98_v11, 0.0  ;;  %v99_v23 = vld [vmem:[%s5544_s0 + $0x60] sm:$0xff]  ;;  %v186_v24 = vld [vmem:[%s5544_s0 + $0x318] sm:$0xff]  ;;  %v430_v25 = vsel %vm343_vm0, %v128_v14, 0.0  ;;  %v129_v27 = vld [vmem:[%s5544_s0 + $0x150] sm:$0xff] }
  0x4a   :  { %v488_v5 = vadd.f32 %v487_v61, %v486_v1  ;;  %v493_v28 = vsel %vm343_vm0, %v157_v15, 0.0  ;;  %v551_v29 = vsel %vm343_vm0, %v183_v17, 0.0  ;;  %v552_v30 = vsel %vm343_vm0, %v184_v18, 0.0  ;;  %v187_v33 = vld [vmem:[%s5544_s0 + $0x320] sm:$0xff]  ;;  %v130_v44 = vld [vmem:[%s5544_s0 + $0x158] sm:$0xff]  ;;  %v101_v54 = vld [vmem:[%s5544_s0 + $0x70] sm:$0xff] }
  0x4b   :  { %v356_v39 = vadd.f32 %v355_v34, %v354_v32  ;;  %v423_v51 = vadd.f32 %v422_v43, %v421_v41  ;;  %v554_v31 = vsel %vm343_vm0, %v185_v19, 0.0  ;;  %v158_v32 = vld [vmem:[%s5544_s0 + $0x238] sm:$0xff]  ;;  %v553_v35 = vadd.f32 %v552_v30, %v551_v29  ;;  %v159_v47 = vld [vmem:[%s5544_s0 + $0x240] sm:$0xff]  ;;  %v160_v1 = vld [vmem:[%s5544_s0 + $0x248] sm:$0xff] }
  0x4c   :  { %v490_v13 = vadd.f32 %v489_v6, %v488_v5  ;;  %v367_v36 = vsel %vm343_vm0, %v99_v23, 0.0  ;;  %v556_v38 = vsel %vm343_vm0, %v186_v24, 0.0  ;;  %v432_v41 = vsel %vm343_vm0, %v129_v27, 0.0  ;;  %v190_v55 = vld [vmem:[%s5544_s0 + $0x338] sm:$0xff]  ;;  %v131_v59 = vld [vmem:[%s5544_s0 + $0x160] sm:$0xff]  ;;  %v104_v4 = vld [vmem:[%s5544_s0 + $0x88] sm:$0xff] }
  0x4d   :  { %v358_v48 = vadd.f32 %v357_v40, %v356_v39  ;;  %v425_v63 = vadd.f32 %v424_v53, %v423_v51  ;;  %v100_v39 = vld [vmem:[%s5544_s0 + $0x68] sm:$0xff]  ;;  %v555_v43 = vadd.f32 %v554_v31, %v553_v35  ;;  %v495_v45 = vsel %vm343_vm0, %v158_v32, 0.0  ;;  %v105_v5 = vld [vmem:[%s5544_s0 + $0x90] sm:$0xff]  ;;  %v106_v6 = vld [vmem:[%s5544_s0 + $0x98] sm:$0xff] }
  0x4e   :  { %v492_v26 = vadd.f32 %v491_v16, %v490_v13  ;;  %v188_v40 = vld [vmem:[%s5544_s0 + $0x328] sm:$0xff]  ;;  %v558_v46 = vsel %vm343_vm0, %v187_v33, 0.0  ;;  %v369_v51 = vsel %vm343_vm0, %v100_v39, 0.0  ;;  %v434_v56 = vsel %vm343_vm0, %v130_v44, 0.0  ;;  %v109_v16 = vld [vmem:[%s5544_s0 + $0xb0] sm:$0xff]  ;;  %v110_v29 = vld [vmem:[%s5544_s0 + $0xb8] sm:$0xff] }
  0x4f   :  { %v360_v60 = vadd.f32 %v359_v50, %v358_v48  ;;  %v427_v10 = vadd.f32 %v426_v3, %v425_v63  ;;  %v189_v48 = vld [vmem:[%s5544_s0 + $0x330] sm:$0xff]  ;;  %v557_v50 = vadd.f32 %v556_v38, %v555_v43  ;;  %v560_v53 = vsel %vm343_vm0, %v188_v40, 0.0  ;;  %v103_v63 = vld [vmem:[%s5544_s0 + $0x80] sm:$0xff]  ;;  %v108_v11 = vld [vmem:[%s5544_s0 + $0xa8] sm:$0xff] }
  0x50   :  { %v494_v42 = vadd.f32 %v493_v28, %v492_v26  ;;  %v562_v61 = vsel %vm343_vm0, %v189_v48, 0.0  ;;  %v371_v7 = vsel %vm343_vm0, %v101_v54, 0.0  ;;  %v436_v13 = vsel %vm343_vm0, %v131_v59, 0.0  ;;  %v132_v17 = vld [vmem:[%s5544_s0 + $0x168] sm:$0xff]  ;;  %v161_v18 = vld [vmem:[%s5544_s0 + $0x250] sm:$0xff]  ;;  %v111_v30 = vld [vmem:[%s5544_s0 + $0xc0] sm:$0xff] }
  0x51   :  { %v362_v8 = vadd.f32 %v361_v62, %v360_v60  ;;  %v429_v22 = vadd.f32 %v428_v12, %v427_v10  ;;  %v559_v58 = vadd.f32 %v558_v46, %v557_v50  ;;  %v497_v60 = vsel %vm343_vm0, %v159_v47, 0.0  ;;  %v102_v62 = vld [vmem:[%s5544_s0 + $0x78] sm:$0xff]  ;;  %v107_v10 = vld [vmem:[%s5544_s0 + $0xa0] sm:$0xff]  ;;  %v216_v23 = vld [vmem:[%s5544_s0 + $0x408] sm:$0xff] }
  0x52   :  { %v496_v57 = vadd.f32 %v495_v45, %v494_v42  ;;  %v191_v12 = vld [vmem:[%s5544_s0 + $0x340] sm:$0xff]  ;;  %v373_v19 = vsel %vm343_vm0, %v102_v62, 0.0  ;;  %v217_v24 = vld [vmem:[%s5544_s0 + $0x410] sm:$0xff]  ;;  %v4394_v26 = vsel %vm343_vm0, %v104_v4, 0.0  ;;  %v4397_v27 = vsel %vm343_vm0, %v105_v5, 0.0  ;;  %v112_v35 = vld [vmem:[%s5544_s0 + $0xc8] sm:$0xff] }
  0x53   :  { %v364_v20 = vadd.f32 %v363_v9, %v362_v8  ;;  %v431_v37 = vadd.f32 %v430_v25, %v429_v22  ;;  %v561_v3 = vadd.f32 %v560_v53, %v559_v58  ;;  %v564_v9 = vsel %vm343_vm0, %v190_v55, 0.0  ;;  %v215_v22 = vld [vmem:[%s5544_s0 + $0x400] sm:$0xff]  ;;  %v113_v42 = vld [vmem:[%s5544_s0 + $0xd0] sm:$0xff]  ;;  %v114_v48 = vld [vmem:[%s5544_s0 + $0xd8] sm:$0xff] }
  0x54   :  { %v498_v14 = vadd.f32 %v497_v60, %v496_v57  ;;  %v4406_v31 = vsel %vm343_vm0, %v106_v6, 0.0  ;;  %v4409_v32 = vsel %vm343_vm0, %v107_v10, 0.0  ;;  %v4422_v38 = vsel %vm343_vm0, %v108_v11, 0.0  ;;  %v133_v43 = vld [vmem:[%s5544_s0 + $0x170] sm:$0xff]  ;;  %v219_v50 = vld [vmem:[%s5544_s0 + $0x420] sm:$0xff]  ;;  %v116_v60 = vld [vmem:[%s5544_s0 + $0xe8] sm:$0xff] }
  0x55   :  { %v366_v34 = vadd.f32 %v365_v21, %v364_v20  ;;  %v433_v52 = vadd.f32 %v432_v41, %v431_v37  ;;  %v563_v15 = vadd.f32 %v562_v61, %v561_v3  ;;  %v375_v20 = vsel %vm343_vm0, %v103_v63, 0.0  ;;  %v218_v37 = vld [vmem:[%s5544_s0 + $0x418] sm:$0xff]  ;;  %v115_v55 = vld [vmem:[%s5544_s0 + $0xe0] sm:$0xff]  ;;  %v193_v61 = vld [vmem:[%s5544_s0 + $0x350] sm:$0xff] }
  0x56   :  { %v499_v21 = vsel %vm343_vm0, %v160_v1, 0.0  ;;  %v4425_v39 = vsel %vm343_vm0, %v109_v16, 0.0  ;;  %v438_v40 = vsel %vm343_vm0, %v132_v17, 0.0  ;;  %v501_v44 = vsel %vm343_vm0, %v161_v18, 0.0  ;;  %v220_v62 = vld [vmem:[%s5544_s0 + $0x428] sm:$0xff]  ;;  %v117_v4 = vld [vmem:[%s5544_s0 + $0xf0] sm:$0xff] }
  0x57   :  { %v368_v49 = vadd.f32 %v367_v36, %v366_v34  ;;  %v435_v8 = vadd.f32 %v434_v56, %v433_v52  ;;  %v565_v28 = vadd.f32 %v564_v9, %v563_v15  ;;  %v566_v34 = vsel %vm343_vm0, %v191_v12, 0.0  ;;  %v192_v36 = vld [vmem:[%s5544_s0 + $0x348] sm:$0xff]  ;;  %v134_v5 = vld [vmem:[%s5544_s0 + $0x178] sm:$0xff]  ;;  %v163_v11 = vld [vmem:[%s5544_s0 + $0x260] sm:$0xff] }
  0x58   :  { %v500_v41 = vadd.f32 %v499_v21, %v498_v14  ;;  %v620_v45 = vsel %vm343_vm0, %v215_v22, 0.0  ;;  %v621_v46 = vsel %vm343_vm0, %v216_v23, 0.0  ;;  %v623_v47 = vsel %vm343_vm0, %v217_v24, 0.0  ;;  %v118_v10 = vld [vmem:[%s5544_s0 + $0xf8] sm:$0xff]  ;;  %v221_v12 = vld [vmem:[%s5544_s0 + $0x430] sm:$0xff]  ;;  %v135_v17 = vld [vmem:[%s5544_s0 + $0x180] sm:$0xff] }
  0x59   :  { %v370_v2 = vadd.f32 %v369_v51, %v368_v49  ;;  %v437_v33 = vadd.f32 %v436_v13, %v435_v8  ;;  %v162_v49 = vld [vmem:[%s5544_s0 + $0x258] sm:$0xff]  ;;  %v4448_v52 = vsel %vm343_vm0, %v110_v29, 0.0  ;;  %v567_v53 = vadd.f32 %v566_v34, %v565_v28 }
  0x5a   :  { %v622_v54 = vadd.f32 %v621_v46, %v620_v45  ;;  %v4454_v56 = vsel %vm343_vm0, %v111_v30, 0.0  ;;  %v568_v58 = vsel %vm343_vm0, %v192_v36, 0.0  ;;  %v625_v59 = vsel %vm343_vm0, %v218_v37, 0.0  ;;  %v194_v23 = vld [vmem:[%s5544_s0 + $0x358] sm:$0xff] }
  0x5b   :  { %v372_v25 = vadd.f32 %v371_v7, %v370_v2  ;;  %v439_v57 = vadd.f32 %v438_v40, %v437_v33  ;;  %v4468_v63 = vsel %vm343_vm0, %v112_v35, 0.0  ;;  %v440_v1 = vsel %vm343_vm0, %v133_v43, 0.0  ;;  %v222_v24 = vld [vmem:[%s5544_s0 + $0x438] sm:$0xff]  ;;  %v137_v33 = vld [vmem:[%s5544_s0 + $0x190] sm:$0xff]  ;;  %v139_v35 = vld [vmem:[%s5544_s0 + $0x1a0] sm:$0xff] }
  0x5c   :  { %v502_v2 = vadd.f32 %v501_v44, %v500_v41  ;;  %v624_v3 = vadd.f32 %v623_v47, %v622_v54  ;;  %v4478_v6 = vsel %vm343_vm0, %v113_v42, 0.0  ;;  %v4481_v7 = vsel %vm343_vm0, %v114_v48, 0.0  ;;  %v138_v34 = vld [vmem:[%s5544_s0 + $0x198] sm:$0xff]  ;;  %v140_v41 = vld [vmem:[%s5544_s0 + $0x1a8] sm:$0xff]  ;;  %v223_v43 = vld [vmem:[%s5544_s0 + $0x440] sm:$0xff] }
  0x5d   :  { %v374_v51 = vadd.f32 %v373_v19, %v372_v25  ;;  %v503_v8 = vsel %vm343_vm0, %v162_v49, 0.0  ;;  %v627_v9 = vsel %vm343_vm0, %v219_v50, 0.0  ;;  %v4495_v14 = vsel %vm343_vm0, %v115_v55, 0.0  ;;  %v164_v42 = vld [vmem:[%s5544_s0 + $0x268] sm:$0xff]  ;;  %v141_v48 = vld [vmem:[%s5544_s0 + $0x1b0] sm:$0xff]  ;;  %v142_v49 = vld [vmem:[%s5544_s0 + $0x1b8] sm:$0xff] }
  0x5e   :  { %v569_v15 = vadd.f32 %v568_v58, %v567_v53  ;;  %v626_v16 = vadd.f32 %v625_v59, %v624_v3  ;;  %v4501_v18 = vsel %vm343_vm0, %v116_v60, 0.0  ;;  %v441_v19 = vadd.f32 %v440_v1, %v439_v57  ;;  %v195_v55 = vld [vmem:[%s5544_s0 + $0x360] sm:$0xff]  ;;  %v224_v57 = vld [vmem:[%s5544_s0 + $0x448] sm:$0xff]  ;;  %v145_v1 = vld [vmem:[%s5544_s0 + $0x1d0] sm:$0xff] }
  0x5f   :  { %v376_v13 = vadd.f32 %v375_v20, %v374_v51  ;;  %v570_v21 = vsel %vm343_vm0, %v193_v61, 0.0  ;;  %v629_v22 = vsel %vm343_vm0, %v220_v62, 0.0  ;;  %v136_v20 = vld [vmem:[%s5544_s0 + $0x188] sm:$0xff]  ;;  %v4515_v25 = vsel %vm343_vm0, %v117_v4, 0.0 }
  0x60   :  { %v442_v28 = vsel %vm343_vm0, %v134_v5, 0.0  ;;  %v504_v29 = vadd.f32 %v503_v8, %v502_v2  ;;  %v628_v30 = vadd.f32 %v627_v9, %v626_v16  ;;  %v4528_v36 = vsel %vm343_vm0, %v118_v10, 0.0  ;;  %v144_v62 = vld [vmem:[%s5544_s0 + $0x1c8] sm:$0xff]  ;;  %v146_v8 = vld [vmem:[%s5544_s0 + $0x1d8] sm:$0xff]  ;;  %v165_v9 = vld [vmem:[%s5544_s0 + $0x270] sm:$0xff] }
  0x61   :  { %v505_v37 = vsel %vm343_vm0, %v163_v11, 0.0  ;;  %v631_v40 = vsel %vm343_vm0, %v221_v12, 0.0  ;;  %v378_v44 = vadd.f32 %v4394_v26, %v376_v13  ;;  %v444_v45 = vsel %vm343_vm0, %v135_v17, 0.0  ;;  %v143_v26 = vld [vmem:[%s5544_s0 + $0x1c0] sm:$0xff]  ;;  %v225_v10 = vld [vmem:[%s5544_s0 + $0x450] sm:$0xff]  ;;  %v148_v17 = vld [vmem:[%s5544_s0 + $0x1e8] sm:$0xff] }
  0x62   :  { %v571_v46 = vadd.f32 %v570_v21, %v569_v15  ;;  %v630_v47 = vadd.f32 %v629_v22, %v628_v30  ;;  %v443_v50 = vadd.f32 %v442_v28, %v441_v19  ;;  %v446_v51 = vsel %vm343_vm0, %v136_v20, 0.0  ;;  %v147_v16 = vld [vmem:[%s5544_s0 + $0x1e0] sm:$0xff]  ;;  %v149_v20 = vld [vmem:[%s5544_s0 + $0x1f0] sm:$0xff] }
  0x63   :  { %v572_v53 = vsel %vm343_vm0, %v194_v23, 0.0  ;;  %v633_v54 = vsel %vm343_vm0, %v222_v24, 0.0  ;;  %v4562_v58 = vsel %vm343_vm0, %v137_v33, 0.0  ;;  %v4565_v59 = vsel %vm343_vm0, %v138_v34, 0.0  ;;  %v196_v23 = vld [vmem:[%s5544_s0 + $0x368] sm:$0xff]  ;;  %v226_v24 = vld [vmem:[%s5544_s0 + $0x458] sm:$0xff] }
  0x64   :  { %v506_v60 = vadd.f32 %v505_v37, %v504_v29  ;;  %v632_v61 = vadd.f32 %v631_v40, %v630_v47  ;;  %v4574_v2 = vsel %vm343_vm0, %v139_v35, 0.0  ;;  %v4577_v3 = vsel %vm343_vm0, %v140_v41, 0.0  ;;  %v150_v34 = vld [vmem:[%s5544_s0 + $0x1f8] sm:$0xff] }
  0x65   :  { %v507_v4 = vsel %vm343_vm0, %v164_v42, 0.0  ;;  %v635_v5 = vsel %vm343_vm0, %v223_v43, 0.0  ;;  %v380_v11 = vadd.f32 %v4397_v27, %v378_v44  ;;  %v4592_v12 = vsel %vm343_vm0, %v141_v48, 0.0  ;;  %v166_v35 = vld [vmem:[%s5544_s0 + $0x278] sm:$0xff]  ;;  %v167_v43 = vld [vmem:[%s5544_s0 + $0x280] sm:$0xff] }
  0x66   :  { %v573_v13 = vadd.f32 %v572_v53, %v571_v46  ;;  %v634_v15 = vadd.f32 %v633_v54, %v632_v61  ;;  %v445_v19 = vadd.f32 %v444_v45, %v443_v50  ;;  %v4601_v21 = vsel %vm343_vm0, %v142_v49, 0.0  ;;  %v227_v44 = vld [vmem:[%s5544_s0 + $0x460] sm:$0xff]  ;;  %v197_v50 = vld [vmem:[%s5544_s0 + $0x370] sm:$0xff] }
  0x67   :  { %v574_v22 = vsel %vm343_vm0, %v195_v55, 0.0  ;;  %v637_v27 = vsel %vm343_vm0, %v224_v57, 0.0  ;;  %v4615_v28 = vsel %vm343_vm0, %v143_v26, 0.0  ;;  %v4618_v29 = vsel %vm343_vm0, %v144_v62, 0.0  ;;  %v247_v45 = vld [vmem:[%s5544_s0 + $0x500] sm:$0xff]  ;;  %v248_v57 = vld [vmem:[%s5544_s0 + $0x508] sm:$0xff] }
  0x68   :  { %v508_v30 = vadd.f32 %v507_v4, %v506_v60  ;;  %v636_v33 = vadd.f32 %v635_v5, %v634_v15  ;;  %v4627_v37 = vsel %vm343_vm0, %v145_v1, 0.0  ;;  %v4630_v40 = vsel %vm343_vm0, %v146_v8, 0.0  ;;  %v249_v60 = vld [vmem:[%s5544_s0 + $0x510] sm:$0xff]  ;;  %v168_v4 = vld [vmem:[%s5544_s0 + $0x288] sm:$0xff]  ;;  %v171_v15 = vld [vmem:[%s5544_s0 + $0x2a0] sm:$0xff] }
  0x69   :  { %v509_v41 = vsel %vm343_vm0, %v165_v9, 0.0  ;;  %v639_v42 = vsel %vm343_vm0, %v225_v10, 0.0  ;;  %v382_v46 = vadd.f32 %v4406_v31, %v380_v11  ;;  %v4645_v47 = vsel %vm343_vm0, %v147_v16, 0.0  ;;  %v228_v31 = vld [vmem:[%s5544_s0 + $0x468] sm:$0xff]  ;;  %v169_v5 = vld [vmem:[%s5544_s0 + $0x290] sm:$0xff]  ;;  %v250_v16 = vld [vmem:[%s5544_s0 + $0x518] sm:$0xff] }
  0x6a   :  { %v575_v48 = vadd.f32 %v574_v22, %v573_v13  ;;  %v638_v49 = vadd.f32 %v637_v27, %v636_v33  ;;  %v447_v53 = vadd.f32 %v446_v51, %v445_v19  ;;  %v4651_v54 = vsel %vm343_vm0, %v148_v17, 0.0  ;;  %v170_v13 = vld [vmem:[%s5544_s0 + $0x298] sm:$0xff] }
  0x6b   :  { %v576_v26 = vsel %vm343_vm0, %v196_v23, 0.0  ;;  %v641_v55 = vsel %vm343_vm0, %v226_v24, 0.0  ;;  %v4665_v51 = vsel %vm343_vm0, %v149_v20, 0.0  ;;  %v4668_v61 = vsel %vm343_vm0, %v150_v34, 0.0  ;;  %v229_v20 = vld [vmem:[%s5544_s0 + $0x470] sm:$0xff]  ;;  %v251_v34 = vld [vmem:[%s5544_s0 + $0x520] sm:$0xff] }
  0x6c   :  { %v510_v62 = vadd.f32 %v509_v41, %v508_v30  ;;  %v640_v1 = vadd.f32 %v639_v42, %v638_v49  ;;  %v511_v8 = vsel %vm343_vm0, %v166_v35, 0.0  ;;  %v513_v9 = vsel %vm343_vm0, %v167_v43, 0.0 }
  0x6d   :  { %v643_v10 = vsel %vm343_vm0, %v227_v44, 0.0  ;;  %v689_v11 = vsel %vm343_vm0, %v247_v45, 0.0  ;;  %v384_v17 = vadd.f32 %v4409_v32, %v382_v46  ;;  %v577_v19 = vadd.f32 %v576_v26, %v575_v48  ;;  %v198_v32 = vld [vmem:[%s5544_s0 + $0x378] sm:$0xff]  ;;  %v173_v44 = vld [vmem:[%s5544_s0 + $0x2b0] sm:$0xff]  ;;  %v252_v26 = vld [vmem:[%s5544_s0 + $0x528] sm:$0xff] }
  0x6e   :  { %v578_v22 = vsel %vm343_vm0, %v197_v50, 0.0  ;;  %v642_v27 = vadd.f32 %v641_v55, %v640_v1  ;;  %v449_v23 = vadd.f32 %v4562_v58, %v447_v53  ;;  %v645_v24 = vsel %vm343_vm0, %v228_v31, 0.0  ;;  %v172_v58 = vld [vmem:[%s5544_s0 + $0x2a8] sm:$0xff]  ;;  %v174_v50 = vld [vmem:[%s5544_s0 + $0x2b8] sm:$0xff]  ;;  %v175_v53 = vld [vmem:[%s5544_s0 + $0x2c0] sm:$0xff] }
  0x6f   :  { %v690_v30 = vsel %vm343_vm0, %v248_v57, 0.0  ;;  %v692_v33 = vsel %vm343_vm0, %v249_v60, 0.0  ;;  %v512_v35 = vadd.f32 %v511_v8, %v510_v62  ;;  %v515_v41 = vsel %vm343_vm0, %v168_v4, 0.0  ;;  %v176_v62 = vld [vmem:[%s5544_s0 + $0x2c8] sm:$0xff]  ;;  %v230_v1 = vld [vmem:[%s5544_s0 + $0x478] sm:$0xff] }
  0x70   :  { %v644_v42 = vadd.f32 %v643_v10, %v642_v27  ;;  %v691_v43 = vadd.f32 %v690_v30, %v689_v11  ;;  %v4712_v45 = vsel %vm343_vm0, %v169_v5, 0.0  ;;  %v4715_v46 = vsel %vm343_vm0, %v170_v13, 0.0  ;;  %v199_v11 = vld [vmem:[%s5544_s0 + $0x380] sm:$0xff]  ;;  %v253_v13 = vld [vmem:[%s5544_s0 + $0x530] sm:$0xff]  ;;  %v254_v30 = vld [vmem:[%s5544_s0 + $0x538] sm:$0xff] }
  0x71   :  { %v4718_v48 = vsel %vm343_vm0, %v171_v15, 0.0  ;;  %v694_v49 = vsel %vm343_vm0, %v250_v16, 0.0  ;;  %v579_v55 = vadd.f32 %v578_v22, %v577_v19  ;;  %v647_v57 = vsel %vm343_vm0, %v229_v20, 0.0  ;;  %v178_v19 = vld [vmem:[%s5544_s0 + $0x2d8] sm:$0xff] }
  0x72   :  { %v646_v31 = vadd.f32 %v645_v24, %v644_v42  ;;  %v693_v60 = vadd.f32 %v692_v33, %v691_v43  ;;  %v386_v4 = vadd.f32 %v4422_v38, %v384_v17  ;;  %v451_v5 = vadd.f32 %v4565_v59, %v449_v23  ;;  %v177_v17 = vld [vmem:[%s5544_s0 + $0x2d0] sm:$0xff]  ;;  %v179_v23 = vld [vmem:[%s5544_s0 + $0x2e0] sm:$0xff]  ;;  %v180_v24 = vld [vmem:[%s5544_s0 + $0x2e8] sm:$0xff] }
  0x73   :  { %v580_v8 = vsel %vm343_vm0, %v198_v32, 0.0  ;;  %v696_v10 = vsel %vm343_vm0, %v251_v34, 0.0  ;;  %v514_v15 = vadd.f32 %v513_v9, %v512_v35  ;;  %v4748_v16 = vsel %vm343_vm0, %v172_v58, 0.0  ;;  %v181_v42 = vld [vmem:[%s5544_s0 + $0x2f0] sm:$0xff]  ;;  %v231_v43 = vld [vmem:[%s5544_s0 + $0x480] sm:$0xff] }
  0x74   :  { %v4751_v38 = vsel %vm343_vm0, %v173_v44, 0.0  ;;  %v695_v59 = vadd.f32 %v694_v49, %v693_v60  ;;  %v4760_v22 = vsel %vm343_vm0, %v174_v50, 0.0  ;;  %v4763_v9 = vsel %vm343_vm0, %v175_v53, 0.0  ;;  %v200_v53 = vld [vmem:[%s5544_s0 + $0x388] sm:$0xff]  ;;  %v201_v60 = vld [vmem:[%s5544_s0 + $0x390] sm:$0xff] }
  0x75   :  { %v648_v27 = vadd.f32 %v647_v57, %v646_v31  ;;  %v698_v20 = vsel %vm343_vm0, %v252_v26, 0.0  ;;  %v4776_v33 = vsel %vm343_vm0, %v176_v62, 0.0  ;;  %v581_v32 = vadd.f32 %v580_v8, %v579_v55  ;;  %v255_v26 = vld [vmem:[%s5544_s0 + $0x540] sm:$0xff]  ;;  %v182_v57 = vld [vmem:[%s5544_s0 + $0x2f8] sm:$0xff] }
  0x76   :  { %v649_v34 = vsel %vm343_vm0, %v230_v1, 0.0  ;;  %v697_v35 = vadd.f32 %v696_v10, %v695_v59  ;;  %v388_v58 = vadd.f32 %v4425_v39, %v386_v4  ;;  %v453_v44 = vadd.f32 %v4574_v2, %v451_v5  ;;  %v202_v5 = vld [vmem:[%s5544_s0 + $0x398] sm:$0xff]  ;;  %v203_v8 = vld [vmem:[%s5544_s0 + $0x3a0] sm:$0xff]  ;;  %v256_v10 = vld [vmem:[%s5544_s0 + $0x548] sm:$0xff] }
  0x77   :  { %v582_v49 = vsel %vm343_vm0, %v199_v11, 0.0  ;;  %v700_v50 = vsel %vm343_vm0, %v253_v13, 0.0  ;;  %v516_v55 = vadd.f32 %v515_v41, %v514_v15  ;;  %v4796_v31 = vsel %vm343_vm0, %v177_v17, 0.0  ;;  %v204_v17 = vld [vmem:[%s5544_s0 + $0x3a8] sm:$0xff] }
  0x78   :  { %v4799_v39 = vsel %vm343_vm0, %v178_v19, 0.0  ;;  %v699_v2 = vadd.f32 %v698_v20, %v697_v35  ;;  %v4808_v62 = vsel %vm343_vm0, %v179_v23, 0.0  ;;  %v4811_v41 = vsel %vm343_vm0, %v180_v24, 0.0  ;;  %v232_v19 = vld [vmem:[%s5544_s0 + $0x488] sm:$0xff] }
  0x79   :  { %v650_v1 = vadd.f32 %v649_v34, %v648_v27  ;;  %v702_v4 = vsel %vm343_vm0, %v254_v30, 0.0  ;;  %v4824_v11 = vsel %vm343_vm0, %v181_v42, 0.0  ;;  %v583_v13 = vadd.f32 %v582_v49, %v581_v32  ;;  %v205_v30 = vld [vmem:[%s5544_s0 + $0x3b0] sm:$0xff]  ;;  %v206_v42 = vld [vmem:[%s5544_s0 + $0x3b8] sm:$0xff] }
  0x7a   :  { %v651_v15 = vsel %vm343_vm0, %v231_v43, 0.0  ;;  %v701_v59 = vadd.f32 %v700_v50, %v699_v2  ;;  %v390_v27 = vadd.f32 %v4448_v52, %v388_v58  ;;  %v455_v20 = vadd.f32 %v4577_v3, %v453_v44  ;;  %v257_v32 = vld [vmem:[%s5544_s0 + $0x550] sm:$0xff]  ;;  %v258_v43 = vld [vmem:[%s5544_s0 + $0x558] sm:$0xff]  ;;  %v279_v50 = vld [vmem:[%s5544_s0 + $0x600] sm:$0xff] }
  0x7b   :  { %v584_v23 = vsel %vm343_vm0, %v200_v53, 0.0  ;;  %v704_v24 = vsel %vm343_vm0, %v255_v26, 0.0  ;;  %v518_v34 = vadd.f32 %v4712_v45, %v516_v55  ;;  %v4845_v35 = vsel %vm343_vm0, %v182_v57, 0.0  ;;  %v280_v53 = vld [vmem:[%s5544_s0 + $0x608] sm:$0xff]  ;;  %v281_v26 = vld [vmem:[%s5544_s0 + $0x610] sm:$0xff] }
  0x7c   :  { %v586_v52 = vsel %vm343_vm0, %v201_v60, 0.0  ;;  %v703_v3 = vadd.f32 %v702_v4, %v701_v59  ;;  %v588_v58 = vsel %vm343_vm0, %v202_v5, 0.0  ;;  %v4856_v44 = vsel %vm343_vm0, %v203_v8, 0.0  ;;  %v282_v59 = vld [vmem:[%s5544_s0 + $0x618] sm:$0xff] }
  0x7d   :  { %v652_v45 = vadd.f32 %v651_v15, %v650_v1  ;;  %v706_v49 = vsel %vm343_vm0, %v256_v10, 0.0  ;;  %v585_v55 = vadd.f32 %v584_v23, %v583_v13  ;;  %v4869_v2 = vsel %vm343_vm0, %v204_v17, 0.0  ;;  %v233_v1 = vld [vmem:[%s5544_s0 + $0x490] sm:$0xff]  ;;  %v207_v13 = vld [vmem:[%s5544_s0 + $0x3c0] sm:$0xff] }
  0x7e   :  { %v653_v57 = vsel %vm343_vm0, %v232_v19, 0.0  ;;  %v705_v60 = vadd.f32 %v704_v24, %v703_v3  ;;  %v392_v4 = vadd.f32 %v4454_v56, %v390_v27  ;;  %v457_v5 = vadd.f32 %v4592_v12, %v455_v20  ;;  %v259_v15 = vld [vmem:[%s5544_s0 + $0x560] sm:$0xff]  ;;  %v208_v27 = vld [vmem:[%s5544_s0 + $0x3c8] sm:$0xff] }
  0x7f   :  { %v4878_v8 = vsel %vm343_vm0, %v205_v30, 0.0  ;;  %v708_v10 = vsel %vm343_vm0, %v257_v32, 0.0  ;;  %v520_v56 = vadd.f32 %v4715_v46, %v518_v34  ;;  %v4892_v12 = vsel %vm343_vm0, %v206_v42, 0.0  ;;  %v209_v46 = vld [vmem:[%s5544_s0 + $0x3d0] sm:$0xff]  ;;  %v260_v32 = vld [vmem:[%s5544_s0 + $0x568] sm:$0xff]  ;;  %v283_v34 = vld [vmem:[%s5544_s0 + $0x620] sm:$0xff] }
  0x80   :  { %v707_v17 = vadd.f32 %v706_v49, %v705_v60  ;;  %v710_v19 = vsel %vm343_vm0, %v258_v43, 0.0  ;;  %v654_v20 = vadd.f32 %v653_v57, %v652_v45  ;;  %v758_v23 = vsel %vm343_vm0, %v279_v50, 0.0  ;;  %v234_v49 = vld [vmem:[%s5544_s0 + $0x498] sm:$0xff] }
  0x81   :  { %v759_v24 = vsel %vm343_vm0, %v280_v53, 0.0  ;;  %v761_v30 = vsel %vm343_vm0, %v281_v26, 0.0  ;;  %v587_v3 = vadd.f32 %v586_v52, %v585_v55  ;;  %v655_v42 = vsel %vm343_vm0, %v233_v1, 0.0  ;;  %v261_v52 = vld [vmem:[%s5544_s0 + $0x570] sm:$0xff]  ;;  %v284_v55 = vld [vmem:[%s5544_s0 + $0x628] sm:$0xff] }
  0x82   :  { %v709_v43 = vadd.f32 %v708_v10, %v707_v17  ;;  %v760_v45 = vadd.f32 %v759_v24, %v758_v23  ;;  %v459_v50 = vadd.f32 %v4601_v21, %v457_v5  ;;  %v4916_v53 = vsel %vm343_vm0, %v207_v13, 0.0  ;;  %v210_v10 = vld [vmem:[%s5544_s0 + $0x3d8] sm:$0xff] }
  0x83   :  { %v712_v26 = vsel %vm343_vm0, %v259_v15, 0.0  ;;  %v763_v57 = vsel %vm343_vm0, %v282_v59, 0.0  ;;  %v522_v60 = vadd.f32 %v4718_v48, %v520_v56  ;;  %v4928_v1 = vsel %vm343_vm0, %v208_v27, 0.0  ;;  %v211_v48 = vld [vmem:[%s5544_s0 + $0x3e0] sm:$0xff]  ;;  %v262_v56 = vld [vmem:[%s5544_s0 + $0x578] sm:$0xff] }
  0x84   :  { %v711_v21 = vadd.f32 %v710_v19, %v709_v43  ;;  %v762_v5 = vadd.f32 %v761_v30, %v760_v45  ;;  %v4934_v13 = vsel %vm343_vm0, %v209_v46, 0.0  ;;  %v656_v15 = vadd.f32 %v655_v42, %v654_v20  ;;  %v285_v19 = vld [vmem:[%s5544_s0 + $0x630] sm:$0xff]  ;;  %v235_v30 = vld [vmem:[%s5544_s0 + $0x4a0] sm:$0xff]  ;;  %v286_v43 = vld [vmem:[%s5544_s0 + $0x638] sm:$0xff] }
  0x85   :  { %v714_v59 = vsel %vm343_vm0, %v260_v32, 0.0  ;;  %v765_v17 = vsel %vm343_vm0, %v283_v34, 0.0  ;;  %v589_v27 = vadd.f32 %v588_v58, %v587_v3  ;;  %v657_v23 = vsel %vm343_vm0, %v234_v49, 0.0  ;;  %v212_v58 = vld [vmem:[%s5544_s0 + $0x3e8] sm:$0xff]  ;;  %v263_v3 = vld [vmem:[%s5544_s0 + $0x580] sm:$0xff]  ;;  %v213_v49 = vld [vmem:[%s5544_s0 + $0x3f0] sm:$0xff] }
  0x86   :  { %v713_v20 = vadd.f32 %v712_v26, %v711_v21  ;;  %v764_v24 = vadd.f32 %v763_v57, %v762_v5  ;;  %v394_v46 = vadd.f32 %v4468_v63, %v392_v4  ;;  %v461_v32 = vadd.f32 %v4615_v28, %v459_v50 }
  0x87   :  { %v716_v34 = vsel %vm343_vm0, %v261_v52, 0.0  ;;  %v767_v42 = vsel %vm343_vm0, %v284_v55, 0.0  ;;  %v524_v63 = vadd.f32 %v4748_v16, %v522_v60  ;;  %v4966_v28 = vsel %vm343_vm0, %v210_v10, 0.0  ;;  %v264_v16 = vld [vmem:[%s5544_s0 + $0x588] sm:$0xff]  ;;  %v287_v55 = vld [vmem:[%s5544_s0 + $0x640] sm:$0xff] }
  0x88   :  { %v715_v4 = vadd.f32 %v714_v59, %v713_v20  ;;  %v766_v45 = vadd.f32 %v765_v17, %v764_v24  ;;  %v4972_v50 = vsel %vm343_vm0, %v211_v48, 0.0  ;;  %v658_v26 = vadd.f32 %v657_v23, %v656_v15  ;;  %v236_v15 = vld [vmem:[%s5544_s0 + $0x4a8] sm:$0xff] }
  0x89   :  { %v718_v57 = vsel %vm343_vm0, %v262_v56, 0.0  ;;  %v769_v52 = vsel %vm343_vm0, %v285_v19, 0.0  ;;  %v591_v60 = vadd.f32 %v4856_v44, %v589_v27  ;;  %v659_v21 = vsel %vm343_vm0, %v235_v30, 0.0  ;;  %v214_v44 = vld [vmem:[%s5544_s0 + $0x3f8] sm:$0xff]  ;;  %v265_v19 = vld [vmem:[%s5544_s0 + $0x590] sm:$0xff]  ;;  %v288_v27 = vld [vmem:[%s5544_s0 + $0x648] sm:$0xff] }
  0x8a   :  { %v717_v5 = vadd.f32 %v716_v34, %v715_v4  ;;  %v768_v10 = vadd.f32 %v767_v42, %v766_v45  ;;  %v463_v59 = vadd.f32 %v4618_v29, %v461_v32  ;;  %v4989_v17 = vsel %vm343_vm0, %v212_v58, 0.0  ;;  %v237_v30 = vld [vmem:[%s5544_s0 + $0x4b0] sm:$0xff]  ;;  %v238_v45 = vld [vmem:[%s5544_s0 + $0x4b8] sm:$0xff] }
  0x8b   :  { %v720_v48 = vsel %vm343_vm0, %v263_v3, 0.0  ;;  %v771_v56 = vsel %vm343_vm0, %v286_v43, 0.0  ;;  %v526_v29 = vadd.f32 %v4751_v38, %v524_v63  ;;  %v5004_v23 = vsel %vm343_vm0, %v213_v49, 0.0  ;;  %v266_v38 = vld [vmem:[%s5544_s0 + $0x598] sm:$0xff]  ;;  %v289_v3 = vld [vmem:[%s5544_s0 + $0x650] sm:$0xff]  ;;  %v311_v43 = vld [vmem:[%s5544_s0 + $0x700] sm:$0xff] }
  0x8c   :  { %v719_v20 = vadd.f32 %v718_v57, %v717_v5  ;;  %v770_v24 = vadd.f32 %v769_v52, %v768_v10  ;;  %v5010_v32 = vadd.f32 %v4478_v6, %v394_v46  ;;  %v660_v34 = vadd.f32 %v659_v21, %v658_v26  ;;  %v267_v49 = vld [vmem:[%s5544_s0 + $0x5a0] sm:$0xff] }
  0x8d   :  { %v722_v42 = vsel %vm343_vm0, %v264_v16, 0.0  ;;  %v773_v58 = vsel %vm343_vm0, %v287_v55, 0.0  ;;  %v593_v6 = vadd.f32 %v4869_v2, %v591_v60  ;;  %v661_v46 = vsel %vm343_vm0, %v236_v15, 0.0  ;;  %v290_v16 = vld [vmem:[%s5544_s0 + $0x658] sm:$0xff]  ;;  %v312_v55 = vld [vmem:[%s5544_s0 + $0x708] sm:$0xff] }
  0x8e   :  { %v721_v63 = vadd.f32 %v720_v48, %v719_v20  ;;  %v772_v4 = vadd.f32 %v771_v56, %v770_v24  ;;  %v5032_v26 = vadd.f32 %v4627_v37, %v463_v59  ;;  %v5035_v57 = vsel %vm343_vm0, %v214_v44, 0.0  ;;  %v313_v37 = vld [vmem:[%s5544_s0 + $0x710] sm:$0xff]  ;;  %v268_v44 = vld [vmem:[%s5544_s0 + $0x5a8] sm:$0xff] }
  0x8f   :  { %v724_v2 = vsel %vm343_vm0, %v265_v19, 0.0  ;;  %v775_v52 = vsel %vm343_vm0, %v288_v27, 0.0  ;;  %v528_v60 = vadd.f32 %v4760_v22, %v526_v29  ;;  %v663_v21 = vsel %vm343_vm0, %v237_v30, 0.0  ;;  %v291_v19 = vld [vmem:[%s5544_s0 + $0x660] sm:$0xff]  ;;  %v314_v22 = vld [vmem:[%s5544_s0 + $0x718] sm:$0xff] }
  0x90   :  { %v723_v5 = vadd.f32 %v722_v42, %v721_v63  ;;  %v774_v10 = vadd.f32 %v773_v58, %v772_v4  ;;  %v662_v15 = vadd.f32 %v661_v46, %v660_v34  ;;  %v726_v59 = vsel %vm343_vm0, %v266_v38, 0.0  ;;  %v239_v30 = vld [vmem:[%s5544_s0 + $0x4c0] sm:$0xff] }
  0x91   :  { %v777_v48 = vsel %vm343_vm0, %v289_v3, 0.0  ;;  %v827_v56 = vsel %vm343_vm0, %v311_v43, 0.0  ;;  %v595_v27 = vadd.f32 %v4878_v8, %v593_v6  ;;  %v665_v29 = vsel %vm343_vm0, %v238_v45, 0.0  ;;  %v269_v8 = vld [vmem:[%s5544_s0 + $0x5b0] sm:$0xff]  ;;  %v292_v3 = vld [vmem:[%s5544_s0 + $0x668] sm:$0xff]  ;;  %v315_v43 = vld [vmem:[%s5544_s0 + $0x720] sm:$0xff] }
  0x92   :  { %v725_v20 = vadd.f32 %v724_v2, %v723_v5  ;;  %v776_v24 = vadd.f32 %v775_v52, %v774_v10  ;;  %v728_v34 = vsel %vm343_vm0, %v267_v49, 0.0  ;;  %v779_v42 = vsel %vm343_vm0, %v290_v16, 0.0  ;;  %v270_v16 = vld [vmem:[%s5544_s0 + $0x5b8] sm:$0xff] }
  0x93   :  { %v828_v58 = vsel %vm343_vm0, %v312_v55, 0.0  ;;  %v830_v38 = vsel %vm343_vm0, %v313_v37, 0.0  ;;  %v530_v6 = vadd.f32 %v4763_v9, %v528_v60  ;;  %v664_v45 = vadd.f32 %v663_v21, %v662_v15  ;;  %v293_v55 = vld [vmem:[%s5544_s0 + $0x670] sm:$0xff]  ;;  %v316_v9 = vld [vmem:[%s5544_s0 + $0x728] sm:$0xff] }
  0x94   :  { %v727_v46 = vadd.f32 %v726_v59, %v725_v20  ;;  %v778_v63 = vadd.f32 %v777_v48, %v776_v24  ;;  %v829_v4 = vadd.f32 %v828_v58, %v827_v56  ;;  %v730_v49 = vsel %vm343_vm0, %v268_v44, 0.0  ;;  %v294_v56 = vld [vmem:[%s5544_s0 + $0x678] sm:$0xff]  ;;  %v317_v44 = vld [vmem:[%s5544_s0 + $0x730] sm:$0xff]  ;;  %v240_v20 = vld [vmem:[%s5544_s0 + $0x4c8] sm:$0xff] }
  0x95   :  { %v781_v2 = vsel %vm343_vm0, %v291_v19, 0.0  ;;  %v832_v52 = vsel %vm343_vm0, %v314_v22, 0.0  ;;  %v597_v37 = vadd.f32 %v4892_v12, %v595_v27  ;;  %v667_v10 = vsel %vm343_vm0, %v239_v30, 0.0  ;;  %v271_v58 = vld [vmem:[%s5544_s0 + $0x5c0] sm:$0xff] }
  0x96   :  { %v729_v60 = vadd.f32 %v728_v34, %v727_v46  ;;  %v780_v21 = vadd.f32 %v779_v42, %v778_v63  ;;  %v831_v5 = vadd.f32 %v830_v38, %v829_v4  ;;  %v732_v15 = vsel %vm343_vm0, %v269_v8, 0.0  ;;  %v318_v38 = vld [vmem:[%s5544_s0 + $0x738] sm:$0xff] }
  0x97   :  { %v783_v59 = vsel %vm343_vm0, %v292_v3, 0.0  ;;  %v834_v48 = vsel %vm343_vm0, %v315_v43, 0.0  ;;  %v532_v12 = vadd.f32 %v4776_v33, %v530_v6  ;;  %v666_v24 = vadd.f32 %v665_v29, %v664_v45  ;;  %v295_v33 = vld [vmem:[%s5544_s0 + $0x680] sm:$0xff]  ;;  %v296_v45 = vld [vmem:[%s5544_s0 + $0x688] sm:$0xff] }
  0x98   :  { %v731_v19 = vadd.f32 %v730_v49, %v729_v60  ;;  %v782_v22 = vadd.f32 %v781_v2, %v780_v21  ;;  %v833_v27 = vadd.f32 %v832_v52, %v831_v5  ;;  %v734_v30 = vsel %vm343_vm0, %v270_v16, 0.0  ;;  %v320_v60 = vld [vmem:[%s5544_s0 + $0x748] sm:$0xff] }
  0x99   :  { %v785_v34 = vsel %vm343_vm0, %v293_v55, 0.0  ;;  %v836_v42 = vsel %vm343_vm0, %v316_v9, 0.0  ;;  %v599_v29 = vadd.f32 %v4916_v53, %v597_v37  ;;  %v398_v6 = vadd.f32 %v4481_v7, %v5010_v32  ;;  %v319_v53 = vld [vmem:[%s5544_s0 + $0x740] sm:$0xff]  ;;  %v272_v9 = vld [vmem:[%s5544_s0 + $0x5c8] sm:$0xff]  ;;  %v297_v37 = vld [vmem:[%s5544_s0 + $0x690] sm:$0xff] }
  0x9a   :  { %v733_v8 = vadd.f32 %v732_v15, %v731_v19  ;;  %v784_v3 = vadd.f32 %v783_v59, %v782_v22  ;;  %v835_v43 = vadd.f32 %v834_v48, %v833_v27  ;;  %v467_v46 = vadd.f32 %v4630_v40, %v5032_v26  ;;  %v241_v40 = vld [vmem:[%s5544_s0 + $0x4d0] sm:$0xff]  ;;  %v298_v19 = vld [vmem:[%s5544_s0 + $0x698] sm:$0xff] }
  0x9b   :  { %v787_v63 = vsel %vm343_vm0, %v294_v56, 0.0  ;;  %v838_v4 = vsel %vm343_vm0, %v317_v44, 0.0  ;;  %v669_v49 = vsel %vm343_vm0, %v240_v20, 0.0  ;;  %v668_v32 = vadd.f32 %v667_v10, %v666_v24 }
  0x9c   :  { %v735_v2 = vadd.f32 %v734_v30, %v733_v8  ;;  %v786_v52 = vadd.f32 %v785_v34, %v784_v3  ;;  %v837_v7 = vadd.f32 %v836_v42, %v835_v43  ;;  %v736_v26 = vsel %vm343_vm0, %v271_v58, 0.0  ;;  %v273_v34 = vld [vmem:[%s5544_s0 + $0x5d0] sm:$0xff]  ;;  %v299_v42 = vld [vmem:[%s5544_s0 + $0x6a0] sm:$0xff]  ;;  %v322_v58 = vld [vmem:[%s5544_s0 + $0x758] sm:$0xff] }
  0x9d   :  { %v789_v16 = vsel %vm343_vm0, %v295_v33, 0.0  ;;  %v840_v55 = vsel %vm343_vm0, %v318_v38, 0.0  ;;  %v534_v21 = vadd.f32 %v4796_v31, %v532_v12  ;;  %v601_v5 = vadd.f32 %v4928_v1, %v599_v29  ;;  %v321_v31 = vld [vmem:[%s5544_s0 + $0x750] sm:$0xff]  ;;  %v300_v3 = vld [vmem:[%s5544_s0 + $0x6a8] sm:$0xff] }
  0x9e   :  { %v788_v10 = vadd.f32 %v787_v63, %v786_v52  ;;  %v839_v15 = vadd.f32 %v838_v4, %v837_v7  ;;  %v400_v59 = vadd.f32 %v4495_v14, %v398_v6  ;;  %v469_v48 = vadd.f32 %v4645_v47, %v467_v46  ;;  %v242_v14 = vld [vmem:[%s5544_s0 + $0x4d8] sm:$0xff] }
  0x9f   :  { %v791_v56 = vsel %vm343_vm0, %v296_v45, 0.0  ;;  %v842_v44 = vsel %vm343_vm0, %v319_v53, 0.0  ;;  %v671_v1 = vsel %vm343_vm0, %v241_v40, 0.0  ;;  %v737_v12 = vadd.f32 %v736_v26, %v735_v2  ;;  %v5192_v2 = vld [vmem:[#allocation2 + $0x18] sm:$0xff]  ;;  %v324_v26 = vld [vmem:[%s5544_s0 + $0x768] sm:$0xff] }
  0xa0   :  { %v790_v22 = vadd.f32 %v789_v16, %v788_v10  ;;  %v841_v27 = vadd.f32 %v840_v55, %v839_v15  ;;  %v670_v47 = vadd.f32 %v669_v49, %v668_v32  ;;  %v738_v20 = vsel %vm343_vm0, %v272_v9, 0.0  ;;  %v5190_v49 = vld [vmem:[#allocation2 + $0x10] sm:$0xff]  ;;  %v274_v40 = vld [vmem:[%s5544_s0 + $0x5d8] sm:$0xff] }
  0xa1   :  { %v793_v24 = vsel %vm343_vm0, %v297_v37, 0.0  ;;  %v844_v30 = vsel %vm343_vm0, %v320_v60, 0.0  ;;  %v536_v33 = vadd.f32 %v4799_v39, %v534_v21  ;;  %v603_v38 = vadd.f32 %v4934_v13, %v601_v5  ;;  %v323_v39 = vld [vmem:[%s5544_s0 + $0x760] sm:$0xff]  ;;  %v301_v32 = vld [vmem:[%s5544_s0 + $0x6b0] sm:$0xff] }
  0xa2   :  { %v792_v29 = vadd.f32 %v791_v56, %v790_v22  ;;  %v843_v8 = vadd.f32 %v842_v44, %v841_v27  ;;  %v402_v43 = vadd.f32 %v4501_v18, %v400_v59  ;;  %v471_v6 = vadd.f32 %v4651_v54, %v469_v48  ;;  %v243_v60 = vld [vmem:[%s5544_s0 + $0x4e0] sm:$0xff]  ;;  %v326_v27 = vld [vmem:[%s5544_s0 + $0x778] sm:$0xff] }
  0xa3   :  { %v795_v46 = vsel %vm343_vm0, %v298_v19, 0.0  ;;  %v846_v63 = vsel %vm343_vm0, %v321_v31, 0.0  ;;  %v673_v13 = vsel %vm343_vm0, %v242_v14, 0.0  ;;  %v739_v4 = vadd.f32 %v738_v20, %v737_v12  ;;  %v275_v22 = vld [vmem:[%s5544_s0 + $0x5e0] sm:$0xff] }
  0xa4   :  { %v794_v45 = vadd.f32 %v793_v24, %v792_v29  ;;  %v845_v53 = vadd.f32 %v844_v30, %v843_v8  ;;  %v672_v18 = vadd.f32 %v671_v1, %v670_v47  ;;  %v740_v54 = vsel %vm343_vm0, %v273_v34, 0.0  ;;  %v244_v30 = vld [vmem:[%s5544_s0 + $0x4e8] sm:$0xff] }
  0xa5   :  { %v797_v52 = vsel %vm343_vm0, %v299_v42, 0.0  ;;  %v848_v7 = vsel %vm343_vm0, %v322_v58, 0.0  ;;  %v538_v16 = vadd.f32 %v4808_v62, %v536_v33  ;;  %v605_v55 = vadd.f32 %v4966_v28, %v603_v38  ;;  %v302_v62 = vld [vmem:[%s5544_s0 + $0x6b8] sm:$0xff]  ;;  %v325_v28 = vld [vmem:[%s5544_s0 + $0x770] sm:$0xff]  ;;  %v327_v38 = vld [vmem:[%s5544_s0 + $0x780] sm:$0xff] }
  0xa6   :  { %v796_v9 = vadd.f32 %v795_v46, %v794_v45  ;;  %v847_v37 = vadd.f32 %v846_v63, %v845_v53  ;;  %v799_v21 = vsel %vm343_vm0, %v300_v3, 0.0  ;;  %v850_v5 = vsel %vm343_vm0, %v323_v39, 0.0  ;;  %v276_v63 = vld [vmem:[%s5544_s0 + $0x5e8] sm:$0xff]  ;;  %v305_v39 = vld [vmem:[%s5544_s0 + $0x6d0] sm:$0xff] }
  0xa7   :  { %v1020_v10 = vcombine.high %v5190_v49, %v5190_v49  ;;  %v1021_v15 = vcombine.high %v5192_v2, %v5192_v2  ;;  %v404_v59 = vadd.f32 %v4515_v25, %v402_v43  ;;  %v741_v48 = vadd.f32 %v740_v54, %v739_v4  ;;  %v303_v25 = vld [vmem:[%s5544_s0 + $0x6c0] sm:$0xff] }
  0xa8   :  { %v798_v56 = vadd.f32 %v797_v52, %v796_v9  ;;  %v849_v44 = vadd.f32 %v848_v7, %v847_v37  ;;  %v674_v19 = vadd.f32 %v673_v13, %v672_v18  ;;  %v742_v31 = vsel %vm343_vm0, %v274_v40, 0.0  ;;  %v245_v18 = vld [vmem:[%s5544_s0 + $0x4f0] sm:$0xff] }
  0xa9   :  { %v801_v1 = vsel %vm343_vm0, %v301_v32, 0.0  ;;  %v852_v12 = vsel %vm343_vm0, %v324_v26, 0.0  ;;  %3906 = vmatprep.subr.msk.mxu0 %vm1028_vm1, %v1020_v10  ;;  %3909 = vmatprep.subr.msk.mxu1 %vm1028_vm1, %v1021_v15  ;;  %v607_v14 = vadd.f32 %v4972_v50, %v605_v55  ;;  %v675_v47 = vsel %vm343_vm0, %v243_v60, 0.0  ;;  %v304_v50 = vld [vmem:[%s5544_s0 + $0x6c8] sm:$0xff]  ;;  %v329_v32 = vld [vmem:[%s5544_s0 + $0x790] sm:$0xff]  ;;  %v330_v10 = vld [vmem:[%s5544_s0 + $0x798] sm:$0xff] }
  0xaa   :  { %v800_v20 = vadd.f32 %v799_v21, %v798_v56  ;;  %v851_v24 = vadd.f32 %v850_v5, %v849_v44  ;;  %v473_v34 = vadd.f32 %v4665_v51, %v471_v6  ;;  %v540_v42 = vadd.f32 %v4811_v41, %v538_v16  ;;  %v277_v21 = vld [vmem:[%s5544_s0 + $0x5f0] sm:$0xff]  ;;  %v307_v5 = vld [vmem:[%s5544_s0 + $0x6e0] sm:$0xff] }
  0xab   :  { %v803_v58 = vsel %vm343_vm0, %v302_v62, 0.0  ;;  %v854_v33 = vsel %vm343_vm0, %v325_v28, 0.0  ;;  %v406_v29 = vadd.f32 %v4528_v36, %v404_v59  ;;  %v743_v8 = vadd.f32 %v742_v31, %v741_v48  ;;  %v328_v36 = vld [vmem:[%s5544_s0 + $0x788] sm:$0xff]  ;;  %v246_v48 = vld [vmem:[%s5544_s0 + $0x4f8] sm:$0xff] }
  0xac   :  { %v802_v3 = vadd.f32 %v801_v1, %v800_v20  ;;  %v853_v43 = vadd.f32 %v852_v12, %v851_v24  ;;  %v676_v51 = vadd.f32 %v675_v47, %v674_v19  ;;  %v744_v41 = vsel %vm343_vm0, %v275_v22, 0.0  ;;  %v308_v1 = vld [vmem:[%s5544_s0 + $0x6e8] sm:$0xff]  ;;  %v278_v24 = vld [vmem:[%s5544_s0 + $0x5f8] sm:$0xff] }
  0xad   :  { %v805_v6 = vsel %vm343_vm0, %v303_v25, 0.0  ;;  %v856_v46 = vsel %vm343_vm0, %v326_v27, 0.0  ;;  %v609_v13 = vadd.f32 %v4989_v17, %v607_v14  ;;  %v677_v4 = vsel %vm343_vm0, %v244_v30, 0.0  ;;  %v306_v17 = vld [vmem:[%s5544_s0 + $0x6d8] sm:$0xff]  ;;  %v309_v30 = vld [vmem:[%s5544_s0 + $0x6f0] sm:$0xff] }
  0xae   :  { %v804_v45 = vadd.f32 %v803_v58, %v802_v3  ;;  %v855_v53 = vadd.f32 %v854_v33, %v853_v43  ;;  %v475_v54 = vadd.f32 %v4668_v61, %v473_v34  ;;  %v542_v52 = vadd.f32 %v4824_v11, %v540_v42  ;;  %v332_v34 = vld [vmem:[%s5544_s0 + $0x7a8] sm:$0xff]  ;;  %v333_v43 = vld [vmem:[%s5544_s0 + $0x7b0] sm:$0xff] }
  0xaf   :  { %v807_v7 = vsel %vm343_vm0, %v304_v50, 0.0  ;;  %v858_v40 = vsel %vm343_vm0, %v327_v38, 0.0  ;;  %v407_v26 = vrot.slane %v406_v29, 4  ;;  %v745_v16 = vadd.f32 %v744_v41, %v743_v8 }
  0xb0   :  { %v806_v55 = vadd.f32 %v805_v6, %v804_v45  ;;  %v857_v9 = vadd.f32 %v856_v46, %v855_v53  ;;  %v678_v37 = vadd.f32 %v677_v4, %v676_v51  ;;  %v746_v61 = vsel %vm343_vm0, %v276_v63, 0.0 }
  0xb1   :  { %v809_v11 = vsel %vm343_vm0, %v305_v39, 0.0  ;;  %v860_v60 = vsel %vm343_vm0, %v328_v36, 0.0  ;;  %v611_v15 = vadd.f32 %v5004_v23, %v609_v13  ;;  %v679_v62 = vsel %vm343_vm0, %v245_v18, 0.0  ;;  %v331_v23 = vld [vmem:[%s5544_s0 + $0x7a0] sm:$0xff]  ;;  %v334_v13 = vld [vmem:[%s5544_s0 + $0x7b8] sm:$0xff] }
  0xb2   :  { %v808_v28 = vadd.f32 %v807_v7, %v806_v55  ;;  %v859_v59 = vadd.f32 %v858_v40, %v857_v9  ;;  %v476_v56 = vrot.slane %v475_v54, 4  ;;  %v544_v44 = vadd.f32 %v4845_v35, %v542_v52  ;;  %v335_v40 = vld [vmem:[%s5544_s0 + $0x7c0] sm:$0xff] }
  0xb3   :  { %v811_v19 = vsel %vm343_vm0, %v306_v17, 0.0  ;;  %v862_v31 = vsel %vm343_vm0, %v329_v32, 0.0  ;;  %v408_v12 = vadd.f32 %v407_v26, %v406_v29  ;;  %v747_v22 = vadd.f32 %v746_v61, %v745_v16 }
  0xb4   :  { %v810_v25 = vadd.f32 %v809_v11, %v808_v28  ;;  %v861_v27 = vadd.f32 %v860_v60, %v859_v59  ;;  %v680_v14 = vadd.f32 %v679_v62, %v678_v37  ;;  %v748_v47 = vsel %vm343_vm0, %v277_v21, 0.0  ;;  %v336_v37 = vld [vmem:[%s5544_s0 + $0x7c8] sm:$0xff] }
  0xb5   :  { %v813_v35 = vsel %vm343_vm0, %v307_v5, 0.0  ;;  %v864_v20 = vsel %vm343_vm0, %v330_v10, 0.0  ;;  %v613_v42 = vadd.f32 %v5035_v57, %v611_v15  ;;  %v681_v58 = vsel %vm343_vm0, %v246_v48, 0.0  ;;  %v310_v57 = vld [vmem:[%s5544_s0 + $0x6f8] sm:$0xff]  ;;  %v337_v10 = vld [vmem:[%s5544_s0 + $0x7d0] sm:$0xff] }
  0xb6   :  { %v812_v33 = vadd.f32 %v811_v19, %v810_v25  ;;  %v863_v50 = vadd.f32 %v862_v31, %v861_v27  ;;  %v477_v38 = vadd.f32 %v476_v56, %v475_v54  ;;  %v545_v29 = vrot.slane %v544_v44, 4 }
  0xb7   :  { %v815_v8 = vsel %vm343_vm0, %v308_v1, 0.0  ;;  %v866_v3 = vsel %vm343_vm0, %v331_v23, 0.0  ;;  %v749_v51 = vadd.f32 %v748_v47, %v747_v22  ;;  %v682_v46 = vadd.f32 %v681_v58, %v680_v14 }
  0xb8   :  { %v814_v41 = vadd.f32 %v813_v35, %v812_v33  ;;  %v865_v6 = vadd.f32 %v864_v20, %v863_v50  ;;  %v750_v63 = vsel %vm343_vm0, %v278_v24, 0.0  ;;  %v817_v39 = vsel %vm343_vm0, %v309_v30, 0.0  ;;  %v340_v24 = vld [vmem:[%s5544_s0 + $0x7e8] sm:$0xff]  ;;  %v341_v50 = vld [vmem:[%s5544_s0 + $0x7f0] sm:$0xff] }
  0xb9   :  { %v868_v36 = vsel %vm343_vm0, %v332_v34, 0.0  ;;  %v614_v4 = vrot.slane %v613_v42, 4  ;;  %v409_v18 = vrot.slane %v408_v12, 2  ;;  %v478_v54 = vrot.slane %v477_v38, 2 }
  0xba   :  { %v816_v45 = vadd.f32 %v815_v8, %v814_v41  ;;  %v867_v53 = vadd.f32 %v866_v3, %v865_v6  ;;  %v546_v52 = vadd.f32 %v545_v29, %v544_v44  ;;  %v870_v7 = vsel %vm343_vm0, %v333_v43, 0.0  ;;  %v338_v44 = vld [vmem:[%s5544_s0 + $0x7d8] sm:$0xff] }
  0xbb   :  { %v751_v17 = vadd.f32 %v750_v63, %v749_v51  ;;  %v819_v26 = vsel %vm343_vm0, %v310_v57, 0.0  ;;  %v683_v55 = vrot.slane %v682_v46, 4  ;;  %v872_v9 = vsel %vm343_vm0, %v334_v13, 0.0  ;;  %v342_v41 = vld [vmem:[%s5544_s0 + $0x7f8] sm:$0xff] }
  0xbc   :  { %v818_v32 = vadd.f32 %v817_v39, %v816_v45  ;;  %v869_v16 = vadd.f32 %v868_v36, %v867_v53  ;;  %v615_v61 = vadd.f32 %v614_v4, %v613_v42  ;;  %v547_v60 = vrot.slane %v546_v52, 2 }
  0xbd   :  { %v874_v5 = vsel %vm343_vm0, %v335_v40, 0.0  ;;  %v410_v15 = vadd.f32 %v409_v18, %v408_v12  ;;  %v479_v62 = vadd.f32 %v478_v54, %v477_v38  ;;  %v752_v28 = vrot.slane %v751_v17, 4  ;;  %v339_v12 = vld [vmem:[%s5544_s0 + $0x7e0] sm:$0xff]  ;;  %s4102_s0 = smov [#allocation11]  }
  0xbe   :  { %v871_v11 = vadd.f32 %v870_v7, %v869_v16  ;;  %v820_v21 = vadd.f32 %v819_v26, %v818_v32  ;;  %v684_v48 = vadd.f32 %v683_v55, %v682_v46  ;;  %v876_v56 = vsel %vm343_vm0, %v336_v37, 0.0  ;;  %s3875_s8 = sshll.u32 %s4102_s0, 4  ;;  %s3876_s8 = int_to_ptr.vmem [resolvable:$true] %s3875_s8 }
  0xbf   :  { %v616_v19 = vrot.slane %v615_v61, 2  ;;  %v548_v1 = vadd.f32 %v547_v60, %v546_v52  ;;  %v878_v22 = vsel %vm343_vm0, %v337_v10, 0.0  ;;  %v411_v25 = vrot.slane %v410_v15, 1  ;;  %s4044_s9 = scalar_lea.vmem %s3876_s8, 512  ;;  %p4049_p12 = scmp.lt.s32.totalorder %s3876_s8, %s3876_s8 }
  0xc0   :  { %v873_v59 = vadd.f32 %v872_v9, %v871_v11  ;;  %v821_v23 = vrot.slane %v820_v21, 4  ;;  %v480_v27 = vrot.slane %v479_v62, 1  ;;  %v753_v14 = vadd.f32 %v752_v28, %v751_v17  ;;  %v901_v28 = vld [vmem:[#allocation2 + $0x28] sm:$0xff]  ;;  %p4045_p11 = scmp.ne.s32.totalorder %s3876_s8, %s4044_s9  ;;  %p4050_p13 = scmp.lt.s32.totalorder %s4044_s9, %s4044_s9 }
  0xc1   :  { %v685_v35 = vrot.slane %v684_v48, 2  ;;  %v880_v20 = vsel %vm343_vm0, %v338_v44, 0.0  ;;  %v617_v30 = vadd.f32 %v616_v19, %v615_v61  ;;  %v549_v42 = vrot.slane %v548_v1, 1  ;;  %v902_v19 = vld [vmem:[#allocation2 + $0x30] sm:$0xff] }
  0xc2   :  { %v875_v31 = vadd.f32 %v874_v5, %v873_v59  ;;  %v822_v58 = vadd.f32 %v821_v23, %v820_v21  ;;  %v882_v33 = vsel %vm343_vm0, %v339_v12, 0.0  ;;  %v412_v38 = vadd.f32 %v411_v25, %v410_v15  ;;  %v1817_v12 = vld [vmem:[#allocation7 + $0x5e0] sm:$0xff]  ;;  %v1686_v25 = vld [vmem:[#allocation7 + $0x1c8] sm:$0xff]  ;;  %p4051_p0 = por %p4050_p13, %p4049_p12 }
  0xc3   :  { %v481_v29 = vadd.f32 %v480_v27, %v479_v62  ;;  %v754_v8 = vrot.slane %v753_v14, 2  ;;  %v686_v43 = vadd.f32 %v685_v35, %v684_v48  ;;  %v884_v51 = vsel %vm343_vm0, %v340_v24, 0.0  ;;  %v900_v62 = vld [vmem:[#allocation2 + $0x20] sm:$0xff]  ;;  %v1814_v27 = vld [vmem:[#allocation7 + $0x5c8] sm:$0xff]  ;;  %v1681_v24 = vld [vmem:[#allocation7 + $0x1a0] sm:$0xff] }
  0xc4   :  { %v877_v47 = vadd.f32 %v876_v56, %v875_v31  ;;  %v618_v6 = vrot.slane %v617_v30, 1  ;;  %v550_v46 = vadd.f32 %v549_v42, %v548_v1  ;;  %v823_v63 = vrot.slane %v822_v58, 2  ;;  %v903_v31 = vld [vmem:[#allocation2 + $0x38] sm:$0xff]  ;;  %v1677_v42 = vld [vmem:[#allocation7 + $0x180] sm:$0xff]  ;;  %p4052_p1 = pnand %p4051_p0, %p4045_p11 }
  0xc5   :  { %v886_v39 = vsel %vm343_vm0, %v341_v50, 0.0  ;;  %v755_v36 = vadd.f32 %v754_v8, %v753_v14  ;;  %v997_v4 = vsel %vm996_vm2, %v481_v29, %v412_v38  ;;  %v687_v45 = vrot.slane %v686_v43, 1  ;;  %v1685_v14 = vld [vmem:[#allocation7 + $0x1c0] sm:$0xff]  ;;  %v1682_v35 = vld [vmem:[#allocation7 + $0x1a8] sm:$0xff] }
  0xc6   :  { %v879_v34 = vadd.f32 %v878_v22, %v877_v47  ;;  %v888_v53 = vsel %vm343_vm0, %v342_v41, 0.0  ;;  %v619_v18 = vadd.f32 %v618_v6, %v617_v30  ;;  %v824_v52 = vadd.f32 %v823_v63, %v822_v58  ;;  %v1689_v22 = vld [vmem:[#allocation7 + $0x1e0] sm:$0xff]  ;;  %v1678_v30 = vld [vmem:[#allocation7 + $0x188] sm:$0xff] }
  0xc7   :  { %v999_v7 = vsel %vm998_vm3, %v550_v46, %v997_v4  ;;  %v756_v40 = vrot.slane %v755_v36, 1  ;;  %v688_v32 = vadd.f32 %v687_v45, %v686_v43  ;;  %vm1004_vm6 = vcmask 1045509   ;;  %v1813_v47 = vld [vmem:[#allocation7 + $0x5c0] sm:$0xff]  ;;  %v1802_v50 = vld [vmem:[#allocation7 + $0x568] sm:$0xff] }
  0xc8   :  { %v881_v3 = vadd.f32 %v880_v20, %v879_v34  ;;  %v1001_v16 = vsel %vm1000_vm4, %v619_v18, %v999_v7  ;;  %v825_v55 = vrot.slane %v824_v52, 1  ;;  %vm1006_vm7 = vcmask 1046534   ;;  %v1810_v20 = vld [vmem:[#allocation7 + $0x5a8] sm:$0xff]  ;;  %v1805_v58 = vld [vmem:[#allocation7 + $0x580] sm:$0xff] }
  0xc9   :  { %v757_v9 = vadd.f32 %v756_v40, %v755_v36  ;;  %v1003_v61 = vsel %vm1002_vm5, %v688_v32, %v1001_v16  ;;  %vm1008_vm8 = vcmask 1047559   ;;  %v1022_v56 = vcombine.high %v900_v62, %v900_v62  ;;  %v1806_v34 = vld [vmem:[#allocation7 + $0x588] sm:$0xff]  ;;  %v1673_v38 = vld [vmem:[#allocation7 + $0x160] sm:$0xff] }
  0xca   :  { %v883_v57 = vadd.f32 %v882_v33, %v881_v3  ;;  %v826_v60 = vadd.f32 %v825_v55, %v824_v52  ;;  %v1023_v44 = vcombine.high %v901_v28, %v901_v28  ;;  %v1024_v1 = vcombine.high %v902_v19, %v902_v19  ;;  %v1674_v33 = vld [vmem:[#allocation7 + $0x168] sm:$0xff]  ;;  %v1801_v29 = vld [vmem:[#allocation7 + $0x560] sm:$0xff] }
  0xcb   :  { %v1005_v5 = vsel %vm1004_vm6, %v757_v9, %v1003_v61  ;;  %v1025_v23 = vcombine.high %v903_v31, %v903_v31  ;;  %v1670_v8 = vld [vmem:[#allocation7 + $0x148] sm:$0xff]  ;;  %v1669_v43 = vld [vmem:[#allocation7 + $0x140] sm:$0xff] }
  0xcc   :  { %v885_v13 = vadd.f32 %v884_v51, %v883_v57  ;;  %v1007_v15 = vsel %vm1006_vm7, %v826_v60, %v1005_v5  ;;  %v1798_v3 = vld [vmem:[#allocation7 + $0x548] sm:$0xff]  ;;  %v1797_v51 = vld [vmem:[#allocation7 + $0x540] sm:$0xff] }
  0xcd   :  { %v1666_v41 = vld [vmem:[#allocation7 + $0x128] sm:$0xff]  ;;  %v1665_v57 = vld [vmem:[#allocation7 + $0x120] sm:$0xff] }
  0xce   :  { %v887_v54 = vadd.f32 %v886_v39, %v885_v13  ;;  %v1794_v6 = vld [vmem:[#allocation7 + $0x528] sm:$0xff]  ;;  %v1793_v46 = vld [vmem:[#allocation7 + $0x520] sm:$0xff] }
  0xcf   :  { %v1662_v63 = vld [vmem:[#allocation7 + $0x108] sm:$0xff]  ;;  %v1661_v36 = vld [vmem:[#allocation7 + $0x100] sm:$0xff] }
  0xd0   :  { %v889_v17 = vadd.f32 %v888_v53, %v887_v54  ;;  %v1790_v39 = vld [vmem:[#allocation7 + $0x508] sm:$0xff]  ;;  %v1789_v13 = vld [vmem:[#allocation7 + $0x500] sm:$0xff] }
  0xd1   :  { %v1658_v4 = vld [vmem:[#allocation7 + $0xe8] sm:$0xff]  ;;  %v1657_v53 = vld [vmem:[#allocation7 + $0xe0] sm:$0xff] }
  0xd2   :  { %v890_v26 = vrot.slane %v889_v17, 4  ;;  %v1786_v45 = vld [vmem:[#allocation7 + $0x4e8] sm:$0xff]  ;;  %v1785_v18 = vld [vmem:[#allocation7 + $0x4e0] sm:$0xff] }
  0xd3   :  { %v1654_v54 = vld [vmem:[#allocation7 + $0xc8] sm:$0xff]  ;;  %v1653_v7 = vld [vmem:[#allocation7 + $0xc0] sm:$0xff] }
  0xd4   :  { %v891_v37 = vadd.f32 %v890_v26, %v889_v17  ;;  %v1782_v52 = vld [vmem:[#allocation7 + $0x4c8] sm:$0xff]  ;;  %v1781_v40 = vld [vmem:[#allocation7 + $0x4c0] sm:$0xff] }
  0xd5   :  { %v1650_v17 = vld [vmem:[#allocation7 + $0xa8] sm:$0xff]  ;;  %v1649_v26 = vld [vmem:[#allocation7 + $0xa0] sm:$0xff] }
  0xd6   :  { %v892_v11 = vrot.slane %v891_v37, 2  ;;  %v1778_v32 = vld [vmem:[#allocation7 + $0x4a8] sm:$0xff]  ;;  %v1777_v16 = vld [vmem:[#allocation7 + $0x4a0] sm:$0xff] }
  0xd7   :  { %v1646_v55 = vld [vmem:[#allocation7 + $0x88] sm:$0xff]  ;;  %v1773_v61 = vld [vmem:[#allocation7 + $0x480] sm:$0xff] }
  0xd8   :  { %v893_v21 = vadd.f32 %v892_v11, %v891_v37  ;;  %v1774_v9 = vld [vmem:[#allocation7 + $0x488] sm:$0xff]  ;;  %v1645_v37 = vld [vmem:[#allocation7 + $0x80] sm:$0xff] }
  0xd9   :  { %v1642_v11 = vld [vmem:[#allocation7 + $0x68] sm:$0xff]  ;;  %v1769_v5 = vld [vmem:[#allocation7 + $0x460] sm:$0xff] }
  0xda   :  { %v894_v10 = vrot.slane %v893_v21, 1  ;;  %v1770_v60 = vld [vmem:[#allocation7 + $0x468] sm:$0xff] }
  0xdc   :  { %v895_v59 = vadd.f32 %v894_v10, %v893_v21  ;;  %v1641_v21 = vld [vmem:[#allocation7 + $0x60] sm:$0xff]  ;;  %v1638_v10 = vld [vmem:[#allocation7 + $0x48] sm:$0xff] }
  0xde   :  { %v1009_v48 = vsel %vm1008_vm8, %v895_v59, %v1007_v15  ;;  %v1766_v15 = vld [vmem:[#allocation7 + $0x448] sm:$0xff] }
  0xdf   :  { %3902 = vmatmul.mubr.msk.f32.vlgmr.msra.gmra.mxu0 %vm343_vm0, %v1009_v48  ;;  %3905 = vmatmul.mubr.msk.f32.vlgmr.msra.gmra.mxu1 %vm343_vm0, %v1009_v48  ;;  %v1634_v59 = vld [vmem:[#allocation7 + $0x28] sm:$0xff] }
  0xe0   :  { %3907 = vmatpush1.msk.msra.mxu0 %vm1028_vm1, %v5190_v49  ;;  %1267 = vmatprep.mubr.f32.mxu0 %v4101_v0  ;;  %v1690_v49 = vld [vmem:[#allocation7 + $0x1e8] sm:$0xff] }
  0xe1   :  { %3910 = vmatpush1.msk.msra.mxu1 %vm1028_vm1, %v5192_v2  ;;  %1338 = vmatprep.mubr.f32.mxu1 %v4101_v0  ;;  %v1818_v2 = vld [vmem:[#allocation7 + $0x5e8] sm:$0xff] }
  0xe2   :  { %3912 = vmatprep.subr.msk.mxu0 %vm1028_vm1, %v1022_v56  ;;  %3915 = vmatprep.subr.msk.mxu1 %vm1028_vm1, %v1023_v44  ;;  %v1633_v56 = vld [vmem:[#allocation7 + $0x20] sm:$0xff] }
  0xe3   :  { %3908 = vmatmul.mubr.msk.f32.vlgmr.msra.gmra.mxu0 %vm343_vm0, %v1009_v48  ;;  %3911 = vmatmul.mubr.msk.f32.vlgmr.msra.gmra.mxu1 %vm343_vm0, %v1009_v48  ;;  %v1761_v44 = vld [vmem:[#allocation7 + $0x420] sm:$0xff] }
  0xe4   :  { %3913 = vmatpush1.msk.msra.mxu0 %vm1028_vm1, %v900_v62  ;;  %1409 = vmatprep.mubr.f32.mxu0 %v4101_v0  ;;  %v1637_v62 = vld [vmem:[#allocation7 + $0x40] sm:$0xff] }
  0xe5   :  { %3916 = vmatpush1.msk.msra.mxu1 %vm1028_vm1, %v901_v28  ;;  %1480 = vmatprep.mubr.f32.mxu1 %v4101_v0  ;;  %v1765_v28 = vld [vmem:[#allocation7 + $0x440] sm:$0xff] }
  0xe6   :  { %3918 = vmatprep.subr.msk.mxu0 %vm1028_vm1, %v1024_v1  ;;  %3921 = vmatprep.subr.msk.mxu1 %vm1028_vm1, %v1025_v23  ;;  %v1629_v1 = vld [vmem:[#allocation7] sm:$0xff] }
  0xe7   :  { %3914 = vmatmul.mubr.msk.f32.vlgmr.msra.gmra.mxu0 %vm343_vm0, %v1009_v48  ;;  %3917 = vmatmul.mubr.msk.f32.vlgmr.msra.gmra.mxu1 %vm343_vm0, %v1009_v48  ;;  %v1757_v23 = vld [vmem:[#allocation7 + $0x400] sm:$0xff] }
  0xe8   :  { %3919 = vmatpush1.msk.msra.mxu0 %vm1028_vm1, %v902_v19  ;;  %1551 = vmatprep.mubr.f32.mxu0 %v4101_v0  ;;  %v1630_v19 = vld [vmem:[#allocation7 + $0x8] sm:$0xff] }
  0xe9   :  { %3922 = vmatpush1.msk.msra.mxu1 %vm1028_vm1, %v903_v31  ;;  %1622 = vmatprep.mubr.f32.mxu1 %v4101_v0  ;;  %v1809_v0 = vld [vmem:[#allocation7 + $0x5a0] sm:$0xff]  ;;  %v1758_v31 = vld [vmem:[#allocation7 + $0x408] sm:$0xff] }
  0xea   :  { %2675 = vmatprep.subr.mxu0 %v1690_v49  ;;  %2746 = vmatprep.subr.mxu1 %v1818_v2  ;;  %v1754_v49 = vld [vmem:[#allocation7 + $0x3e8] sm:$0xff] }
  0xeb   :  { %3920 = vmatmul.mubr.msk.f32.vlgmr.msra.gmra.mxu0 %vm343_vm0, %v1009_v48  ;;  %3923 = vmatmul.mubr.msk.f32.vlgmr.msra.gmra.mxu1 %vm343_vm0, %v1009_v48  ;;  %v1762_v48 = vld [vmem:[#allocation7 + $0x428] sm:$0xff] }
  0xec   :  { %2676 = vmatpush1.msra.mxu0 %v1689_v22  ;;  %2747 = vmatpush1.msra.mxu1 %v1817_v12  ;;  %v1882_v2 = vld [vmem:[#allocation7 + $0x7e8] sm:$0xff]  ;;  %v1753_v22 = vld [vmem:[#allocation7 + $0x3e0] sm:$0xff] }
  0xed   :  { %2677 = vmatprep.subr.mxu0 %v1686_v25  ;;  %2748 = vmatprep.subr.mxu1 %v1814_v27  ;;  %v1881_v12 = vld [vmem:[#allocation7 + $0x7e0] sm:$0xff]  ;;  %v1750_v25 = vld [vmem:[#allocation7 + $0x3c8] sm:$0xff] }
  0xee   :  { %2678 = vmatpush1.msra.mxu0 %v1685_v14  ;;  %2749 = vmatpush1.msra.mxu1 %v1813_v47  ;;  %v1878_v27 = vld [vmem:[#allocation7 + $0x7c8] sm:$0xff]  ;;  %v1749_v14 = vld [vmem:[#allocation7 + $0x3c0] sm:$0xff] }
  0xef   :  { %2679 = vmatprep.subr.mxu0 %v1682_v35  ;;  %2750 = vmatprep.subr.mxu1 %v1810_v20  ;;  %v1877_v47 = vld [vmem:[#allocation7 + $0x7c0] sm:$0xff]  ;;  %v1746_v35 = vld [vmem:[#allocation7 + $0x3a8] sm:$0xff] }
  0xf0   :  { %2680 = vmatpush1.msra.mxu0 %v1681_v24  ;;  %2751 = vmatpush1.msra.mxu1 %v1809_v0  ;;  %v1874_v20 = vld [vmem:[#allocation7 + $0x7a8] sm:$0xff]  ;;  %v1745_v24 = vld [vmem:[#allocation7 + $0x3a0] sm:$0xff] }
  0xf1   :  { %2681 = vmatprep.subr.mxu0 %v1678_v30  ;;  %2752 = vmatprep.subr.mxu1 %v1806_v34  ;;  %v1873_v0 = vld [vmem:[#allocation7 + $0x7a0] sm:$0xff]  ;;  %v1742_v30 = vld [vmem:[#allocation7 + $0x388] sm:$0xff] }
  0xf2   :  { %2682 = vmatpush1.msra.mxu0 %v1677_v42  ;;  %2753 = vmatpush1.msra.mxu1 %v1805_v58  ;;  %v1870_v34 = vld [vmem:[#allocation7 + $0x788] sm:$0xff]  ;;  %v1741_v42 = vld [vmem:[#allocation7 + $0x380] sm:$0xff] }
  0xf3   :  { %2683 = vmatprep.subr.mxu0 %v1674_v33  ;;  %2754 = vmatprep.subr.mxu1 %v1802_v50  ;;  %v1869_v58 = vld [vmem:[#allocation7 + $0x780] sm:$0xff]  ;;  %v1738_v33 = vld [vmem:[#allocation7 + $0x368] sm:$0xff] }
  0xf4   :  { %2684 = vmatpush1.msra.mxu0 %v1673_v38  ;;  %2755 = vmatpush1.msra.mxu1 %v1801_v29  ;;  %v1866_v50 = vld [vmem:[#allocation7 + $0x768] sm:$0xff]  ;;  %v1737_v38 = vld [vmem:[#allocation7 + $0x360] sm:$0xff] }
  0xf5   :  { %2685 = vmatprep.subr.mxu0 %v1670_v8  ;;  %2756 = vmatprep.subr.mxu1 %v1798_v3  ;;  %v1865_v29 = vld [vmem:[#allocation7 + $0x760] sm:$0xff]  ;;  %v1734_v8 = vld [vmem:[#allocation7 + $0x348] sm:$0xff] }
  0xf6   :  { %2686 = vmatpush1.msra.mxu0 %v1669_v43  ;;  %2757 = vmatpush1.msra.mxu1 %v1797_v51  ;;  %v1862_v3 = vld [vmem:[#allocation7 + $0x748] sm:$0xff]  ;;  %v1733_v43 = vld [vmem:[#allocation7 + $0x340] sm:$0xff] }
  0xf7   :  { %2687 = vmatprep.subr.mxu0 %v1666_v41  ;;  %2758 = vmatprep.subr.mxu1 %v1794_v6  ;;  %v1861_v51 = vld [vmem:[#allocation7 + $0x740] sm:$0xff]  ;;  %v1730_v41 = vld [vmem:[#allocation7 + $0x328] sm:$0xff] }
  0xf8   :  { %2688 = vmatpush1.msra.mxu0 %v1665_v57  ;;  %2759 = vmatpush1.msra.mxu1 %v1793_v46  ;;  %v1858_v6 = vld [vmem:[#allocation7 + $0x728] sm:$0xff]  ;;  %v1729_v57 = vld [vmem:[#allocation7 + $0x320] sm:$0xff] }
  0xf9   :  { %2689 = vmatprep.subr.mxu0 %v1662_v63  ;;  %2760 = vmatprep.subr.mxu1 %v1790_v39  ;;  %v1857_v46 = vld [vmem:[#allocation7 + $0x720] sm:$0xff]  ;;  %v1726_v63 = vld [vmem:[#allocation7 + $0x308] sm:$0xff] }
  0xfa   :  { %2690 = vmatpush1.msra.mxu0 %v1661_v36  ;;  %2761 = vmatpush1.msra.mxu1 %v1789_v13  ;;  %v1854_v39 = vld [vmem:[#allocation7 + $0x708] sm:$0xff]  ;;  %v1725_v36 = vld [vmem:[#allocation7 + $0x300] sm:$0xff] }
  0xfb   :  { %2691 = vmatprep.subr.mxu0 %v1658_v4  ;;  %2762 = vmatprep.subr.mxu1 %v1786_v45  ;;  %v1853_v13 = vld [vmem:[#allocation7 + $0x700] sm:$0xff]  ;;  %v1722_v4 = vld [vmem:[#allocation7 + $0x2e8] sm:$0xff] }
  0xfc   :  { %2692 = vmatpush1.msra.mxu0 %v1657_v53  ;;  %2763 = vmatpush1.msra.mxu1 %v1785_v18  ;;  %v1850_v45 = vld [vmem:[#allocation7 + $0x6e8] sm:$0xff]  ;;  %v1721_v53 = vld [vmem:[#allocation7 + $0x2e0] sm:$0xff] }
  0xfd   :  { %2693 = vmatprep.subr.mxu0 %v1654_v54  ;;  %2764 = vmatprep.subr.mxu1 %v1782_v52  ;;  %v1849_v18 = vld [vmem:[#allocation7 + $0x6e0] sm:$0xff]  ;;  %v1718_v54 = vld [vmem:[#allocation7 + $0x2c8] sm:$0xff] }
  0xfe   :  { %2694 = vmatpush1.msra.mxu0 %v1653_v7  ;;  %2765 = vmatpush1.msra.mxu1 %v1781_v40  ;;  %v1846_v52 = vld [vmem:[#allocation7 + $0x6c8] sm:$0xff]  ;;  %v1717_v7 = vld [vmem:[#allocation7 + $0x2c0] sm:$0xff] }
  0xff   :  { %2695 = vmatprep.subr.mxu0 %v1650_v17  ;;  %2766 = vmatprep.subr.mxu1 %v1778_v32  ;;  %v1845_v40 = vld [vmem:[#allocation7 + $0x6c0] sm:$0xff]  ;;  %v1714_v17 = vld [vmem:[#allocation7 + $0x2a8] sm:$0xff] }
 0x100   :  { %2696 = vmatpush1.msra.mxu0 %v1649_v26  ;;  %2767 = vmatpush1.msra.mxu1 %v1777_v16  ;;  %v1842_v32 = vld [vmem:[#allocation7 + $0x6a8] sm:$0xff]  ;;  %v1713_v26 = vld [vmem:[#allocation7 + $0x2a0] sm:$0xff] }
 0x101   :  { %2697 = vmatprep.subr.mxu0 %v1646_v55  ;;  %2768 = vmatprep.subr.mxu1 %v1774_v9  ;;  %v1841_v16 = vld [vmem:[#allocation7 + $0x6a0] sm:$0xff]  ;;  %v1710_v55 = vld [vmem:[#allocation7 + $0x288] sm:$0xff] }
 0x102   :  { %2698 = vmatpush1.msra.mxu0 %v1645_v37  ;;  %2769 = vmatpush1.msra.mxu1 %v1773_v61  ;;  %v1838_v9 = vld [vmem:[#allocation7 + $0x688] sm:$0xff]  ;;  %v1709_v37 = vld [vmem:[#allocation7 + $0x280] sm:$0xff] }
 0x103   :  { %2699 = vmatprep.subr.mxu0 %v1642_v11  ;;  %2770 = vmatprep.subr.mxu1 %v1770_v60  ;;  %v1837_v61 = vld [vmem:[#allocation7 + $0x680] sm:$0xff]  ;;  %v1706_v11 = vld [vmem:[#allocation7 + $0x268] sm:$0xff] }
 0x104   :  { %2700 = vmatpush1.msra.mxu0 %v1641_v21  ;;  %2771 = vmatpush1.msra.mxu1 %v1769_v5  ;;  %v1834_v60 = vld [vmem:[#allocation7 + $0x668] sm:$0xff]  ;;  %v1705_v21 = vld [vmem:[#allocation7 + $0x260] sm:$0xff] }
 0x105   :  { %2701 = vmatprep.subr.mxu0 %v1638_v10  ;;  %2772 = vmatprep.subr.mxu1 %v1766_v15  ;;  %v1833_v5 = vld [vmem:[#allocation7 + $0x660] sm:$0xff]  ;;  %v1702_v10 = vld [vmem:[#allocation7 + $0x248] sm:$0xff] }
 0x106   :  { %2702 = vmatpush1.msra.mxu0 %v1637_v62  ;;  %2773 = vmatpush1.msra.mxu1 %v1765_v28  ;;  %v1830_v15 = vld [vmem:[#allocation7 + $0x648] sm:$0xff]  ;;  %v1701_v62 = vld [vmem:[#allocation7 + $0x240] sm:$0xff] }
 0x107   :  { %2703 = vmatprep.subr.mxu0 %v1634_v59  ;;  %2774 = vmatprep.subr.mxu1 %v1762_v48  ;;  %v1829_v28 = vld [vmem:[#allocation7 + $0x640] sm:$0xff]  ;;  %v1698_v59 = vld [vmem:[#allocation7 + $0x228] sm:$0xff] }
 0x108   :  { %2704 = vmatpush1.msra.mxu0 %v1633_v56  ;;  %2775 = vmatpush1.msra.mxu1 %v1761_v44  ;;  %v1826_v48 = vld [vmem:[#allocation7 + $0x628] sm:$0xff]  ;;  %v1697_v56 = vld [vmem:[#allocation7 + $0x220] sm:$0xff] }
 0x109   :  { %2705 = vmatprep.subr.mxu0 %v1630_v19  ;;  %2776 = vmatprep.subr.mxu1 %v1758_v31  ;;  %v1825_v44 = vld [vmem:[#allocation7 + $0x620] sm:$0xff]  ;;  %v1694_v19 = vld [vmem:[#allocation7 + $0x208] sm:$0xff] }
 0x10a   :  { %2706 = vmatpush1.msra.mxu0 %v1629_v1  ;;  %2777 = vmatpush1.msra.mxu1 %v1757_v23  ;;  %v1822_v31 = vld [vmem:[#allocation7 + $0x608] sm:$0xff]  ;;  %v1693_v1 = vld [vmem:[#allocation7 + $0x200] sm:$0xff] }
 0x10b   :  { %2707 = vmatprep.subr.mxu0 %v1754_v49  ;;  %2778 = vmatprep.subr.mxu1 %v1882_v2  ;;  %v1821_v23 = vld [vmem:[#allocation7 + $0x600] sm:$0xff]  ;;  %v1946_v49 = vld [vmem:[#allocation7 + $0x9e8] sm:$0xff] }
 0x10c   :  { %2708 = vmatpush2.msra.mxu0 %v1753_v22  ;;  %2779 = vmatpush2.msra.mxu1 %v1881_v12  ;;  %v2074_v2 = vld [vmem:[#allocation7 + $0xde8] sm:$0xff]  ;;  %v908_v22 = vlaneseq }
 0x10d   :  { %2709 = vmatprep.subr.mxu0 %v1750_v25  ;;  %2780 = vmatprep.subr.mxu1 %v1878_v27 }
 0x10e   :  { %2710 = vmatpush2.msra.mxu0 %v1749_v14  ;;  %2781 = vmatpush2.msra.mxu1 %v1877_v47  ;;  %v5397_v12 = vshrl.u32 %v908_v22, 7 }
 0x10f   :  { %2711 = vmatprep.subr.mxu0 %v1746_v35  ;;  %2782 = vmatprep.subr.mxu1 %v1874_v20  ;;  %v5411_v35 = vld [vmem:[#allocation5] sm:$0xff] }
 0x110   :  { %2712 = vmatpush2.msra.mxu0 %v1745_v24  ;;  %2783 = vmatpush2.msra.mxu1 %v1873_v0  ;;  %v5400_v25 = vsub.s32 2, %v5397_v12  ;;  %v5403_v27 = vsub.s32 1, %v5397_v12  ;;  %v5406_v14 = vsub.s32 3, %v5397_v12  ;;  %v5409_v47 = vsub.s32 0, %v5397_v12 }
 0x111   :  { %2713 = vmatprep.subr.mxu0 %v1742_v30  ;;  %2784 = vmatprep.subr.mxu1 %v1870_v34 }
 0x112   :  { %2714 = vmatpush2.msra.mxu0 %v1741_v42  ;;  %2785 = vmatpush2.msra.mxu1 %v1869_v58  ;;  %v919_v20 = vrot.slane %v5411_v35, %v5400_v25  ;;  %v915_v24 = vrot.slane %v5411_v35, %v5403_v27  ;;  %v923_v0 = vrot.slane %v5411_v35, %v5406_v14 }
 0x113   :  { %2715 = vmatprep.subr.mxu0 %v1738_v33  ;;  %2786 = vmatprep.subr.mxu1 %v1866_v50  ;;  %v911_v30 = vrot.slane %v5411_v35, %v5409_v47 }
 0x114   :  { %2716 = vmatpush2.msra.mxu0 %v1737_v38  ;;  %2787 = vmatpush2.msra.mxu1 %v1865_v29 }
 0x115   :  { %2717 = vmatprep.subr.mxu0 %v1734_v8  ;;  %2788 = vmatprep.subr.mxu1 %v1862_v3  ;;  %v1945_v3 = vld [vmem:[#allocation7 + $0x9e0] sm:$0xff] }
 0x116   :  { %2718 = vmatpush2.msra.mxu0 %v1733_v43  ;;  %2789 = vmatpush2.msra.mxu1 %v1861_v51  ;;  %v2073_v43 = vld [vmem:[#allocation7 + $0xde0] sm:$0xff]  ;;  %v1942_v51 = vld [vmem:[#allocation7 + $0x9c8] sm:$0xff] }
 0x117   :  { %2719 = vmatprep.subr.mxu0 %v1730_v41  ;;  %2790 = vmatprep.subr.mxu1 %v1858_v6  ;;  %v2070_v41 = vld [vmem:[#allocation7 + $0xdc8] sm:$0xff]  ;;  %v1941_v6 = vld [vmem:[#allocation7 + $0x9c0] sm:$0xff] }
 0x118   :  { %2720 = vmatpush2.msra.mxu0 %v1729_v57  ;;  %2791 = vmatpush2.msra.mxu1 %v1857_v46  ;;  %v2069_v57 = vld [vmem:[#allocation7 + $0xdc0] sm:$0xff]  ;;  %v1938_v46 = vld [vmem:[#allocation7 + $0x9a8] sm:$0xff] }
 0x119   :  { %2721 = vmatprep.subr.mxu0 %v1726_v63  ;;  %2792 = vmatprep.subr.mxu1 %v1854_v39  ;;  %v2066_v63 = vld [vmem:[#allocation7 + $0xda8] sm:$0xff]  ;;  %v1937_v39 = vld [vmem:[#allocation7 + $0x9a0] sm:$0xff] }
 0x11a   :  { %2722 = vmatpush2.msra.mxu0 %v1725_v36  ;;  %2793 = vmatpush2.msra.mxu1 %v1853_v13  ;;  %v2065_v36 = vld [vmem:[#allocation7 + $0xda0] sm:$0xff]  ;;  %v1934_v13 = vld [vmem:[#allocation7 + $0x988] sm:$0xff] }
 0x11b   :  { %2723 = vmatprep.subr.mxu0 %v1722_v4  ;;  %2794 = vmatprep.subr.mxu1 %v1850_v45  ;;  %v2062_v4 = vld [vmem:[#allocation7 + $0xd88] sm:$0xff]  ;;  %v1933_v45 = vld [vmem:[#allocation7 + $0x980] sm:$0xff] }
 0x11c   :  { %2724 = vmatpush2.msra.mxu0 %v1721_v53  ;;  %2795 = vmatpush2.msra.mxu1 %v1849_v18  ;;  %v2061_v53 = vld [vmem:[#allocation7 + $0xd80] sm:$0xff]  ;;  %v1930_v18 = vld [vmem:[#allocation7 + $0x968] sm:$0xff] }
 0x11d   :  { %2725 = vmatprep.subr.mxu0 %v1718_v54  ;;  %2796 = vmatprep.subr.mxu1 %v1846_v52  ;;  %v2058_v54 = vld [vmem:[#allocation7 + $0xd68] sm:$0xff]  ;;  %v1929_v52 = vld [vmem:[#allocation7 + $0x960] sm:$0xff] }
 0x11e   :  { %2726 = vmatpush2.msra.mxu0 %v1717_v7  ;;  %2797 = vmatpush2.msra.mxu1 %v1845_v40  ;;  %v2057_v7 = vld [vmem:[#allocation7 + $0xd60] sm:$0xff]  ;;  %v1926_v40 = vld [vmem:[#allocation7 + $0x948] sm:$0xff] }
 0x11f   :  { %2727 = vmatprep.subr.mxu0 %v1714_v17  ;;  %2798 = vmatprep.subr.mxu1 %v1842_v32  ;;  %v2054_v17 = vld [vmem:[#allocation7 + $0xd48] sm:$0xff]  ;;  %v1925_v32 = vld [vmem:[#allocation7 + $0x940] sm:$0xff] }
 0x120   :  { %2728 = vmatpush2.msra.mxu0 %v1713_v26  ;;  %2799 = vmatpush2.msra.mxu1 %v1841_v16  ;;  %v2053_v26 = vld [vmem:[#allocation7 + $0xd40] sm:$0xff]  ;;  %v1922_v16 = vld [vmem:[#allocation7 + $0x928] sm:$0xff] }
 0x121   :  { %2729 = vmatprep.subr.mxu0 %v1710_v55  ;;  %2800 = vmatprep.subr.mxu1 %v1838_v9  ;;  %v2050_v55 = vld [vmem:[#allocation7 + $0xd28] sm:$0xff]  ;;  %v1921_v9 = vld [vmem:[#allocation7 + $0x920] sm:$0xff] }
 0x122   :  { %2730 = vmatpush2.msra.mxu0 %v1709_v37  ;;  %2801 = vmatpush2.msra.mxu1 %v1837_v61  ;;  %v2049_v37 = vld [vmem:[#allocation7 + $0xd20] sm:$0xff]  ;;  %v1918_v61 = vld [vmem:[#allocation7 + $0x908] sm:$0xff] }
 0x123   :  { %2731 = vmatprep.subr.mxu0 %v1706_v11  ;;  %2802 = vmatprep.subr.mxu1 %v1834_v60  ;;  %v2046_v11 = vld [vmem:[#allocation7 + $0xd08] sm:$0xff]  ;;  %v1917_v60 = vld [vmem:[#allocation7 + $0x900] sm:$0xff] }
 0x124   :  { %2732 = vmatpush2.msra.mxu0 %v1705_v21  ;;  %2803 = vmatpush2.msra.mxu1 %v1833_v5  ;;  %v2045_v21 = vld [vmem:[#allocation7 + $0xd00] sm:$0xff]  ;;  %v1914_v5 = vld [vmem:[#allocation7 + $0x8e8] sm:$0xff] }
 0x125   :  { %2733 = vmatprep.subr.mxu0 %v1702_v10  ;;  %2804 = vmatprep.subr.mxu1 %v1830_v15  ;;  %v2042_v10 = vld [vmem:[#allocation7 + $0xce8] sm:$0xff]  ;;  %v1913_v15 = vld [vmem:[#allocation7 + $0x8e0] sm:$0xff] }
 0x126   :  { %2734 = vmatpush2.msra.mxu0 %v1701_v62  ;;  %2805 = vmatpush2.msra.mxu1 %v1829_v28  ;;  %v2041_v62 = vld [vmem:[#allocation7 + $0xce0] sm:$0xff]  ;;  %v1910_v28 = vld [vmem:[#allocation7 + $0x8c8] sm:$0xff] }
 0x127   :  { %2735 = vmatprep.subr.mxu0 %v1698_v59  ;;  %2806 = vmatprep.subr.mxu1 %v1826_v48  ;;  %v2038_v59 = vld [vmem:[#allocation7 + $0xcc8] sm:$0xff]  ;;  %v1909_v48 = vld [vmem:[#allocation7 + $0x8c0] sm:$0xff] }
 0x128   :  { %2736 = vmatpush2.msra.mxu0 %v1697_v56  ;;  %2807 = vmatpush2.msra.mxu1 %v1825_v44  ;;  %v2037_v56 = vld [vmem:[#allocation7 + $0xcc0] sm:$0xff]  ;;  %v1906_v44 = vld [vmem:[#allocation7 + $0x8a8] sm:$0xff] }
 0x129   :  { %2737 = vmatprep.subr.mxu0 %v1694_v19  ;;  %2808 = vmatprep.subr.mxu1 %v1822_v31  ;;  %v2034_v19 = vld [vmem:[#allocation7 + $0xca8] sm:$0xff]  ;;  %v1905_v31 = vld [vmem:[#allocation7 + $0x8a0] sm:$0xff] }
 0x12a   :  { %2738 = vmatpush2.msra.mxu0 %v1693_v1  ;;  %2809 = vmatpush2.msra.mxu1 %v1821_v23  ;;  %v2033_v1 = vld [vmem:[#allocation7 + $0xca0] sm:$0xff]  ;;  %v1902_v23 = vld [vmem:[#allocation7 + $0x888] sm:$0xff] }
 0x12b   :  { %2817 = vmatprep.subr.mxu0 %v1946_v49  ;;  %2888 = vmatprep.subr.mxu1 %v2074_v2  ;;  %v2030_v49 = vld [vmem:[#allocation7 + $0xc88] sm:$0xff]  ;;  %v1901_v2 = vld [vmem:[#allocation7 + $0x880] sm:$0xff] }
 0x19f   :  { %v1127_v34 = vpop.f32.mrf.mxu0  ;;  %v1198_v42 = vpop.f32.mrf.mxu1 }
 0x1a0   :  { %v5421_v58 = vadd.f32 %v1198_v42, %v919_v20  ;;  %v5427_v8 = vadd.f32 %v1127_v34, %v911_v30  ;;  %v2029_v20 = vld [vmem:[#allocation7 + $0xc80] sm:$0xff]  ;;  %v1894_v42 = vld [vmem:[#allocation7 + $0x848] sm:$0xff] }
 0x1a1   :  { %v1129_v33 = vpop.f32.mrf.mxu0  ;;  %v1200_v50 = vpop.f32.mrf.mxu1  ;;  %v1897_v30 = vld [vmem:[#allocation7 + $0x860] sm:$0xff] }
 0x1a2   :  { %v5423_v38 = vadd.f32 %v1129_v33, %v915_v24  ;;  %v5425_v29 = vadd.f32 %v1200_v50, %v923_v0  ;;  %v1898_v24 = vld [vmem:[#allocation7 + $0x868] sm:$0xff]  ;;  %v2025_v34 = vld [vmem:[#allocation7 + $0xc60] sm:$0xff] }
 0x1a3   :  { %v2026_v0 = vld [vmem:[#allocation7 + $0xc68] sm:$0xff]  ;;  %v1893_v50 = vld [vmem:[#allocation7 + $0x840] sm:$0xff] }
 0x1a4   :  { %2739 = vmatprep.mubr.f32.mxu0 %v5423_v38  ;;  %2810 = vmatprep.mubr.f32.mxu1 %v5425_v29  ;;  %v2022_v33 = vld [vmem:[#allocation7 + $0xc48] sm:$0xff] }
 0x1a5   :  { %2740 = vmatmul.mubr.f32.vlgmr.msra.gmra.mxu0 %v5427_v8  ;;  %2811 = vmatmul.mubr.f32.vlgmr.msra.gmra.mxu1 %v5421_v58 }
 0x1a6   :  { %2818 = vmatpush1.msra.mxu0 %v1945_v3  ;;  %2889 = vmatpush1.msra.mxu1 %v2073_v43  ;;  %v2021_v3 = vld [vmem:[#allocation7 + $0xc40] sm:$0xff]  ;;  %v1890_v43 = vld [vmem:[#allocation7 + $0x828] sm:$0xff] }
 0x1a7   :  { %2819 = vmatprep.subr.mxu0 %v1942_v51  ;;  %2890 = vmatprep.subr.mxu1 %v2070_v41  ;;  %v2018_v51 = vld [vmem:[#allocation7 + $0xc28] sm:$0xff]  ;;  %v1889_v41 = vld [vmem:[#allocation7 + $0x820] sm:$0xff] }
 0x1a8   :  { %2820 = vmatpush1.msra.mxu0 %v1941_v6  ;;  %2891 = vmatpush1.msra.mxu1 %v2069_v57  ;;  %v2017_v6 = vld [vmem:[#allocation7 + $0xc20] sm:$0xff]  ;;  %v1886_v57 = vld [vmem:[#allocation7 + $0x808] sm:$0xff] }
 0x1a9   :  { %2821 = vmatprep.subr.mxu0 %v1938_v46  ;;  %2892 = vmatprep.subr.mxu1 %v2066_v63  ;;  %v2014_v46 = vld [vmem:[#allocation7 + $0xc08] sm:$0xff]  ;;  %v1885_v63 = vld [vmem:[#allocation7 + $0x800] sm:$0xff] }
 0x1aa   :  { %2822 = vmatpush1.msra.mxu0 %v1937_v39  ;;  %2893 = vmatpush1.msra.mxu1 %v2065_v36  ;;  %v2013_v39 = vld [vmem:[#allocation7 + $0xc00] sm:$0xff]  ;;  %v2010_v36 = vld [vmem:[#allocation7 + $0xbe8] sm:$0xff] }
 0x1ab   :  { %2823 = vmatprep.subr.mxu0 %v1934_v13  ;;  %2894 = vmatprep.subr.mxu1 %v2062_v4  ;;  %v2138_v13 = vld [vmem:[#allocation7 + $0xfe8] sm:$0xff]  ;;  %v2009_v4 = vld [vmem:[#allocation7 + $0xbe0] sm:$0xff] }
 0x1ac   :  { %2824 = vmatpush1.msra.mxu0 %v1933_v45  ;;  %2895 = vmatpush1.msra.mxu1 %v2061_v53  ;;  %v2137_v45 = vld [vmem:[#allocation7 + $0xfe0] sm:$0xff]  ;;  %v2006_v53 = vld [vmem:[#allocation7 + $0xbc8] sm:$0xff] }
 0x1ad   :  { %2825 = vmatprep.subr.mxu0 %v1930_v18  ;;  %2896 = vmatprep.subr.mxu1 %v2058_v54  ;;  %v2134_v18 = vld [vmem:[#allocation7 + $0xfc8] sm:$0xff]  ;;  %v2005_v54 = vld [vmem:[#allocation7 + $0xbc0] sm:$0xff] }
 0x1ae   :  { %2826 = vmatpush1.msra.mxu0 %v1929_v52  ;;  %2897 = vmatpush1.msra.mxu1 %v2057_v7  ;;  %v2133_v52 = vld [vmem:[#allocation7 + $0xfc0] sm:$0xff]  ;;  %v2002_v7 = vld [vmem:[#allocation7 + $0xba8] sm:$0xff] }
 0x1af   :  { %2827 = vmatprep.subr.mxu0 %v1926_v40  ;;  %2898 = vmatprep.subr.mxu1 %v2054_v17  ;;  %v2130_v40 = vld [vmem:[#allocation7 + $0xfa8] sm:$0xff]  ;;  %v2001_v17 = vld [vmem:[#allocation7 + $0xba0] sm:$0xff] }
 0x1b0   :  { %2828 = vmatpush1.msra.mxu0 %v1925_v32  ;;  %2899 = vmatpush1.msra.mxu1 %v2053_v26  ;;  %v2129_v32 = vld [vmem:[#allocation7 + $0xfa0] sm:$0xff]  ;;  %v1998_v26 = vld [vmem:[#allocation7 + $0xb88] sm:$0xff] }
 0x1b1   :  { %2829 = vmatprep.subr.mxu0 %v1922_v16  ;;  %2900 = vmatprep.subr.mxu1 %v2050_v55  ;;  %v2126_v16 = vld [vmem:[#allocation7 + $0xf88] sm:$0xff]  ;;  %v1997_v55 = vld [vmem:[#allocation7 + $0xb80] sm:$0xff] }
 0x1b2   :  { %2830 = vmatpush1.msra.mxu0 %v1921_v9  ;;  %2901 = vmatpush1.msra.mxu1 %v2049_v37  ;;  %v2125_v9 = vld [vmem:[#allocation7 + $0xf80] sm:$0xff]  ;;  %v1994_v37 = vld [vmem:[#allocation7 + $0xb68] sm:$0xff] }
 0x1b3   :  { %2831 = vmatprep.subr.mxu0 %v1918_v61  ;;  %2902 = vmatprep.subr.mxu1 %v2046_v11  ;;  %v2122_v61 = vld [vmem:[#allocation7 + $0xf68] sm:$0xff]  ;;  %v1993_v11 = vld [vmem:[#allocation7 + $0xb60] sm:$0xff] }
 0x1b4   :  { %2832 = vmatpush1.msra.mxu0 %v1917_v60  ;;  %2903 = vmatpush1.msra.mxu1 %v2045_v21  ;;  %v2121_v60 = vld [vmem:[#allocation7 + $0xf60] sm:$0xff]  ;;  %v1990_v21 = vld [vmem:[#allocation7 + $0xb48] sm:$0xff] }
 0x1b5   :  { %2833 = vmatprep.subr.mxu0 %v1914_v5  ;;  %2904 = vmatprep.subr.mxu1 %v2042_v10  ;;  %v2118_v5 = vld [vmem:[#allocation7 + $0xf48] sm:$0xff]  ;;  %v1989_v10 = vld [vmem:[#allocation7 + $0xb40] sm:$0xff] }
 0x1b6   :  { %2834 = vmatpush1.msra.mxu0 %v1913_v15  ;;  %2905 = vmatpush1.msra.mxu1 %v2041_v62  ;;  %v2117_v15 = vld [vmem:[#allocation7 + $0xf40] sm:$0xff]  ;;  %v1986_v62 = vld [vmem:[#allocation7 + $0xb28] sm:$0xff] }
 0x1b7   :  { %2835 = vmatprep.subr.mxu0 %v1910_v28  ;;  %2906 = vmatprep.subr.mxu1 %v2038_v59  ;;  %v2114_v28 = vld [vmem:[#allocation7 + $0xf28] sm:$0xff]  ;;  %v1985_v59 = vld [vmem:[#allocation7 + $0xb20] sm:$0xff] }
 0x1b8   :  { %2836 = vmatpush1.msra.mxu0 %v1909_v48  ;;  %2907 = vmatpush1.msra.mxu1 %v2037_v56  ;;  %v2113_v48 = vld [vmem:[#allocation7 + $0xf20] sm:$0xff]  ;;  %v1982_v56 = vld [vmem:[#allocation7 + $0xb08] sm:$0xff] }
 0x1b9   :  { %2837 = vmatprep.subr.mxu0 %v1906_v44  ;;  %2908 = vmatprep.subr.mxu1 %v2034_v19  ;;  %v2110_v44 = vld [vmem:[#allocation7 + $0xf08] sm:$0xff]  ;;  %v1981_v19 = vld [vmem:[#allocation7 + $0xb00] sm:$0xff] }
 0x1ba   :  { %2838 = vmatpush1.msra.mxu0 %v1905_v31  ;;  %2909 = vmatpush1.msra.mxu1 %v2033_v1  ;;  %v2109_v31 = vld [vmem:[#allocation7 + $0xf00] sm:$0xff]  ;;  %v1978_v1 = vld [vmem:[#allocation7 + $0xae8] sm:$0xff] }
 0x1bb   :  { %2839 = vmatprep.subr.mxu0 %v1902_v23  ;;  %2910 = vmatprep.subr.mxu1 %v2030_v49  ;;  %v2106_v23 = vld [vmem:[#allocation7 + $0xee8] sm:$0xff]  ;;  %v1977_v49 = vld [vmem:[#allocation7 + $0xae0] sm:$0xff] }
 0x1bc   :  { %2840 = vmatpush1.msra.mxu0 %v1901_v2  ;;  %2911 = vmatpush1.msra.mxu1 %v2029_v20  ;;  %v2105_v2 = vld [vmem:[#allocation7 + $0xee0] sm:$0xff]  ;;  %v1974_v20 = vld [vmem:[#allocation7 + $0xac8] sm:$0xff] }
 0x1bd   :  { %2841 = vmatprep.subr.mxu0 %v1898_v24  ;;  %2912 = vmatprep.subr.mxu1 %v2026_v0  ;;  %v2102_v24 = vld [vmem:[#allocation7 + $0xec8] sm:$0xff]  ;;  %v1973_v0 = vld [vmem:[#allocation7 + $0xac0] sm:$0xff] }
 0x1be   :  { %2842 = vmatpush1.msra.mxu0 %v1897_v30  ;;  %2913 = vmatpush1.msra.mxu1 %v2025_v34  ;;  %v2101_v30 = vld [vmem:[#allocation7 + $0xec0] sm:$0xff]  ;;  %v1970_v34 = vld [vmem:[#allocation7 + $0xaa8] sm:$0xff] }
 0x1bf   :  { %2843 = vmatprep.subr.mxu0 %v1894_v42  ;;  %2914 = vmatprep.subr.mxu1 %v2022_v33  ;;  %v2098_v42 = vld [vmem:[#allocation7 + $0xea8] sm:$0xff]  ;;  %v1969_v33 = vld [vmem:[#allocation7 + $0xaa0] sm:$0xff] }
 0x1c0   :  { %2844 = vmatpush1.msra.mxu0 %v1893_v50  ;;  %2915 = vmatpush1.msra.mxu1 %v2021_v3  ;;  %v2097_v50 = vld [vmem:[#allocation7 + $0xea0] sm:$0xff]  ;;  %v930_v3 = vsub.s32 5, %v5397_v12 }
 0x1c1   :  { %2845 = vmatprep.subr.mxu0 %v1890_v43  ;;  %2916 = vmatprep.subr.mxu1 %v2018_v51  ;;  %v1966_v43 = vld [vmem:[#allocation7 + $0xa88] sm:$0xff] }
 0x1c2   :  { %2846 = vmatpush1.msra.mxu0 %v1889_v41  ;;  %2917 = vmatpush1.msra.mxu1 %v2017_v6  ;;  %v2094_v51 = vld [vmem:[#allocation7 + $0xe88] sm:$0xff]  ;;  %v1269_v41 = vpop.f32.mrf.mxu0  ;;  %v1965_v6 = vld [vmem:[#allocation7 + $0xa80] sm:$0xff] }
 0x1c3   :  { %2847 = vmatprep.subr.mxu0 %v1886_v57  ;;  %2918 = vmatprep.subr.mxu1 %v2014_v46  ;;  %v2093_v57 = vld [vmem:[#allocation7 + $0xe80] sm:$0xff]  ;;  %v938_v46 = vsub.s32 7, %v5397_v12 }
 0x1c4   :  { %2848 = vmatpush1.msra.mxu0 %v1885_v63  ;;  %2919 = vmatpush1.msra.mxu1 %v2013_v39  ;;  %v1962_v63 = vld [vmem:[#allocation7 + $0xa68] sm:$0xff] }
 0x1c5   :  { %2849 = vmatprep.subr.mxu0 %v2010_v36  ;;  %2920 = vmatprep.subr.mxu1 %v2138_v13  ;;  %v2090_v39 = vld [vmem:[#allocation7 + $0xe68] sm:$0xff]  ;;  %v934_v36 = vsub.s32 6, %v5397_v12  ;;  %v1340_v13 = vpop.f32.mrf.mxu1 }
 0x1c6   :  { %2850 = vmatpush2.msra.mxu0 %v2009_v4  ;;  %2921 = vmatpush2.msra.mxu1 %v2137_v45  ;;  %v1961_v4 = vld [vmem:[#allocation7 + $0xa60] sm:$0xff] }
 0x1c7   :  { %2851 = vmatprep.subr.mxu0 %v2006_v53  ;;  %2922 = vmatprep.subr.mxu1 %v2134_v18  ;;  %v2089_v45 = vld [vmem:[#allocation7 + $0xe60] sm:$0xff]  ;;  %v931_v53 = vrot.slane %v5411_v35, %v930_v3  ;;  %v926_v18 = vsub.s32 4, %v5397_v12 }
 0x1c8   :  { %2852 = vmatpush2.msra.mxu0 %v2005_v54  ;;  %2923 = vmatpush2.msra.mxu1 %v2133_v52  ;;  %v1958_v54 = vld [vmem:[#allocation7 + $0xa48] sm:$0xff] }
 0x1c9   :  { %2853 = vmatprep.subr.mxu0 %v2002_v7  ;;  %2924 = vmatprep.subr.mxu1 %v2130_v40  ;;  %v2086_v52 = vld [vmem:[#allocation7 + $0xe48] sm:$0xff]  ;;  %v1271_v7 = vpop.f32.mrf.mxu0  ;;  %v1957_v40 = vld [vmem:[#allocation7 + $0xa40] sm:$0xff] }
 0x1ca   :  { %2854 = vmatpush2.msra.mxu0 %v2001_v17  ;;  %2925 = vmatpush2.msra.mxu1 %v2129_v32  ;;  %v2085_v17 = vld [vmem:[#allocation7 + $0xe40] sm:$0xff]  ;;  %v939_v32 = vrot.slane %v5411_v35, %v938_v46 }
 0x1cb   :  { %2855 = vmatprep.subr.mxu0 %v1998_v26  ;;  %2926 = vmatprep.subr.mxu1 %v2126_v16  ;;  %v935_v26 = vrot.slane %v5411_v35, %v934_v36  ;;  %v1342_v16 = vpop.f32.mrf.mxu1 }
 0x1cc   :  { %2856 = vmatpush2.msra.mxu0 %v1997_v55  ;;  %2927 = vmatpush2.msra.mxu1 %v2125_v9  ;;  %v1954_v55 = vld [vmem:[#allocation7 + $0xa28] sm:$0xff] }
 0x1cd   :  { %2857 = vmatprep.subr.mxu0 %v1994_v37  ;;  %2928 = vmatprep.subr.mxu1 %v2122_v61  ;;  %v2082_v9 = vld [vmem:[#allocation7 + $0xe28] sm:$0xff]  ;;  %v5446_v37 = vadd.f32 %v1271_v7, %v931_v53  ;;  %v1953_v61 = vld [vmem:[#allocation7 + $0xa20] sm:$0xff] }
 0x1ce   :  { %2858 = vmatpush2.msra.mxu0 %v1993_v11  ;;  %2929 = vmatpush2.msra.mxu1 %v2121_v60  ;;  %v2081_v11 = vld [vmem:[#allocation7 + $0xe20] sm:$0xff]  ;;  %v927_v60 = vrot.slane %v5411_v35, %v926_v18  ;;  %v2202_v35 = vld [vmem:[#allocation7 + $0x11e8] sm:$0xff] }
 0x1cf   :  { %2859 = vmatprep.subr.mxu0 %v1990_v21  ;;  %2930 = vmatprep.subr.mxu1 %v2118_v5  ;;  %v1950_v21 = vld [vmem:[#allocation7 + $0xa08] sm:$0xff]  ;;  %v5451_v5 = vadd.f32 %v1342_v16, %v939_v32  ;;  %v2301_v7 = vld [vmem:[#allocation7 + $0x1500] sm:$0xff] }
 0x1d0   :  { %2860 = vmatpush2.msra.mxu0 %v1989_v10  ;;  %2931 = vmatpush2.msra.mxu1 %v2117_v15  ;;  %v2078_v10 = vld [vmem:[#allocation7 + $0xe08] sm:$0xff]  ;;  %v1949_v15 = vld [vmem:[#allocation7 + $0xa00] sm:$0xff] }
 0x1d1   :  { %2861 = vmatprep.subr.mxu0 %v1986_v62  ;;  %2932 = vmatprep.subr.mxu1 %v2114_v28  ;;  %v5453_v62 = vadd.f32 %v1340_v13, %v935_v26  ;;  %v2077_v28 = vld [vmem:[#allocation7 + $0xe00] sm:$0xff]  ;;  %v2306_v13 = vld [vmem:[#allocation7 + $0x1528] sm:$0xff] }
 0x1d2   :  { %2862 = vmatpush2.msra.mxu0 %v1985_v59  ;;  %2933 = vmatpush2.msra.mxu1 %v2113_v48  ;;  %v5456_v59 = vadd.f32 %v1269_v41, %v927_v60  ;;  %v2330_v48 = vld [vmem:[#allocation7 + $0x15e8] sm:$0xff]  ;;  %v2169_v32 = vld [vmem:[#allocation7 + $0x10e0] sm:$0xff] }
 0x1d3   :  { %2863 = vmatprep.subr.mxu0 %v1982_v56  ;;  %2934 = vmatprep.subr.mxu1 %v2110_v44  ;;  %v2201_v56 = vld [vmem:[#allocation7 + $0x11e0] sm:$0xff]  ;;  %v2182_v41 = vld [vmem:[#allocation7 + $0x1148] sm:$0xff] }
 0x1d4   :  { %2864 = vmatpush2.msra.mxu0 %v1981_v19  ;;  %2935 = vmatpush2.msra.mxu1 %v2109_v31  ;;  %v2329_v44 = vld [vmem:[#allocation7 + $0x15e0] sm:$0xff]  ;;  %v2198_v19 = vld [vmem:[#allocation7 + $0x11c8] sm:$0xff] }
 0x1d5   :  { %2865 = vmatprep.subr.mxu0 %v1978_v1  ;;  %2936 = vmatprep.subr.mxu1 %v2106_v23  ;;  %v2326_v31 = vld [vmem:[#allocation7 + $0x15c8] sm:$0xff]  ;;  %v2197_v1 = vld [vmem:[#allocation7 + $0x11c0] sm:$0xff] }
 0x1d6   :  { %2866 = vmatpush2.msra.mxu0 %v1977_v49  ;;  %2937 = vmatpush2.msra.mxu1 %v2105_v2  ;;  %v2325_v23 = vld [vmem:[#allocation7 + $0x15c0] sm:$0xff]  ;;  %v2194_v49 = vld [vmem:[#allocation7 + $0x11a8] sm:$0xff] }
 0x1d7   :  { %2867 = vmatprep.subr.mxu0 %v1974_v20  ;;  %2938 = vmatprep.subr.mxu1 %v2102_v24  ;;  %v2322_v2 = vld [vmem:[#allocation7 + $0x15a8] sm:$0xff]  ;;  %v2193_v20 = vld [vmem:[#allocation7 + $0x11a0] sm:$0xff] }
 0x1d8   :  { %2868 = vmatpush2.msra.mxu0 %v1973_v0  ;;  %2939 = vmatpush2.msra.mxu1 %v2101_v30  ;;  %v2321_v24 = vld [vmem:[#allocation7 + $0x15a0] sm:$0xff]  ;;  %v2190_v0 = vld [vmem:[#allocation7 + $0x1188] sm:$0xff] }
 0x1d9   :  { %2869 = vmatprep.subr.mxu0 %v1970_v34  ;;  %2940 = vmatprep.subr.mxu1 %v2098_v42  ;;  %v2318_v30 = vld [vmem:[#allocation7 + $0x1588] sm:$0xff]  ;;  %v2189_v34 = vld [vmem:[#allocation7 + $0x1180] sm:$0xff] }
 0x1da   :  { %2870 = vmatpush2.msra.mxu0 %v1969_v33  ;;  %2941 = vmatpush2.msra.mxu1 %v2097_v50  ;;  %v2317_v42 = vld [vmem:[#allocation7 + $0x1580] sm:$0xff]  ;;  %v2186_v33 = vld [vmem:[#allocation7 + $0x1168] sm:$0xff] }
 0x1db   :  { %2871 = vmatprep.subr.mxu0 %v1966_v43  ;;  %2942 = vmatprep.subr.mxu1 %v2094_v51  ;;  %v2314_v50 = vld [vmem:[#allocation7 + $0x1568] sm:$0xff]  ;;  %v2185_v43 = vld [vmem:[#allocation7 + $0x1160] sm:$0xff] }
 0x1dc   :  { %2872 = vmatpush2.msra.mxu0 %v1965_v6  ;;  %2943 = vmatpush2.msra.mxu1 %v2093_v57  ;;  %v2313_v51 = vld [vmem:[#allocation7 + $0x1560] sm:$0xff]  ;;  %v2310_v6 = vld [vmem:[#allocation7 + $0x1548] sm:$0xff] }
 0x1dd   :  { %2873 = vmatprep.subr.mxu0 %v1962_v63  ;;  %2944 = vmatprep.subr.mxu1 %v2090_v39  ;;  %v2181_v57 = vld [vmem:[#allocation7 + $0x1140] sm:$0xff]  ;;  %v2178_v39 = vld [vmem:[#allocation7 + $0x1128] sm:$0xff] }
 0x1de   :  { %2874 = vmatpush2.msra.mxu0 %v1961_v4  ;;  %2945 = vmatpush2.msra.mxu1 %v2089_v45  ;;  %v2309_v63 = vld [vmem:[#allocation7 + $0x1540] sm:$0xff]  ;;  %v2174_v53 = vld [vmem:[#allocation7 + $0x1108] sm:$0xff] }
 0x1df   :  { %2875 = vmatprep.subr.mxu0 %v1958_v54  ;;  %2946 = vmatprep.subr.mxu1 %v2086_v52  ;;  %v2177_v4 = vld [vmem:[#allocation7 + $0x1120] sm:$0xff]  ;;  %v2302_v54 = vld [vmem:[#allocation7 + $0x1508] sm:$0xff] }
 0x1e0   :  { %2876 = vmatpush2.msra.mxu0 %v1957_v40  ;;  %2947 = vmatpush2.msra.mxu1 %v2085_v17  ;;  %v2305_v45 = vld [vmem:[#allocation7 + $0x1520] sm:$0xff]  ;;  %v2170_v40 = vld [vmem:[#allocation7 + $0x10e8] sm:$0xff] }
 0x1e1   :  { %2877 = vmatprep.subr.mxu0 %v1954_v55  ;;  %2948 = vmatprep.subr.mxu1 %v2082_v9  ;;  %v2173_v52 = vld [vmem:[#allocation7 + $0x1100] sm:$0xff]  ;;  %v2298_v17 = vld [vmem:[#allocation7 + $0x14e8] sm:$0xff] }
 0x1e2   :  { %2878 = vmatpush2.msra.mxu0 %v1953_v61  ;;  %2949 = vmatpush2.msra.mxu1 %v2081_v11  ;;  %v2297_v26 = vld [vmem:[#allocation7 + $0x14e0] sm:$0xff]  ;;  %v2166_v16 = vld [vmem:[#allocation7 + $0x10c8] sm:$0xff] }
 0x1e3   :  { %2879 = vmatprep.subr.mxu0 %v1950_v21  ;;  %2881 = vmatprep.mubr.f32.mxu0 %v5446_v37  ;;  %v2294_v55 = vld [vmem:[#allocation7 + $0x14c8] sm:$0xff]  ;;  %v2165_v9 = vld [vmem:[#allocation7 + $0x10c0] sm:$0xff] }
 0x1e4   :  { %2950 = vmatprep.subr.mxu1 %v2078_v10  ;;  %2880 = vmatpush2.msra.mxu0 %v1949_v15  ;;  %v2293_v61 = vld [vmem:[#allocation7 + $0x14c0] sm:$0xff]  ;;  %v2162_v11 = vld [vmem:[#allocation7 + $0x10a8] sm:$0xff] }
 0x1e5   :  { %2951 = vmatpush2.msra.mxu1 %v2077_v28  ;;  %2952 = vmatprep.mubr.f32.mxu1 %v5451_v5  ;;  %v2290_v60 = vld [vmem:[#allocation7 + $0x14a8] sm:$0xff]  ;;  %v2161_v21 = vld [vmem:[#allocation7 + $0x10a0] sm:$0xff] }
 0x1e6   :  { %2882 = vmatmul.mubr.f32.vlgmr.msra.gmra.mxu0 %v5456_v59  ;;  %2953 = vmatmul.mubr.f32.vlgmr.msra.gmra.mxu1 %v5453_v62  ;;  %v2289_v10 = vld [vmem:[#allocation7 + $0x14a0] sm:$0xff]  ;;  %v2158_v15 = vld [vmem:[#allocation7 + $0x1088] sm:$0xff] }
 0x1e7   :  { %2959 = vmatprep.subr.mxu0 %v2202_v35  ;;  %3030 = vmatprep.subr.mxu1 %v2330_v48  ;;  %v2286_v28 = vld [vmem:[#allocation7 + $0x1488] sm:$0xff]  ;;  %v2157_v35 = vld [vmem:[#allocation7 + $0x1080] sm:$0xff] }
 0x1e8   :  { %2960 = vmatpush1.msra.mxu0 %v2201_v56  ;;  %3031 = vmatpush1.msra.mxu1 %v2329_v44  ;;  %v2285_v48 = vld [vmem:[#allocation7 + $0x1480] sm:$0xff]  ;;  %v2154_v56 = vld [vmem:[#allocation7 + $0x1068] sm:$0xff] }
 0x1e9   :  { %2961 = vmatprep.subr.mxu0 %v2198_v19  ;;  %3032 = vmatprep.subr.mxu1 %v2326_v31  ;;  %v2282_v44 = vld [vmem:[#allocation7 + $0x1468] sm:$0xff]  ;;  %v2153_v19 = vld [vmem:[#allocation7 + $0x1060] sm:$0xff] }
 0x1ea   :  { %2962 = vmatpush1.msra.mxu0 %v2197_v1  ;;  %3033 = vmatpush1.msra.mxu1 %v2325_v23  ;;  %v2281_v31 = vld [vmem:[#allocation7 + $0x1460] sm:$0xff]  ;;  %v2150_v1 = vld [vmem:[#allocation7 + $0x1048] sm:$0xff] }
 0x1eb   :  { %2963 = vmatprep.subr.mxu0 %v2194_v49  ;;  %3034 = vmatprep.subr.mxu1 %v2322_v2  ;;  %v2278_v23 = vld [vmem:[#allocation7 + $0x1448] sm:$0xff]  ;;  %v2149_v49 = vld [vmem:[#allocation7 + $0x1040] sm:$0xff] }
 0x1ec   :  { %2964 = vmatpush1.msra.mxu0 %v2193_v20  ;;  %3035 = vmatpush1.msra.mxu1 %v2321_v24  ;;  %v2277_v2 = vld [vmem:[#allocation7 + $0x1440] sm:$0xff]  ;;  %v2146_v20 = vld [vmem:[#allocation7 + $0x1028] sm:$0xff] }
 0x1ed   :  { %2965 = vmatprep.subr.mxu0 %v2190_v0  ;;  %3036 = vmatprep.subr.mxu1 %v2318_v30  ;;  %v2274_v24 = vld [vmem:[#allocation7 + $0x1428] sm:$0xff]  ;;  %v2145_v0 = vld [vmem:[#allocation7 + $0x1020] sm:$0xff] }
 0x1ee   :  { %2966 = vmatpush1.msra.mxu0 %v2189_v34  ;;  %3037 = vmatpush1.msra.mxu1 %v2317_v42  ;;  %v2273_v30 = vld [vmem:[#allocation7 + $0x1420] sm:$0xff]  ;;  %v2142_v34 = vld [vmem:[#allocation7 + $0x1008] sm:$0xff] }
 0x1ef   :  { %2967 = vmatprep.subr.mxu0 %v2186_v33  ;;  %3038 = vmatprep.subr.mxu1 %v2314_v50  ;;  %v2270_v42 = vld [vmem:[#allocation7 + $0x1408] sm:$0xff]  ;;  %v2141_v33 = vld [vmem:[#allocation7 + $0x1000] sm:$0xff] }
 0x1f0   :  { %2968 = vmatpush1.msra.mxu0 %v2185_v43  ;;  %3039 = vmatpush1.msra.mxu1 %v2313_v51  ;;  %v2269_v50 = vld [vmem:[#allocation7 + $0x1400] sm:$0xff]  ;;  %v2266_v43 = vld [vmem:[#allocation7 + $0x13e8] sm:$0xff] }
 0x1f1   :  { %2969 = vmatprep.subr.mxu0 %v2182_v41  ;;  %3040 = vmatprep.subr.mxu1 %v2310_v6  ;;  %v2394_v51 = vld [vmem:[#allocation7 + $0x17e8] sm:$0xff]  ;;  %v2265_v41 = vld [vmem:[#allocation7 + $0x13e0] sm:$0xff] }
 0x1f2   :  { %2970 = vmatpush1.msra.mxu0 %v2181_v57  ;;  %3041 = vmatpush1.msra.mxu1 %v2309_v63  ;;  %v2393_v6 = vld [vmem:[#allocation7 + $0x17e0] sm:$0xff]  ;;  %v2262_v57 = vld [vmem:[#allocation7 + $0x13c8] sm:$0xff] }
 0x1f3   :  { %2971 = vmatprep.subr.mxu0 %v2178_v39  ;;  %3042 = vmatprep.subr.mxu1 %v2306_v13  ;;  %v2390_v63 = vld [vmem:[#allocation7 + $0x17c8] sm:$0xff]  ;;  %v2261_v39 = vld [vmem:[#allocation7 + $0x13c0] sm:$0xff] }
 0x1f4   :  { %2972 = vmatpush1.msra.mxu0 %v2177_v4  ;;  %3043 = vmatpush1.msra.mxu1 %v2305_v45  ;;  %v2389_v13 = vld [vmem:[#allocation7 + $0x17c0] sm:$0xff]  ;;  %v2258_v4 = vld [vmem:[#allocation7 + $0x13a8] sm:$0xff] }
 0x1f5   :  { %2973 = vmatprep.subr.mxu0 %v2174_v53  ;;  %3044 = vmatprep.subr.mxu1 %v2302_v54  ;;  %v2386_v45 = vld [vmem:[#allocation7 + $0x17a8] sm:$0xff]  ;;  %v2257_v53 = vld [vmem:[#allocation7 + $0x13a0] sm:$0xff] }
 0x1f6   :  { %2974 = vmatpush1.msra.mxu0 %v2173_v52  ;;  %3045 = vmatpush1.msra.mxu1 %v2301_v7  ;;  %v2385_v54 = vld [vmem:[#allocation7 + $0x17a0] sm:$0xff]  ;;  %v2254_v52 = vld [vmem:[#allocation7 + $0x1388] sm:$0xff] }
 0x1f7   :  { %2975 = vmatprep.subr.mxu0 %v2170_v40  ;;  %3046 = vmatprep.subr.mxu1 %v2298_v17  ;;  %v2382_v7 = vld [vmem:[#allocation7 + $0x1788] sm:$0xff]  ;;  %v2253_v40 = vld [vmem:[#allocation7 + $0x1380] sm:$0xff] }
 0x1f8   :  { %2976 = vmatpush1.msra.mxu0 %v2169_v32  ;;  %3047 = vmatpush1.msra.mxu1 %v2297_v26  ;;  %v2381_v17 = vld [vmem:[#allocation7 + $0x1780] sm:$0xff]  ;;  %v2250_v32 = vld [vmem:[#allocation7 + $0x1368] sm:$0xff] }
 0x1f9   :  { %2977 = vmatprep.subr.mxu0 %v2166_v16  ;;  %3048 = vmatprep.subr.mxu1 %v2294_v55  ;;  %v2378_v26 = vld [vmem:[#allocation7 + $0x1768] sm:$0xff]  ;;  %v2249_v16 = vld [vmem:[#allocation7 + $0x1360] sm:$0xff] }
 0x1fa   :  { %2978 = vmatpush1.msra.mxu0 %v2165_v9  ;;  %3049 = vmatpush1.msra.mxu1 %v2293_v61  ;;  %v2377_v55 = vld [vmem:[#allocation7 + $0x1760] sm:$0xff]  ;;  %v2246_v9 = vld [vmem:[#allocation7 + $0x1348] sm:$0xff] }
 0x1fb   :  { %2979 = vmatprep.subr.mxu0 %v2162_v11  ;;  %3050 = vmatprep.subr.mxu1 %v2290_v60  ;;  %v2374_v61 = vld [vmem:[#allocation7 + $0x1748] sm:$0xff]  ;;  %v2245_v11 = vld [vmem:[#allocation7 + $0x1340] sm:$0xff] }
 0x1fc   :  { %2980 = vmatpush1.msra.mxu0 %v2161_v21  ;;  %3051 = vmatpush1.msra.mxu1 %v2289_v10  ;;  %v2373_v60 = vld [vmem:[#allocation7 + $0x1740] sm:$0xff]  ;;  %v2242_v21 = vld [vmem:[#allocation7 + $0x1328] sm:$0xff] }
 0x1fd   :  { %2981 = vmatprep.subr.mxu0 %v2158_v15  ;;  %3052 = vmatprep.subr.mxu1 %v2286_v28  ;;  %v2370_v10 = vld [vmem:[#allocation7 + $0x1728] sm:$0xff]  ;;  %v2241_v15 = vld [vmem:[#allocation7 + $0x1320] sm:$0xff] }
 0x1fe   :  { %2982 = vmatpush1.msra.mxu0 %v2157_v35  ;;  %3053 = vmatpush1.msra.mxu1 %v2285_v48  ;;  %v2369_v28 = vld [vmem:[#allocation7 + $0x1720] sm:$0xff]  ;;  %v2238_v35 = vld [vmem:[#allocation7 + $0x1308] sm:$0xff] }
 0x1ff   :  { %2983 = vmatprep.subr.mxu0 %v2154_v56  ;;  %3054 = vmatprep.subr.mxu1 %v2282_v44  ;;  %v2366_v48 = vld [vmem:[#allocation7 + $0x1708] sm:$0xff]  ;;  %v2237_v56 = vld [vmem:[#allocation7 + $0x1300] sm:$0xff] }
 0x200   :  { %2984 = vmatpush1.msra.mxu0 %v2153_v19  ;;  %3055 = vmatpush1.msra.mxu1 %v2281_v31  ;;  %v2365_v44 = vld [vmem:[#allocation7 + $0x1700] sm:$0xff]  ;;  %v2234_v19 = vld [vmem:[#allocation7 + $0x12e8] sm:$0xff] }
 0x201   :  { %2985 = vmatprep.subr.mxu0 %v2150_v1  ;;  %3056 = vmatprep.subr.mxu1 %v2278_v23  ;;  %v2362_v31 = vld [vmem:[#allocation7 + $0x16e8] sm:$0xff]  ;;  %v2233_v1 = vld [vmem:[#allocation7 + $0x12e0] sm:$0xff] }
 0x202   :  { %2986 = vmatpush1.msra.mxu0 %v2149_v49  ;;  %3057 = vmatpush1.msra.mxu1 %v2277_v2  ;;  %v2361_v23 = vld [vmem:[#allocation7 + $0x16e0] sm:$0xff]  ;;  %v2230_v49 = vld [vmem:[#allocation7 + $0x12c8] sm:$0xff] }
 0x203   :  { %2987 = vmatprep.subr.mxu0 %v2146_v20  ;;  %3058 = vmatprep.subr.mxu1 %v2274_v24  ;;  %v2358_v2 = vld [vmem:[#allocation7 + $0x16c8] sm:$0xff]  ;;  %v2229_v20 = vld [vmem:[#allocation7 + $0x12c0] sm:$0xff] }
 0x204   :  { %2988 = vmatpush1.msra.mxu0 %v2145_v0  ;;  %3059 = vmatpush1.msra.mxu1 %v2273_v30  ;;  %v2357_v24 = vld [vmem:[#allocation7 + $0x16c0] sm:$0xff]  ;;  %v2226_v0 = vld [vmem:[#allocation7 + $0x12a8] sm:$0xff] }
 0x205   :  { %2989 = vmatprep.subr.mxu0 %v2142_v34  ;;  %3060 = vmatprep.subr.mxu1 %v2270_v42  ;;  %v2354_v30 = vld [vmem:[#allocation7 + $0x16a8] sm:$0xff]  ;;  %v2225_v34 = vld [vmem:[#allocation7 + $0x12a0] sm:$0xff] }
 0x206   :  { %2990 = vmatpush1.msra.mxu0 %v2141_v33  ;;  %3061 = vmatpush1.msra.mxu1 %v2269_v50  ;;  %v2353_v42 = vld [vmem:[#allocation7 + $0x16a0] sm:$0xff]  ;;  %v2222_v33 = vld [vmem:[#allocation7 + $0x1288] sm:$0xff] }
 0x207   :  { %2991 = vmatprep.subr.mxu0 %v2266_v43  ;;  %3062 = vmatprep.subr.mxu1 %v2394_v51  ;;  %v2350_v50 = vld [vmem:[#allocation7 + $0x1688] sm:$0xff]  ;;  %v5461_v43 = vld [vmem:[#allocation5 + $0x8] sm:$0xff]  ;;  %v1411_v51 = vpop.f32.mrf.mxu0 }
 0x208   :  { %2992 = vmatpush2.msra.mxu0 %v2265_v41  ;;  %3063 = vmatpush2.msra.mxu1 %v2393_v6  ;;  %v2221_v41 = vld [vmem:[#allocation7 + $0x1280] sm:$0xff] }
 0x209   :  { %2993 = vmatprep.subr.mxu0 %v2262_v57  ;;  %3064 = vmatprep.subr.mxu1 %v2390_v63  ;;  %v2349_v6 = vld [vmem:[#allocation7 + $0x1680] sm:$0xff]  ;;  %v2218_v57 = vld [vmem:[#allocation7 + $0x1268] sm:$0xff] }
 0x20a   :  { %2994 = vmatpush2.msra.mxu0 %v2261_v39  ;;  %3065 = vmatpush2.msra.mxu1 %v2389_v13  ;;  %v2346_v63 = vld [vmem:[#allocation7 + $0x1668] sm:$0xff]  ;;  %v1482_v39 = vpop.f32.mrf.mxu1  ;;  %v2217_v13 = vld [vmem:[#allocation7 + $0x1260] sm:$0xff] }
 0x20b   :  { %2995 = vmatprep.subr.mxu0 %v2258_v4  ;;  %3066 = vmatprep.subr.mxu1 %v2386_v45  ;;  %v2345_v4 = vld [vmem:[#allocation7 + $0x1660] sm:$0xff]  ;;  %v947_v45 = vrot.slane %v5461_v43, %v5403_v27 }
 0x20c   :  { %2996 = vmatpush2.msra.mxu0 %v2257_v53  ;;  %3067 = vmatpush2.msra.mxu1 %v2385_v54  ;;  %v2214_v53 = vld [vmem:[#allocation7 + $0x1248] sm:$0xff] }
 0x20d   :  { %2997 = vmatprep.subr.mxu0 %v2254_v52  ;;  %3068 = vmatprep.subr.mxu1 %v2382_v7  ;;  %v2342_v54 = vld [vmem:[#allocation7 + $0x1648] sm:$0xff]  ;;  %v1413_v52 = vpop.f32.mrf.mxu0  ;;  %v2213_v7 = vld [vmem:[#allocation7 + $0x1240] sm:$0xff] }
 0x20e   :  { %2998 = vmatpush2.msra.mxu0 %v2253_v40  ;;  %3069 = vmatpush2.msra.mxu1 %v2381_v17  ;;  %v2341_v40 = vld [vmem:[#allocation7 + $0x1640] sm:$0xff]  ;;  %v955_v17 = vrot.slane %v5461_v43, %v5406_v14 }
 0x20f   :  { %2999 = vmatprep.subr.mxu0 %v2250_v32  ;;  %3070 = vmatprep.subr.mxu1 %v2378_v26  ;;  %v951_v32 = vrot.slane %v5461_v43, %v5400_v25  ;;  %v1484_v26 = vpop.f32.mrf.mxu1 }
 0x210   :  { %3000 = vmatpush2.msra.mxu0 %v2249_v16  ;;  %3071 = vmatpush2.msra.mxu1 %v2377_v55  ;;  %v2210_v16 = vld [vmem:[#allocation7 + $0x1228] sm:$0xff] }
 0x211   :  { %3001 = vmatprep.subr.mxu0 %v2246_v9  ;;  %3072 = vmatprep.subr.mxu1 %v2374_v61  ;;  %v2338_v55 = vld [vmem:[#allocation7 + $0x1628] sm:$0xff]  ;;  %v5469_v9 = vadd.f32 %v1413_v52, %v947_v45  ;;  %v2209_v61 = vld [vmem:[#allocation7 + $0x1220] sm:$0xff] }
 0x212   :  { %3002 = vmatpush2.msra.mxu0 %v2245_v11  ;;  %3073 = vmatpush2.msra.mxu1 %v2373_v60  ;;  %v2337_v11 = vld [vmem:[#allocation7 + $0x1620] sm:$0xff]  ;;  %v943_v60 = vrot.slane %v5461_v43, %v5409_v47  ;;  %v2570_v45 = vld [vmem:[#allocation7 + $0x1d68] sm:$0xff] }
 0x213   :  { %3003 = vmatprep.subr.mxu0 %v2242_v21  ;;  %3074 = vmatprep.subr.mxu1 %v2370_v10  ;;  %v2206_v21 = vld [vmem:[#allocation7 + $0x1208] sm:$0xff]  ;;  %v5473_v10 = vpop.f32.mrf.mxu0 }
 0x214   :  { %3004 = vmatpush2.msra.mxu0 %v2241_v15  ;;  %3075 = vmatpush2.msra.mxu1 %v2369_v28  ;;  %v5475_v15 = vadd.f32 %v1484_v26, %v955_v17  ;;  %v2334_v28 = vld [vmem:[#allocation7 + $0x1608] sm:$0xff]  ;;  %v2565_v17 = vld [vmem:[#allocation7 + $0x1d40] sm:$0xff] }
 0x215   :  { %3005 = vmatprep.subr.mxu0 %v2238_v35  ;;  %3076 = vmatprep.subr.mxu1 %v2366_v48  ;;  %v2205_v35 = vld [vmem:[#allocation7 + $0x1200] sm:$0xff]  ;;  %v5477_v48 = vadd.f32 %v1482_v39, %v951_v32  ;;  %v2438_v52 = vld [vmem:[#allocation7 + $0x1948] sm:$0xff] }
 0x216   :  { %3006 = vmatpush2.msra.mxu0 %v2237_v56  ;;  %3077 = vmatpush2.msra.mxu1 %v2365_v44  ;;  %v2333_v56 = vld [vmem:[#allocation7 + $0x1600] sm:$0xff]  ;;  %v963_v44 = vrot.slane %v5461_v43, %v930_v3  ;;  %v2582_v3 = vld [vmem:[#allocation7 + $0x1dc8] sm:$0xff] }
 0x217   :  { %3007 = vmatprep.subr.mxu0 %v2234_v19  ;;  %3078 = vmatprep.subr.mxu1 %v2362_v31  ;;  %v5483_v19 = vpop.f32.mrf.mxu1  ;;  %v5485_v31 = vadd.f32 %v1411_v51, %v943_v60  ;;  %v2578_v51 = vld [vmem:[#allocation7 + $0x1da8] sm:$0xff]  ;;  %v2445_v39 = vld [vmem:[#allocation7 + $0x1980] sm:$0xff] }
 0x218   :  { %3008 = vmatpush2.msra.mxu0 %v2233_v1  ;;  %3079 = vmatpush2.msra.mxu1 %v2361_v23  ;;  %v2458_v1 = vld [vmem:[#allocation7 + $0x19e8] sm:$0xff]  ;;  %v2429_v60 = vld [vmem:[#allocation7 + $0x1900] sm:$0xff] }
 0x219   :  { %3009 = vmatprep.subr.mxu0 %v2230_v49  ;;  %3080 = vmatprep.subr.mxu1 %v2358_v2  ;;  %v2586_v23 = vld [vmem:[#allocation7 + $0x1de8] sm:$0xff]  ;;  %v1555_v49 = vpop.f32.mrf.mxu0  ;;  %v2457_v2 = vld [vmem:[#allocation7 + $0x19e0] sm:$0xff] }
 0x21a   :  { %3010 = vmatpush2.msra.mxu0 %v2229_v20  ;;  %3081 = vmatpush2.msra.mxu1 %v2357_v24  ;;  %v2585_v20 = vld [vmem:[#allocation7 + $0x1de0] sm:$0xff]  ;;  %v2454_v24 = vld [vmem:[#allocation7 + $0x19c8] sm:$0xff] }
 0x21b   :  { %3011 = vmatprep.subr.mxu0 %v2226_v0  ;;  %3082 = vmatprep.subr.mxu1 %v2354_v30  ;;  %v971_v0 = vrot.slane %v5461_v43, %v938_v46  ;;  %v5493_v30 = vadd.f32 %v1555_v49, %v963_v44  ;;  %v2446_v46 = vld [vmem:[#allocation7 + $0x1988] sm:$0xff]  ;;  %v2553_v44 = vld [vmem:[#allocation7 + $0x1ce0] sm:$0xff] }
 0x21c   :  { %3012 = vmatpush2.msra.mxu0 %v2225_v34  ;;  %3083 = vmatpush2.msra.mxu1 %v2353_v42  ;;  %v1626_v34 = vpop.f32.mrf.mxu1  ;;  %v2453_v42 = vld [vmem:[#allocation7 + $0x19c0] sm:$0xff]  ;;  %v2434_v32 = vld [vmem:[#allocation7 + $0x1928] sm:$0xff] }
 0x21d   :  { %3013 = vmatprep.subr.mxu0 %v2222_v33  ;;  %3084 = vmatprep.subr.mxu1 %v2350_v50  ;;  %v2581_v33 = vld [vmem:[#allocation7 + $0x1dc0] sm:$0xff]  ;;  %v2450_v50 = vld [vmem:[#allocation7 + $0x19a8] sm:$0xff] }
 0x21e   :  { %3014 = vmatpush2.msra.mxu0 %v2221_v41  ;;  %3085 = vmatpush2.msra.mxu1 %v2349_v6  ;;  %v2449_v41 = vld [vmem:[#allocation7 + $0x19a0] sm:$0xff]  ;;  %v5495_v6 = vadd.f32 %v1626_v34, %v971_v0  ;;  %v2562_v26 = vld [vmem:[#allocation7 + $0x1d28] sm:$0xff] }
 0x21f   :  { %3015 = vmatprep.subr.mxu0 %v2218_v57  ;;  %3086 = vmatprep.subr.mxu1 %v2346_v63  ;;  %v2577_v57 = vld [vmem:[#allocation7 + $0x1da0] sm:$0xff]  ;;  %v2574_v63 = vld [vmem:[#allocation7 + $0x1d88] sm:$0xff] }
 0x220   :  { %3016 = vmatpush2.msra.mxu0 %v2217_v13  ;;  %3087 = vmatpush2.msra.mxu1 %v2345_v4  ;;  %v2573_v13 = vld [vmem:[#allocation7 + $0x1d80] sm:$0xff]  ;;  %v2442_v4 = vld [vmem:[#allocation7 + $0x1968] sm:$0xff] }
 0x221   :  { %3017 = vmatprep.subr.mxu0 %v2214_v53  ;;  %3088 = vmatprep.subr.mxu1 %v2342_v54  ;;  %v2441_v53 = vld [vmem:[#allocation7 + $0x1960] sm:$0xff]  ;;  %v2414_v34 = vld [vmem:[#allocation7 + $0x1888] sm:$0xff] }
 0x222   :  { %3018 = vmatpush2.msra.mxu0 %v2213_v7  ;;  %3089 = vmatpush2.msra.mxu1 %v2341_v40  ;;  %v2569_v54 = vld [vmem:[#allocation7 + $0x1d60] sm:$0xff]  ;;  %v2566_v7 = vld [vmem:[#allocation7 + $0x1d48] sm:$0xff] }
 0x223   :  { %3019 = vmatprep.subr.mxu0 %v2210_v16  ;;  %3090 = vmatprep.subr.mxu1 %v2338_v55  ;;  %v2437_v40 = vld [vmem:[#allocation7 + $0x1940] sm:$0xff] }
 0x224   :  { %3020 = vmatpush2.msra.mxu0 %v2209_v61  ;;  %3091 = vmatpush2.msra.mxu1 %v2337_v11  ;;  %v2433_v16 = vld [vmem:[#allocation7 + $0x1920] sm:$0xff]  ;;  %v2430_v61 = vld [vmem:[#allocation7 + $0x1908] sm:$0xff] }
 0x225   :  { %3021 = vmatprep.subr.mxu0 %v2206_v21  ;;  %3023 = vmatprep.mubr.f32.mxu0 %v5469_v9  ;;  %v2561_v55 = vld [vmem:[#allocation7 + $0x1d20] sm:$0xff]  ;;  %v2558_v11 = vld [vmem:[#allocation7 + $0x1d08] sm:$0xff] }
 0x226   :  { %3092 = vmatprep.subr.mxu1 %v2334_v28  ;;  %3022 = vmatpush2.msra.mxu0 %v2205_v35  ;;  %v2557_v21 = vld [vmem:[#allocation7 + $0x1d00] sm:$0xff]  ;;  %v2426_v28 = vld [vmem:[#allocation7 + $0x18e8] sm:$0xff] }
 0x227   :  { %3093 = vmatpush2.msra.mxu1 %v2333_v56  ;;  %3094 = vmatprep.mubr.f32.mxu1 %v5475_v15  ;;  %v2554_v35 = vld [vmem:[#allocation7 + $0x1ce8] sm:$0xff]  ;;  %v2425_v56 = vld [vmem:[#allocation7 + $0x18e0] sm:$0xff] }
 0x228   :  { %3024 = vmatmul.mubr.f32.vlgmr.msra.gmra.mxu0 %v5485_v31  ;;  %3095 = vmatmul.mubr.f32.vlgmr.msra.gmra.mxu1 %v5477_v48  ;;  %v2421_v49 = vld [vmem:[#allocation7 + $0x18c0] sm:$0xff] }
 0x229   :  { %3101 = vmatprep.subr.mxu0 %v2458_v1  ;;  %3172 = vmatprep.subr.mxu1 %v2586_v23  ;;  %v2422_v1 = vld [vmem:[#allocation7 + $0x18c8] sm:$0xff]  ;;  %v2545_v0 = vld [vmem:[#allocation7 + $0x1ca0] sm:$0xff] }
 0x22a   :  { %3102 = vmatpush1.msra.mxu0 %v2457_v2  ;;  %3173 = vmatpush1.msra.mxu1 %v2585_v20  ;;  %v2550_v23 = vld [vmem:[#allocation7 + $0x1cc8] sm:$0xff]  ;;  %v2549_v2 = vld [vmem:[#allocation7 + $0x1cc0] sm:$0xff] }
 0x22b   :  { %3103 = vmatprep.subr.mxu0 %v2454_v24  ;;  %3174 = vmatprep.subr.mxu1 %v2582_v3  ;;  %v2418_v20 = vld [vmem:[#allocation7 + $0x18a8] sm:$0xff]  ;;  %v2417_v3 = vld [vmem:[#allocation7 + $0x18a0] sm:$0xff] }
 0x22c   :  { %3104 = vmatpush1.msra.mxu0 %v2453_v42  ;;  %3175 = vmatpush1.msra.mxu1 %v2581_v33  ;;  %v2546_v24 = vld [vmem:[#allocation7 + $0x1ca8] sm:$0xff]  ;;  %v2413_v33 = vld [vmem:[#allocation7 + $0x1880] sm:$0xff] }
 0x22d   :  { %3105 = vmatprep.subr.mxu0 %v2450_v50  ;;  %3165 = vmatprep.mubr.f32.mxu0 %v5493_v30  ;;  %v2542_v42 = vld [vmem:[#allocation7 + $0x1c88] sm:$0xff]  ;;  %v2541_v50 = vld [vmem:[#allocation7 + $0x1c80] sm:$0xff] }
 0x22e   :  { %3176 = vmatprep.subr.mxu1 %v2578_v51  ;;  %3106 = vmatpush1.msra.mxu0 %v2449_v41  ;;  %v2410_v51 = vld [vmem:[#allocation7 + $0x1868] sm:$0xff] }
 0x22f   :  { %3177 = vmatpush1.msra.mxu1 %v2577_v57  ;;  %3107 = vmatprep.subr.mxu0 %v2446_v46  ;;  %v2538_v41 = vld [vmem:[#allocation7 + $0x1c68] sm:$0xff]  ;;  %v2409_v57 = vld [vmem:[#allocation7 + $0x1860] sm:$0xff] }
 0x230   :  { %3178 = vmatprep.subr.mxu1 %v2574_v63  ;;  %3236 = vmatprep.mubr.f32.mxu1 %v5495_v6  ;;  %v2537_v46 = vld [vmem:[#allocation7 + $0x1c60] sm:$0xff]  ;;  %v2406_v63 = vld [vmem:[#allocation7 + $0x1848] sm:$0xff] }
 0x231   :  { %3108 = vmatpush1.msra.mxu0 %v2445_v39  ;;  %3179 = vmatpush1.msra.mxu1 %v2573_v13  ;;  %v2534_v39 = vld [vmem:[#allocation7 + $0x1c48] sm:$0xff]  ;;  %v2405_v13 = vld [vmem:[#allocation7 + $0x1840] sm:$0xff] }
 0x232   :  { %3109 = vmatprep.subr.mxu0 %v2442_v4  ;;  %3180 = vmatprep.subr.mxu1 %v2570_v45  ;;  %v2533_v4 = vld [vmem:[#allocation7 + $0x1c40] sm:$0xff]  ;;  %v2402_v45 = vld [vmem:[#allocation7 + $0x1828] sm:$0xff] }
 0x233   :  { %3110 = vmatpush1.msra.mxu0 %v2441_v53  ;;  %3181 = vmatpush1.msra.mxu1 %v2569_v54  ;;  %v2530_v53 = vld [vmem:[#allocation7 + $0x1c28] sm:$0xff]  ;;  %v2401_v54 = vld [vmem:[#allocation7 + $0x1820] sm:$0xff] }
 0x234   :  { %3111 = vmatprep.subr.mxu0 %v2438_v52  ;;  %3182 = vmatprep.subr.mxu1 %v2566_v7  ;;  %v2529_v52 = vld [vmem:[#allocation7 + $0x1c20] sm:$0xff]  ;;  %v2398_v7 = vld [vmem:[#allocation7 + $0x1808] sm:$0xff] }
 0x235   :  { %3112 = vmatpush1.msra.mxu0 %v2437_v40  ;;  %3183 = vmatpush1.msra.mxu1 %v2565_v17  ;;  %v2526_v40 = vld [vmem:[#allocation7 + $0x1c08] sm:$0xff]  ;;  %v2397_v17 = vld [vmem:[#allocation7 + $0x1800] sm:$0xff] }
 0x236   :  { %3113 = vmatprep.subr.mxu0 %v2434_v32  ;;  %3184 = vmatprep.subr.mxu1 %v2562_v26  ;;  %v2525_v32 = vld [vmem:[#allocation7 + $0x1c00] sm:$0xff]  ;;  %v2522_v26 = vld [vmem:[#allocation7 + $0x1be8] sm:$0xff] }
 0x237   :  { %3114 = vmatpush1.msra.mxu0 %v2433_v16  ;;  %3185 = vmatpush1.msra.mxu1 %v2561_v55  ;;  %v2650_v16 = vld [vmem:[#allocation7 + $0x1fe8] sm:$0xff]  ;;  %v2521_v55 = vld [vmem:[#allocation7 + $0x1be0] sm:$0xff] }
 0x238   :  { %3115 = vmatprep.subr.mxu0 %v2430_v61  ;;  %3186 = vmatprep.subr.mxu1 %v2558_v11  ;;  %v2649_v61 = vld [vmem:[#allocation7 + $0x1fe0] sm:$0xff]  ;;  %v2518_v11 = vld [vmem:[#allocation7 + $0x1bc8] sm:$0xff] }
 0x239   :  { %3116 = vmatpush1.msra.mxu0 %v2429_v60  ;;  %3187 = vmatpush1.msra.mxu1 %v2557_v21  ;;  %v2646_v60 = vld [vmem:[#allocation7 + $0x1fc8] sm:$0xff]  ;;  %v2517_v21 = vld [vmem:[#allocation7 + $0x1bc0] sm:$0xff] }
 0x23a   :  { %3117 = vmatprep.subr.mxu0 %v2426_v28  ;;  %3188 = vmatprep.subr.mxu1 %v2554_v35  ;;  %v2645_v28 = vld [vmem:[#allocation7 + $0x1fc0] sm:$0xff]  ;;  %v2514_v35 = vld [vmem:[#allocation7 + $0x1ba8] sm:$0xff] }
 0x23b   :  { %3118 = vmatpush1.msra.mxu0 %v2425_v56  ;;  %3189 = vmatpush1.msra.mxu1 %v2553_v44  ;;  %v2642_v56 = vld [vmem:[#allocation7 + $0x1fa8] sm:$0xff]  ;;  %v2513_v44 = vld [vmem:[#allocation7 + $0x1ba0] sm:$0xff] }
 0x23c   :  { %3119 = vmatprep.subr.mxu0 %v2422_v1  ;;  %3190 = vmatprep.subr.mxu1 %v2550_v23  ;;  %v2641_v1 = vld [vmem:[#allocation7 + $0x1fa0] sm:$0xff]  ;;  %v2510_v23 = vld [vmem:[#allocation7 + $0x1b88] sm:$0xff] }
 0x23d   :  { %3120 = vmatpush1.msra.mxu0 %v2421_v49  ;;  %3191 = vmatpush1.msra.mxu1 %v2549_v2  ;;  %v2638_v49 = vld [vmem:[#allocation7 + $0x1f88] sm:$0xff]  ;;  %v2509_v2 = vld [vmem:[#allocation7 + $0x1b80] sm:$0xff] }
 0x23e   :  { %3121 = vmatprep.subr.mxu0 %v2418_v20  ;;  %3192 = vmatprep.subr.mxu1 %v2546_v24  ;;  %v2637_v20 = vld [vmem:[#allocation7 + $0x1f80] sm:$0xff]  ;;  %v2506_v24 = vld [vmem:[#allocation7 + $0x1b68] sm:$0xff] }
 0x23f   :  { %3122 = vmatpush1.msra.mxu0 %v2417_v3  ;;  %3193 = vmatpush1.msra.mxu1 %v2545_v0  ;;  %v2634_v3 = vld [vmem:[#allocation7 + $0x1f68] sm:$0xff]  ;;  %v2505_v0 = vld [vmem:[#allocation7 + $0x1b60] sm:$0xff] }
 0x240   :  { %3123 = vmatprep.subr.mxu0 %v2414_v34  ;;  %3194 = vmatprep.subr.mxu1 %v2542_v42  ;;  %v2633_v34 = vld [vmem:[#allocation7 + $0x1f60] sm:$0xff]  ;;  %v2502_v42 = vld [vmem:[#allocation7 + $0x1b48] sm:$0xff] }
 0x241   :  { %3124 = vmatpush1.msra.mxu0 %v2413_v33  ;;  %3195 = vmatpush1.msra.mxu1 %v2541_v50  ;;  %v2630_v33 = vld [vmem:[#allocation7 + $0x1f48] sm:$0xff]  ;;  %v2501_v50 = vld [vmem:[#allocation7 + $0x1b40] sm:$0xff] }
 0x242   :  { %3125 = vmatprep.subr.mxu0 %v2410_v51  ;;  %3196 = vmatprep.subr.mxu1 %v2538_v41  ;;  %v2629_v51 = vld [vmem:[#allocation7 + $0x1f40] sm:$0xff]  ;;  %v2498_v41 = vld [vmem:[#allocation7 + $0x1b28] sm:$0xff] }
 0x243   :  { %3126 = vmatpush1.msra.mxu0 %v2409_v57  ;;  %3197 = vmatpush1.msra.mxu1 %v2537_v46  ;;  %v2626_v57 = vld [vmem:[#allocation7 + $0x1f28] sm:$0xff]  ;;  %v2497_v46 = vld [vmem:[#allocation7 + $0x1b20] sm:$0xff] }
 0x244   :  { %3127 = vmatprep.subr.mxu0 %v2406_v63  ;;  %3198 = vmatprep.subr.mxu1 %v2534_v39  ;;  %v2625_v63 = vld [vmem:[#allocation7 + $0x1f20] sm:$0xff]  ;;  %v2494_v39 = vld [vmem:[#allocation7 + $0x1b08] sm:$0xff] }
 0x245   :  { %3128 = vmatpush1.msra.mxu0 %v2405_v13  ;;  %3199 = vmatpush1.msra.mxu1 %v2533_v4  ;;  %v2622_v13 = vld [vmem:[#allocation7 + $0x1f08] sm:$0xff]  ;;  %v2493_v4 = vld [vmem:[#allocation7 + $0x1b00] sm:$0xff] }
 0x246   :  { %3129 = vmatprep.subr.mxu0 %v2402_v45  ;;  %3200 = vmatprep.subr.mxu1 %v2530_v53  ;;  %v2621_v45 = vld [vmem:[#allocation7 + $0x1f00] sm:$0xff]  ;;  %v2490_v53 = vld [vmem:[#allocation7 + $0x1ae8] sm:$0xff] }
 0x247   :  { %3130 = vmatpush1.msra.mxu0 %v2401_v54  ;;  %3201 = vmatpush1.msra.mxu1 %v2529_v52  ;;  %v2618_v54 = vld [vmem:[#allocation7 + $0x1ee8] sm:$0xff]  ;;  %v2489_v52 = vld [vmem:[#allocation7 + $0x1ae0] sm:$0xff] }
 0x248   :  { %3131 = vmatprep.subr.mxu0 %v2398_v7  ;;  %3202 = vmatprep.subr.mxu1 %v2526_v40  ;;  %v2617_v7 = vld [vmem:[#allocation7 + $0x1ee0] sm:$0xff]  ;;  %v2486_v40 = vld [vmem:[#allocation7 + $0x1ac8] sm:$0xff] }
 0x249   :  { %3132 = vmatpush1.msra.mxu0 %v2397_v17  ;;  %3203 = vmatpush1.msra.mxu1 %v2525_v32  ;;  %v2614_v17 = vld [vmem:[#allocation7 + $0x1ec8] sm:$0xff]  ;;  %v2485_v32 = vld [vmem:[#allocation7 + $0x1ac0] sm:$0xff] }
 0x24a   :  { %3133 = vmatprep.subr.mxu0 %v2522_v26  ;;  %3204 = vmatprep.subr.mxu1 %v2650_v16  ;;  %v2613_v26 = vld [vmem:[#allocation7 + $0x1ec0] sm:$0xff]  ;;  %v2482_v16 = vld [vmem:[#allocation7 + $0x1aa8] sm:$0xff] }
 0x24b   :  { %3134 = vmatpush2.msra.mxu0 %v2521_v55  ;;  %3205 = vmatpush2.msra.mxu1 %v2649_v61  ;;  %v2610_v55 = vld [vmem:[#allocation7 + $0x1ea8] sm:$0xff]  ;;  %v2481_v61 = vld [vmem:[#allocation7 + $0x1aa0] sm:$0xff] }
 0x24c   :  { %3135 = vmatprep.subr.mxu0 %v2518_v11  ;;  %3206 = vmatprep.subr.mxu1 %v2646_v60  ;;  %v2609_v11 = vld [vmem:[#allocation7 + $0x1ea0] sm:$0xff]  ;;  %v2478_v60 = vld [vmem:[#allocation7 + $0x1a88] sm:$0xff] }
 0x24d   :  { %3136 = vmatpush2.msra.mxu0 %v2517_v21  ;;  %3207 = vmatpush2.msra.mxu1 %v2645_v28  ;;  %v2606_v21 = vld [vmem:[#allocation7 + $0x1e88] sm:$0xff]  ;;  %v2477_v28 = vld [vmem:[#allocation7 + $0x1a80] sm:$0xff] }
 0x24e   :  { %3137 = vmatprep.subr.mxu0 %v2514_v35  ;;  %3208 = vmatprep.subr.mxu1 %v2642_v56  ;;  %v2605_v35 = vld [vmem:[#allocation7 + $0x1e80] sm:$0xff]  ;;  %v2474_v56 = vld [vmem:[#allocation7 + $0x1a68] sm:$0xff] }
 0x24f   :  { %3138 = vmatpush2.msra.mxu0 %v2513_v44  ;;  %3209 = vmatpush2.msra.mxu1 %v2641_v1  ;;  %v2602_v44 = vld [vmem:[#allocation7 + $0x1e68] sm:$0xff]  ;;  %v2473_v1 = vld [vmem:[#allocation7 + $0x1a60] sm:$0xff] }
 0x250   :  { %3139 = vmatprep.subr.mxu0 %v2510_v23  ;;  %3210 = vmatprep.subr.mxu1 %v2638_v49  ;;  %v2601_v23 = vld [vmem:[#allocation7 + $0x1e60] sm:$0xff]  ;;  %v2470_v49 = vld [vmem:[#allocation7 + $0x1a48] sm:$0xff] }
 0x251   :  { %3140 = vmatpush2.msra.mxu0 %v2509_v2  ;;  %3211 = vmatpush2.msra.mxu1 %v2637_v20  ;;  %v2598_v2 = vld [vmem:[#allocation7 + $0x1e48] sm:$0xff]  ;;  %v2469_v20 = vld [vmem:[#allocation7 + $0x1a40] sm:$0xff] }
 0x252   :  { %3141 = vmatprep.subr.mxu0 %v2506_v24  ;;  %3212 = vmatprep.subr.mxu1 %v2634_v3  ;;  %v2597_v24 = vld [vmem:[#allocation7 + $0x1e40] sm:$0xff]  ;;  %v2466_v3 = vld [vmem:[#allocation7 + $0x1a28] sm:$0xff] }
 0x253   :  { %3142 = vmatpush2.msra.mxu0 %v2505_v0  ;;  %3213 = vmatpush2.msra.mxu1 %v2633_v34  ;;  %v2594_v0 = vld [vmem:[#allocation7 + $0x1e28] sm:$0xff]  ;;  %v959_v34 = vrot.slane %v5461_v43, %v926_v18 }
 0x254   :  { %3143 = vmatprep.subr.mxu0 %v2502_v42  ;;  %3214 = vmatprep.subr.mxu1 %v2630_v33  ;;  %v967_v42 = vrot.slane %v5461_v43, %v934_v36  ;;  %v2465_v33 = vld [vmem:[#allocation7 + $0x1a20] sm:$0xff]  ;;  %v1692_v36 = vld [vmem:[#allocation7 + $0x1f8] sm:$0xff] }
 0x255   :  { %3144 = vmatpush2.msra.mxu0 %v2501_v50  ;;  %3215 = vmatpush2.msra.mxu1 %v2629_v51  ;;  %v2593_v50 = vld [vmem:[#allocation7 + $0x1e20] sm:$0xff]  ;;  %v2462_v51 = vld [vmem:[#allocation7 + $0x1a08] sm:$0xff]  ;;  %v5506_v18 = vadd.f32 %v5473_v10, %v959_v34  ;;  %v1820_v43 = vld [vmem:[#allocation7 + $0x5f8] sm:$0xff] }
 0x256   :  { %3145 = vmatprep.subr.mxu0 %v2498_v41  ;;  %3216 = vmatprep.subr.mxu1 %v2626_v57  ;;  %v2590_v41 = vld [vmem:[#allocation7 + $0x1e08] sm:$0xff]  ;;  %v2461_v57 = vld [vmem:[#allocation7 + $0x1a00] sm:$0xff]  ;;  %v5509_v12 = vadd.f32 %v5483_v19, %v967_v42  ;;  %v1816_v10 = vld [vmem:[#allocation7 + $0x5d8] sm:$0xff] }
 0x257   :  { %3146 = vmatpush2.msra.mxu0 %v2497_v46  ;;  %3217 = vmatpush2.msra.mxu1 %v2625_v63  ;;  %v2589_v46 = vld [vmem:[#allocation7 + $0x1e00] sm:$0xff]  ;;  %v1691_v63 = vld [vmem:[#allocation7 + $0x1f0] sm:$0xff]  ;;  %v1784_v34 = vld [vmem:[#allocation7 + $0x4d8] sm:$0xff] }
 0x258   :  { %3147 = vmatprep.subr.mxu0 %v2494_v39  ;;  %3218 = vmatprep.subr.mxu1 %v2622_v13  ;;  %v1819_v39 = vld [vmem:[#allocation7 + $0x5f0] sm:$0xff]  ;;  %v1688_v13 = vld [vmem:[#allocation7 + $0x1d8] sm:$0xff] }
 0x259   :  { %3148 = vmatpush2.msra.mxu0 %v2493_v4  ;;  %3219 = vmatpush2.msra.mxu1 %v2621_v45  ;;  %v1687_v19 = vld [vmem:[#allocation7 + $0x1d0] sm:$0xff]  ;;  %v1684_v45 = vld [vmem:[#allocation7 + $0x1b8] sm:$0xff] }
 0x25a   :  { %3149 = vmatprep.subr.mxu0 %v2490_v53  ;;  %3220 = vmatprep.subr.mxu1 %v2618_v54  ;;  %v1815_v4 = vld [vmem:[#allocation7 + $0x5d0] sm:$0xff]  ;;  %v1812_v53 = vld [vmem:[#allocation7 + $0x5b8] sm:$0xff] }
 0x25b   :  { %3150 = vmatpush2.msra.mxu0 %v2489_v52  ;;  %3221 = vmatpush2.msra.mxu1 %v2617_v7  ;;  %v1683_v54 = vld [vmem:[#allocation7 + $0x1b0] sm:$0xff]  ;;  %v1680_v7 = vld [vmem:[#allocation7 + $0x198] sm:$0xff] }
 0x25c   :  { %3151 = vmatprep.subr.mxu0 %v2486_v40  ;;  %3222 = vmatprep.subr.mxu1 %v2614_v17  ;;  %v1811_v52 = vld [vmem:[#allocation7 + $0x5b0] sm:$0xff]  ;;  %v1808_v40 = vld [vmem:[#allocation7 + $0x598] sm:$0xff] }
 0x25d   :  { %3152 = vmatpush2.msra.mxu0 %v2485_v32  ;;  %3223 = vmatpush2.msra.mxu1 %v2613_v26  ;;  %v1679_v17 = vld [vmem:[#allocation7 + $0x190] sm:$0xff]  ;;  %v1804_v26 = vld [vmem:[#allocation7 + $0x578] sm:$0xff] }
 0x25e   :  { %3153 = vmatprep.subr.mxu0 %v2482_v16  ;;  %3224 = vmatprep.subr.mxu1 %v2610_v55  ;;  %v1807_v32 = vld [vmem:[#allocation7 + $0x590] sm:$0xff]  ;;  %v1672_v55 = vld [vmem:[#allocation7 + $0x158] sm:$0xff] }
 0x25f   :  { %3154 = vmatpush2.msra.mxu0 %v2481_v61  ;;  %3225 = vmatpush2.msra.mxu1 %v2609_v11  ;;  %v1803_v16 = vld [vmem:[#allocation7 + $0x570] sm:$0xff]  ;;  %v1800_v61 = vld [vmem:[#allocation7 + $0x558] sm:$0xff] }
 0x260   :  { %3155 = vmatprep.subr.mxu0 %v2478_v60  ;;  %3226 = vmatprep.subr.mxu1 %v2606_v21  ;;  %v1671_v11 = vld [vmem:[#allocation7 + $0x150] sm:$0xff]  ;;  %v1668_v21 = vld [vmem:[#allocation7 + $0x138] sm:$0xff] }
 0x261   :  { %3156 = vmatpush2.msra.mxu0 %v2477_v28  ;;  %3227 = vmatpush2.msra.mxu1 %v2605_v35  ;;  %v1799_v60 = vld [vmem:[#allocation7 + $0x550] sm:$0xff]  ;;  %v1796_v28 = vld [vmem:[#allocation7 + $0x538] sm:$0xff] }
 0x262   :  { %3157 = vmatprep.subr.mxu0 %v2474_v56  ;;  %3228 = vmatprep.subr.mxu1 %v2602_v44  ;;  %v1667_v35 = vld [vmem:[#allocation7 + $0x130] sm:$0xff]  ;;  %v1664_v44 = vld [vmem:[#allocation7 + $0x118] sm:$0xff] }
 0x263   :  { %3158 = vmatpush2.msra.mxu0 %v2473_v1  ;;  %3229 = vmatpush2.msra.mxu1 %v2601_v23  ;;  %v1795_v56 = vld [vmem:[#allocation7 + $0x530] sm:$0xff]  ;;  %v1792_v1 = vld [vmem:[#allocation7 + $0x518] sm:$0xff] }
 0x264   :  { %3159 = vmatprep.subr.mxu0 %v2470_v49  ;;  %3230 = vmatprep.subr.mxu1 %v2598_v2  ;;  %v1663_v23 = vld [vmem:[#allocation7 + $0x110] sm:$0xff]  ;;  %v1660_v2 = vld [vmem:[#allocation7 + $0xf8] sm:$0xff] }
 0x265   :  { %3160 = vmatpush2.msra.mxu0 %v2469_v20  ;;  %3231 = vmatpush2.msra.mxu1 %v2597_v24  ;;  %v1791_v49 = vld [vmem:[#allocation7 + $0x510] sm:$0xff]  ;;  %v1788_v20 = vld [vmem:[#allocation7 + $0x4f8] sm:$0xff] }
 0x266   :  { %3161 = vmatprep.subr.mxu0 %v2466_v3  ;;  %3232 = vmatprep.subr.mxu1 %v2594_v0  ;;  %v1659_v24 = vld [vmem:[#allocation7 + $0xf0] sm:$0xff]  ;;  %v1656_v0 = vld [vmem:[#allocation7 + $0xd8] sm:$0xff] }
 0x267   :  { %3162 = vmatpush2.msra.mxu0 %v2465_v33  ;;  %3233 = vmatpush2.msra.mxu1 %v2593_v50  ;;  %v1787_v3 = vld [vmem:[#allocation7 + $0x4f0] sm:$0xff]  ;;  %v1652_v50 = vld [vmem:[#allocation7 + $0xb8] sm:$0xff] }
 0x268   :  { %3163 = vmatprep.subr.mxu0 %v2462_v51  ;;  %3234 = vmatprep.subr.mxu1 %v2590_v41  ;;  %v1655_v42 = vld [vmem:[#allocation7 + $0xd0] sm:$0xff]  ;;  %v1780_v51 = vld [vmem:[#allocation7 + $0x4b8] sm:$0xff] }
 0x269   :  { %3164 = vmatpush2.msra.mxu0 %v2461_v57  ;;  %3235 = vmatpush2.msra.mxu1 %v2589_v46  ;;  %v1783_v33 = vld [vmem:[#allocation7 + $0x4d0] sm:$0xff]  ;;  %v1648_v46 = vld [vmem:[#allocation7 + $0x98] sm:$0xff] }
 0x26a   :  { %3166 = vmatmul.mubr.f32.vlgmr.msra.gmra.mxu0 %v5506_v18  ;;  %3237 = vmatmul.mubr.f32.vlgmr.msra.gmra.mxu1 %v5509_v12  ;;  %v1651_v41 = vld [vmem:[#allocation7 + $0xb0] sm:$0xff] }
 0x26b   :  { %3243 = vmatprep.subr.mxu0 %v1692_v36  ;;  %3314 = vmatprep.subr.mxu1 %v1820_v43  ;;  %v1779_v57 = vld [vmem:[#allocation7 + $0x4b0] sm:$0xff]  ;;  %v1776_v36 = vld [vmem:[#allocation7 + $0x498] sm:$0xff] }
 0x26c   :  { %3244 = vmatpush1.msra.mxu0 %v1691_v63  ;;  %3307 = vmatprep.mubr.f32.mxu0 %v5423_v38  ;;  %v1676_v38 = vld [vmem:[#allocation7 + $0x178] sm:$0xff]  ;;  %v1647_v43 = vld [vmem:[#allocation7 + $0x90] sm:$0xff] }
 0x26d   :  { %3315 = vmatpush1.msra.mxu1 %v1819_v39  ;;  %3378 = vmatprep.mubr.f32.mxu1 %v5425_v29  ;;  %v1675_v29 = vld [vmem:[#allocation7 + $0x170] sm:$0xff]  ;;  %v1644_v39 = vld [vmem:[#allocation7 + $0x78] sm:$0xff] }
 0x26e   :  { %3245 = vmatprep.subr.mxu0 %v1688_v13  ;;  %3316 = vmatprep.subr.mxu1 %v1816_v10  ;;  %v1775_v63 = vld [vmem:[#allocation7 + $0x490] sm:$0xff]  ;;  %v1772_v13 = vld [vmem:[#allocation7 + $0x478] sm:$0xff] }
 0x26f   :  { %3246 = vmatpush1.msra.mxu0 %v1687_v19  ;;  %3317 = vmatpush1.msra.mxu1 %v1815_v4  ;;  %v1643_v10 = vld [vmem:[#allocation7 + $0x70] sm:$0xff]  ;;  %v1640_v4 = vld [vmem:[#allocation7 + $0x58] sm:$0xff] }
 0x270   :  { %3247 = vmatprep.subr.mxu0 %v1684_v45  ;;  %3318 = vmatprep.subr.mxu1 %v1812_v53  ;;  %v1771_v19 = vld [vmem:[#allocation7 + $0x470] sm:$0xff]  ;;  %v1768_v45 = vld [vmem:[#allocation7 + $0x458] sm:$0xff] }
 0x271   :  { %3248 = vmatpush1.msra.mxu0 %v1683_v54  ;;  %3319 = vmatpush1.msra.mxu1 %v1811_v52  ;;  %v1639_v53 = vld [vmem:[#allocation7 + $0x50] sm:$0xff]  ;;  %v1636_v52 = vld [vmem:[#allocation7 + $0x38] sm:$0xff] }
 0x272   :  { %3249 = vmatprep.subr.mxu0 %v1680_v7  ;;  %3320 = vmatprep.subr.mxu1 %v1808_v40  ;;  %v1767_v54 = vld [vmem:[#allocation7 + $0x450] sm:$0xff]  ;;  %v1764_v7 = vld [vmem:[#allocation7 + $0x438] sm:$0xff] }
 0x273   :  { %3250 = vmatpush1.msra.mxu0 %v1679_v17  ;;  %3321 = vmatpush1.msra.mxu1 %v1807_v32  ;;  %v1635_v40 = vld [vmem:[#allocation7 + $0x30] sm:$0xff]  ;;  %v1632_v32 = vld [vmem:[#allocation7 + $0x18] sm:$0xff] }
 0x274   :  { %3251 = vmatprep.subr.mxu0 %v1676_v38  ;;  %3322 = vmatprep.subr.mxu1 %v1804_v26  ;;  %v1763_v17 = vld [vmem:[#allocation7 + $0x430] sm:$0xff]  ;;  %v1760_v38 = vld [vmem:[#allocation7 + $0x418] sm:$0xff] }
 0x275   :  { %3252 = vmatpush1.msra.mxu0 %v1675_v29  ;;  %3323 = vmatpush1.msra.mxu1 %v1803_v16  ;;  %v1631_v26 = vld [vmem:[#allocation7 + $0x10] sm:$0xff]  ;;  %v1756_v16 = vld [vmem:[#allocation7 + $0x3f8] sm:$0xff] }
 0x276   :  { %3253 = vmatprep.subr.mxu0 %v1672_v55  ;;  %3324 = vmatprep.subr.mxu1 %v1800_v61  ;;  %v1759_v29 = vld [vmem:[#allocation7 + $0x410] sm:$0xff]  ;;  %v1884_v55 = vld [vmem:[#allocation7 + $0x7f8] sm:$0xff] }
 0x277   :  { %3254 = vmatpush1.msra.mxu0 %v1671_v11  ;;  %3325 = vmatpush1.msra.mxu1 %v1799_v60  ;;  %v1755_v61 = vld [vmem:[#allocation7 + $0x3f0] sm:$0xff]  ;;  %v1752_v60 = vld [vmem:[#allocation7 + $0x3d8] sm:$0xff] }
 0x278   :  { %3255 = vmatprep.subr.mxu0 %v1668_v21  ;;  %3326 = vmatprep.subr.mxu1 %v1796_v28  ;;  %v1883_v11 = vld [vmem:[#allocation7 + $0x7f0] sm:$0xff]  ;;  %v1880_v21 = vld [vmem:[#allocation7 + $0x7d8] sm:$0xff] }
 0x279   :  { %3256 = vmatpush1.msra.mxu0 %v1667_v35  ;;  %3327 = vmatpush1.msra.mxu1 %v1795_v56  ;;  %v1751_v28 = vld [vmem:[#allocation7 + $0x3d0] sm:$0xff]  ;;  %v1748_v56 = vld [vmem:[#allocation7 + $0x3b8] sm:$0xff] }
 0x27a   :  { %3257 = vmatprep.subr.mxu0 %v1664_v44  ;;  %3328 = vmatprep.subr.mxu1 %v1792_v1  ;;  %v1879_v35 = vld [vmem:[#allocation7 + $0x7d0] sm:$0xff]  ;;  %v1876_v44 = vld [vmem:[#allocation7 + $0x7b8] sm:$0xff] }
 0x27b   :  { %3258 = vmatpush1.msra.mxu0 %v1663_v23  ;;  %3329 = vmatpush1.msra.mxu1 %v1791_v49  ;;  %v1747_v1 = vld [vmem:[#allocation7 + $0x3b0] sm:$0xff]  ;;  %v1744_v49 = vld [vmem:[#allocation7 + $0x398] sm:$0xff] }
 0x27c   :  { %3259 = vmatprep.subr.mxu0 %v1660_v2  ;;  %3330 = vmatprep.subr.mxu1 %v1788_v20  ;;  %v1875_v23 = vld [vmem:[#allocation7 + $0x7b0] sm:$0xff]  ;;  %v1872_v2 = vld [vmem:[#allocation7 + $0x798] sm:$0xff] }
 0x27d   :  { %3260 = vmatpush1.msra.mxu0 %v1659_v24  ;;  %3331 = vmatpush1.msra.mxu1 %v1787_v3  ;;  %v1743_v20 = vld [vmem:[#allocation7 + $0x390] sm:$0xff]  ;;  %v1740_v3 = vld [vmem:[#allocation7 + $0x378] sm:$0xff] }
 0x27e   :  { %3261 = vmatprep.subr.mxu0 %v1656_v0  ;;  %3332 = vmatprep.subr.mxu1 %v1784_v34  ;;  %v1871_v24 = vld [vmem:[#allocation7 + $0x790] sm:$0xff]  ;;  %v1868_v0 = vld [vmem:[#allocation7 + $0x778] sm:$0xff] }
 0x27f   :  { %3262 = vmatpush1.msra.mxu0 %v1655_v42  ;;  %3333 = vmatpush1.msra.mxu1 %v1783_v33  ;;  %v1739_v34 = vld [vmem:[#allocation7 + $0x370] sm:$0xff]  ;;  %v1736_v33 = vld [vmem:[#allocation7 + $0x358] sm:$0xff] }
 0x280   :  { %3263 = vmatprep.subr.mxu0 %v1652_v50  ;;  %3334 = vmatprep.subr.mxu1 %v1780_v51  ;;  %v1867_v42 = vld [vmem:[#allocation7 + $0x770] sm:$0xff]  ;;  %v1864_v50 = vld [vmem:[#allocation7 + $0x758] sm:$0xff] }
 0x281   :  { %3264 = vmatpush1.msra.mxu0 %v1651_v41  ;;  %3335 = vmatpush1.msra.mxu1 %v1779_v57  ;;  %v1735_v51 = vld [vmem:[#allocation7 + $0x350] sm:$0xff]  ;;  %v1732_v57 = vld [vmem:[#allocation7 + $0x338] sm:$0xff] }
 0x282   :  { %3265 = vmatprep.subr.mxu0 %v1648_v46  ;;  %3336 = vmatprep.subr.mxu1 %v1776_v36  ;;  %v1863_v41 = vld [vmem:[#allocation7 + $0x750] sm:$0xff]  ;;  %v1860_v46 = vld [vmem:[#allocation7 + $0x738] sm:$0xff] }
 0x283   :  { %3266 = vmatpush1.msra.mxu0 %v1647_v43  ;;  %3337 = vmatpush1.msra.mxu1 %v1775_v63  ;;  %v1731_v36 = vld [vmem:[#allocation7 + $0x330] sm:$0xff]  ;;  %v1728_v63 = vld [vmem:[#allocation7 + $0x318] sm:$0xff] }
 0x284   :  { %3267 = vmatprep.subr.mxu0 %v1644_v39  ;;  %3338 = vmatprep.subr.mxu1 %v1772_v13  ;;  %v1859_v43 = vld [vmem:[#allocation7 + $0x730] sm:$0xff]  ;;  %v1856_v39 = vld [vmem:[#allocation7 + $0x718] sm:$0xff] }
 0x285   :  { %3268 = vmatpush1.msra.mxu0 %v1643_v10  ;;  %3339 = vmatpush1.msra.mxu1 %v1771_v19  ;;  %v1727_v13 = vld [vmem:[#allocation7 + $0x310] sm:$0xff]  ;;  %v1724_v19 = vld [vmem:[#allocation7 + $0x2f8] sm:$0xff] }
 0x286   :  { %3269 = vmatprep.subr.mxu0 %v1640_v4  ;;  %3340 = vmatprep.subr.mxu1 %v1768_v45  ;;  %v1855_v10 = vld [vmem:[#allocation7 + $0x710] sm:$0xff]  ;;  %v1852_v4 = vld [vmem:[#allocation7 + $0x6f8] sm:$0xff] }
 0x287   :  { %3270 = vmatpush1.msra.mxu0 %v1639_v53  ;;  %3341 = vmatpush1.msra.mxu1 %v1767_v54  ;;  %v1723_v45 = vld [vmem:[#allocation7 + $0x2f0] sm:$0xff]  ;;  %v1720_v54 = vld [vmem:[#allocation7 + $0x2d8] sm:$0xff] }
 0x288   :  { %3271 = vmatprep.subr.mxu0 %v1636_v52  ;;  %3342 = vmatprep.subr.mxu1 %v1764_v7  ;;  %v1851_v53 = vld [vmem:[#allocation7 + $0x6f0] sm:$0xff]  ;;  %v1848_v52 = vld [vmem:[#allocation7 + $0x6d8] sm:$0xff] }
 0x289   :  { %3272 = vmatpush1.msra.mxu0 %v1635_v40  ;;  %3343 = vmatpush1.msra.mxu1 %v1763_v17  ;;  %v1719_v7 = vld [vmem:[#allocation7 + $0x2d0] sm:$0xff]  ;;  %v1716_v17 = vld [vmem:[#allocation7 + $0x2b8] sm:$0xff] }
 0x28a   :  { %3273 = vmatprep.subr.mxu0 %v1632_v32  ;;  %3344 = vmatprep.subr.mxu1 %v1760_v38  ;;  %v1847_v40 = vld [vmem:[#allocation7 + $0x6d0] sm:$0xff]  ;;  %v1844_v32 = vld [vmem:[#allocation7 + $0x6b8] sm:$0xff] }
 0x28b   :  { %3274 = vmatpush1.msra.mxu0 %v1631_v26  ;;  %3345 = vmatpush1.msra.mxu1 %v1759_v29  ;;  %v1715_v38 = vld [vmem:[#allocation7 + $0x2b0] sm:$0xff]  ;;  %v1712_v29 = vld [vmem:[#allocation7 + $0x298] sm:$0xff] }
 0x28c   :  { %3275 = vmatprep.subr.mxu0 %v1756_v16  ;;  %3346 = vmatprep.subr.mxu1 %v1884_v55  ;;  %v1843_v26 = vld [vmem:[#allocation7 + $0x6b0] sm:$0xff]  ;;  %v1840_v16 = vld [vmem:[#allocation7 + $0x698] sm:$0xff] }
 0x28d   :  { %3276 = vmatpush2.msra.mxu0 %v1755_v61  ;;  %3347 = vmatpush2.msra.mxu1 %v1883_v11  ;;  %v1711_v55 = vld [vmem:[#allocation7 + $0x290] sm:$0xff]  ;;  %v1708_v11 = vld [vmem:[#allocation7 + $0x278] sm:$0xff] }
 0x28e   :  { %3277 = vmatprep.subr.mxu0 %v1752_v60  ;;  %3348 = vmatprep.subr.mxu1 %v1880_v21  ;;  %v1839_v61 = vld [vmem:[#allocation7 + $0x690] sm:$0xff]  ;;  %v1836_v60 = vld [vmem:[#allocation7 + $0x678] sm:$0xff] }
 0x28f   :  { %3278 = vmatpush2.msra.mxu0 %v1751_v28  ;;  %3349 = vmatpush2.msra.mxu1 %v1879_v35  ;;  %v1707_v21 = vld [vmem:[#allocation7 + $0x270] sm:$0xff]  ;;  %v1704_v35 = vld [vmem:[#allocation7 + $0x258] sm:$0xff] }
 0x290   :  { %3279 = vmatprep.subr.mxu0 %v1748_v56  ;;  %3350 = vmatprep.subr.mxu1 %v1876_v44  ;;  %v1835_v28 = vld [vmem:[#allocation7 + $0x670] sm:$0xff]  ;;  %v1832_v56 = vld [vmem:[#allocation7 + $0x658] sm:$0xff] }
 0x291   :  { %3280 = vmatpush2.msra.mxu0 %v1747_v1  ;;  %3351 = vmatpush2.msra.mxu1 %v1875_v23  ;;  %v1703_v44 = vld [vmem:[#allocation7 + $0x250] sm:$0xff]  ;;  %v1700_v23 = vld [vmem:[#allocation7 + $0x238] sm:$0xff] }
 0x292   :  { %3281 = vmatprep.subr.mxu0 %v1744_v49  ;;  %3352 = vmatprep.subr.mxu1 %v1872_v2  ;;  %v1831_v1 = vld [vmem:[#allocation7 + $0x650] sm:$0xff]  ;;  %v1828_v49 = vld [vmem:[#allocation7 + $0x638] sm:$0xff] }
 0x293   :  { %3282 = vmatpush2.msra.mxu0 %v1743_v20  ;;  %3353 = vmatpush2.msra.mxu1 %v1871_v24  ;;  %v1699_v2 = vld [vmem:[#allocation7 + $0x230] sm:$0xff]  ;;  %v1696_v24 = vld [vmem:[#allocation7 + $0x218] sm:$0xff] }
 0x294   :  { %3283 = vmatprep.subr.mxu0 %v1740_v3  ;;  %3354 = vmatprep.subr.mxu1 %v1868_v0  ;;  %v1827_v20 = vld [vmem:[#allocation7 + $0x630] sm:$0xff]  ;;  %v1824_v3 = vld [vmem:[#allocation7 + $0x618] sm:$0xff] }
 0x295   :  { %3284 = vmatpush2.msra.mxu0 %v1739_v34  ;;  %3355 = vmatpush2.msra.mxu1 %v1867_v42  ;;  %v1695_v0 = vld [vmem:[#allocation7 + $0x210] sm:$0xff]  ;;  %v1948_v42 = vld [vmem:[#allocation7 + $0x9f8] sm:$0xff] }
 0x296   :  { %3285 = vmatprep.subr.mxu0 %v1736_v33  ;;  %3356 = vmatprep.subr.mxu1 %v1864_v50  ;;  %v1823_v34 = vld [vmem:[#allocation7 + $0x610] sm:$0xff]  ;;  %v2076_v33 = vld [vmem:[#allocation7 + $0xdf8] sm:$0xff] }
 0x297   :  { %3286 = vmatpush2.msra.mxu0 %v1735_v51  ;;  %3357 = vmatpush2.msra.mxu1 %v1863_v41  ;;  %v1947_v50 = vld [vmem:[#allocation7 + $0x9f0] sm:$0xff]  ;;  %v1944_v41 = vld [vmem:[#allocation7 + $0x9d8] sm:$0xff] }
 0x298   :  { %3287 = vmatprep.subr.mxu0 %v1732_v57  ;;  %3358 = vmatprep.subr.mxu1 %v1860_v46  ;;  %v2075_v51 = vld [vmem:[#allocation7 + $0xdf0] sm:$0xff]  ;;  %v2072_v57 = vld [vmem:[#allocation7 + $0xdd8] sm:$0xff] }
 0x299   :  { %3288 = vmatpush2.msra.mxu0 %v1731_v36  ;;  %3359 = vmatpush2.msra.mxu1 %v1859_v43  ;;  %v1943_v46 = vld [vmem:[#allocation7 + $0x9d0] sm:$0xff]  ;;  %v1940_v43 = vld [vmem:[#allocation7 + $0x9b8] sm:$0xff] }
 0x29a   :  { %3289 = vmatprep.subr.mxu0 %v1728_v63  ;;  %3360 = vmatprep.subr.mxu1 %v1856_v39  ;;  %v2071_v36 = vld [vmem:[#allocation7 + $0xdd0] sm:$0xff]  ;;  %v2068_v63 = vld [vmem:[#allocation7 + $0xdb8] sm:$0xff] }
 0x29b   :  { %3290 = vmatpush2.msra.mxu0 %v1727_v13  ;;  %3361 = vmatpush2.msra.mxu1 %v1855_v10  ;;  %v2067_v39 = vld [vmem:[#allocation7 + $0xdb0] sm:$0xff]  ;;  %v2064_v13 = vld [vmem:[#allocation7 + $0xd98] sm:$0xff] }
 0x29c   :  { %3291 = vmatprep.subr.mxu0 %v1724_v19  ;;  %3362 = vmatprep.subr.mxu1 %v1852_v4  ;;  %v1935_v10 = vld [vmem:[#allocation7 + $0x990] sm:$0xff]  ;;  %v2060_v4 = vld [vmem:[#allocation7 + $0xd78] sm:$0xff] }
 0x29d   :  { %3292 = vmatpush2.msra.mxu0 %v1723_v45  ;;  %3363 = vmatpush2.msra.mxu1 %v1851_v53  ;;  %v2063_v19 = vld [vmem:[#allocation7 + $0xd90] sm:$0xff]  ;;  %v1928_v53 = vld [vmem:[#allocation7 + $0x958] sm:$0xff] }
 0x29e   :  { %3293 = vmatprep.subr.mxu0 %v1720_v54  ;;  %3364 = vmatprep.subr.mxu1 %v1848_v52  ;;  %v2059_v45 = vld [vmem:[#allocation7 + $0xd70] sm:$0xff]  ;;  %v2056_v54 = vld [vmem:[#allocation7 + $0xd58] sm:$0xff] }
 0x29f   :  { %3294 = vmatpush2.msra.mxu0 %v1719_v7  ;;  %3365 = vmatpush2.msra.mxu1 %v1847_v40  ;;  %v1927_v52 = vld [vmem:[#allocation7 + $0x950] sm:$0xff]  ;;  %v1924_v40 = vld [vmem:[#allocation7 + $0x938] sm:$0xff] }
 0x2a0   :  { %3295 = vmatprep.subr.mxu0 %v1716_v17  ;;  %3366 = vmatprep.subr.mxu1 %v1844_v32  ;;  %v2055_v7 = vld [vmem:[#allocation7 + $0xd50] sm:$0xff]  ;;  %v2052_v17 = vld [vmem:[#allocation7 + $0xd38] sm:$0xff] }
 0x2a1   :  { %3296 = vmatpush2.msra.mxu0 %v1715_v38  ;;  %3367 = vmatpush2.msra.mxu1 %v1843_v26  ;;  %v1923_v32 = vld [vmem:[#allocation7 + $0x930] sm:$0xff]  ;;  %v1920_v26 = vld [vmem:[#allocation7 + $0x918] sm:$0xff] }
 0x2a2   :  { %3297 = vmatprep.subr.mxu0 %v1712_v29  ;;  %3368 = vmatprep.subr.mxu1 %v1840_v16  ;;  %v2051_v38 = vld [vmem:[#allocation7 + $0xd30] sm:$0xff]  ;;  %v2048_v29 = vld [vmem:[#allocation7 + $0xd18] sm:$0xff] }
 0x2a3   :  { %3298 = vmatpush2.msra.mxu0 %v1711_v55  ;;  %3369 = vmatpush2.msra.mxu1 %v1839_v61  ;;  %v1919_v16 = vld [vmem:[#allocation7 + $0x910] sm:$0xff]  ;;  %v1916_v61 = vld [vmem:[#allocation7 + $0x8f8] sm:$0xff] }
 0x2a4   :  { %3299 = vmatprep.subr.mxu0 %v1708_v11  ;;  %3370 = vmatprep.subr.mxu1 %v1836_v60  ;;  %v2047_v55 = vld [vmem:[#allocation7 + $0xd10] sm:$0xff]  ;;  %v2044_v11 = vld [vmem:[#allocation7 + $0xcf8] sm:$0xff] }
 0x2a5   :  { %3300 = vmatpush2.msra.mxu0 %v1707_v21  ;;  %3371 = vmatpush2.msra.mxu1 %v1835_v28  ;;  %v1915_v60 = vld [vmem:[#allocation7 + $0x8f0] sm:$0xff]  ;;  %v1912_v28 = vld [vmem:[#allocation7 + $0x8d8] sm:$0xff] }
 0x2a6   :  { %3301 = vmatprep.subr.mxu0 %v1704_v35  ;;  %3372 = vmatprep.subr.mxu1 %v1832_v56  ;;  %v2043_v21 = vld [vmem:[#allocation7 + $0xcf0] sm:$0xff]  ;;  %v2040_v35 = vld [vmem:[#allocation7 + $0xcd8] sm:$0xff] }
 0x2a7   :  { %3302 = vmatpush2.msra.mxu0 %v1703_v44  ;;  %3373 = vmatpush2.msra.mxu1 %v1831_v1  ;;  %v1911_v56 = vld [vmem:[#allocation7 + $0x8d0] sm:$0xff]  ;;  %v1908_v1 = vld [vmem:[#allocation7 + $0x8b8] sm:$0xff] }
 0x2a8   :  { %3303 = vmatprep.subr.mxu0 %v1700_v23  ;;  %3374 = vmatprep.subr.mxu1 %v1828_v49  ;;  %v2039_v44 = vld [vmem:[#allocation7 + $0xcd0] sm:$0xff]  ;;  %v2036_v23 = vld [vmem:[#allocation7 + $0xcb8] sm:$0xff] }
 0x2a9   :  { %3304 = vmatpush2.msra.mxu0 %v1699_v2  ;;  %3375 = vmatpush2.msra.mxu1 %v1827_v20  ;;  %v1907_v49 = vld [vmem:[#allocation7 + $0x8b0] sm:$0xff]  ;;  %v1904_v20 = vld [vmem:[#allocation7 + $0x898] sm:$0xff] }
 0x2aa   :  { %3305 = vmatprep.subr.mxu0 %v1696_v24  ;;  %3376 = vmatprep.subr.mxu1 %v1824_v3  ;;  %v2035_v2 = vld [vmem:[#allocation7 + $0xcb0] sm:$0xff]  ;;  %v2032_v24 = vld [vmem:[#allocation7 + $0xc98] sm:$0xff] }
 0x2ab   :  { %3306 = vmatpush2.msra.mxu0 %v1695_v0  ;;  %3377 = vmatpush2.msra.mxu1 %v1823_v34  ;;  %v1903_v3 = vld [vmem:[#allocation7 + $0x890] sm:$0xff]  ;;  %v1900_v34 = vld [vmem:[#allocation7 + $0x878] sm:$0xff] }
 0x2ac   :  { %3308 = vmatmul.mubr.f32.vlgmr.msra.gmra.mxu0 %v5427_v8  ;;  %3379 = vmatmul.mubr.f32.vlgmr.msra.gmra.mxu1 %v5421_v58  ;;  %v1939_v8 = vld [vmem:[#allocation7 + $0x9b0] sm:$0xff]  ;;  %v1936_v58 = vld [vmem:[#allocation7 + $0x998] sm:$0xff] }
 0x2ad   :  { %3385 = vmatprep.subr.mxu0 %v1948_v42  ;;  %3456 = vmatprep.subr.mxu1 %v2076_v33  ;;  %v2031_v0 = vld [vmem:[#allocation7 + $0xc90] sm:$0xff]  ;;  %v2028_v42 = vld [vmem:[#allocation7 + $0xc78] sm:$0xff] }
 0x2ae   :  { %3386 = vmatpush1.msra.mxu0 %v1947_v50  ;;  %3449 = vmatprep.mubr.f32.mxu0 %v5446_v37  ;;  %v1932_v37 = vld [vmem:[#allocation7 + $0x978] sm:$0xff]  ;;  %v1899_v33 = vld [vmem:[#allocation7 + $0x870] sm:$0xff] }
 0x2af   :  { %3457 = vmatpush1.msra.mxu1 %v2075_v51  ;;  %3520 = vmatprep.mubr.f32.mxu1 %v5451_v5  ;;  %v1931_v5 = vld [vmem:[#allocation7 + $0x970] sm:$0xff]  ;;  %v1896_v51 = vld [vmem:[#allocation7 + $0x858] sm:$0xff] }
 0x2b0   :  { %3387 = vmatprep.subr.mxu0 %v1944_v41  ;;  %3458 = vmatprep.subr.mxu1 %v2072_v57  ;;  %v2027_v50 = vld [vmem:[#allocation7 + $0xc70] sm:$0xff]  ;;  %v2024_v41 = vld [vmem:[#allocation7 + $0xc58] sm:$0xff] }
 0x2b1   :  { %3388 = vmatpush1.msra.mxu0 %v1943_v46  ;;  %3459 = vmatpush1.msra.mxu1 %v2071_v36  ;;  %v1895_v57 = vld [vmem:[#allocation7 + $0x850] sm:$0xff]  ;;  %v1892_v36 = vld [vmem:[#allocation7 + $0x838] sm:$0xff] }
 0x2b2   :  { %3389 = vmatprep.subr.mxu0 %v1940_v43  ;;  %3460 = vmatprep.subr.mxu1 %v2068_v63  ;;  %v2023_v46 = vld [vmem:[#allocation7 + $0xc50] sm:$0xff]  ;;  %v2020_v43 = vld [vmem:[#allocation7 + $0xc38] sm:$0xff] }
 0x2b3   :  { %3390 = vmatpush1.msra.mxu0 %v1939_v8  ;;  %3461 = vmatpush1.msra.mxu1 %v2067_v39  ;;  %v1891_v63 = vld [vmem:[#allocation7 + $0x830] sm:$0xff]  ;;  %v1888_v39 = vld [vmem:[#allocation7 + $0x818] sm:$0xff] }
 0x2b4   :  { %3391 = vmatprep.subr.mxu0 %v1936_v58  ;;  %3462 = vmatprep.subr.mxu1 %v2064_v13  ;;  %v2019_v8 = vld [vmem:[#allocation7 + $0xc30] sm:$0xff]  ;;  %v2016_v58 = vld [vmem:[#allocation7 + $0xc18] sm:$0xff] }
 0x2b5   :  { %3392 = vmatpush1.msra.mxu0 %v1935_v10  ;;  %3463 = vmatpush1.msra.mxu1 %v2063_v19  ;;  %v1887_v13 = vld [vmem:[#allocation7 + $0x810] sm:$0xff]  ;;  %v2012_v19 = vld [vmem:[#allocation7 + $0xbf8] sm:$0xff] }
 0x2b6   :  { %3393 = vmatprep.subr.mxu0 %v1932_v37  ;;  %3464 = vmatprep.subr.mxu1 %v2060_v4  ;;  %v2015_v10 = vld [vmem:[#allocation7 + $0xc10] sm:$0xff]  ;;  %v2140_v37 = vld [vmem:[#allocation7 + $0xff8] sm:$0xff] }
 0x2b7   :  { %3394 = vmatpush1.msra.mxu0 %v1931_v5  ;;  %3465 = vmatpush1.msra.mxu1 %v2059_v45  ;;  %v2011_v4 = vld [vmem:[#allocation7 + $0xbf0] sm:$0xff]  ;;  %v2008_v45 = vld [vmem:[#allocation7 + $0xbd8] sm:$0xff] }
 0x2b8   :  { %3395 = vmatprep.subr.mxu0 %v1928_v53  ;;  %3466 = vmatprep.subr.mxu1 %v2056_v54  ;;  %v2139_v5 = vld [vmem:[#allocation7 + $0xff0] sm:$0xff]  ;;  %v2136_v53 = vld [vmem:[#allocation7 + $0xfd8] sm:$0xff] }
 0x2b9   :  { %3396 = vmatpush1.msra.mxu0 %v1927_v52  ;;  %3467 = vmatpush1.msra.mxu1 %v2055_v7  ;;  %v2007_v54 = vld [vmem:[#allocation7 + $0xbd0] sm:$0xff]  ;;  %v2004_v7 = vld [vmem:[#allocation7 + $0xbb8] sm:$0xff] }
 0x2ba   :  { %3397 = vmatprep.subr.mxu0 %v1924_v40  ;;  %3468 = vmatprep.subr.mxu1 %v2052_v17  ;;  %v2135_v52 = vld [vmem:[#allocation7 + $0xfd0] sm:$0xff]  ;;  %v2132_v40 = vld [vmem:[#allocation7 + $0xfb8] sm:$0xff] }
 0x2bb   :  { %3398 = vmatpush1.msra.mxu0 %v1923_v32  ;;  %3469 = vmatpush1.msra.mxu1 %v2051_v38  ;;  %v2003_v17 = vld [vmem:[#allocation7 + $0xbb0] sm:$0xff]  ;;  %v2000_v38 = vld [vmem:[#allocation7 + $0xb98] sm:$0xff] }
 0x2bc   :  { %3399 = vmatprep.subr.mxu0 %v1920_v26  ;;  %3470 = vmatprep.subr.mxu1 %v2048_v29  ;;  %v2131_v32 = vld [vmem:[#allocation7 + $0xfb0] sm:$0xff]  ;;  %v2128_v26 = vld [vmem:[#allocation7 + $0xf98] sm:$0xff] }
 0x2bd   :  { %3400 = vmatpush1.msra.mxu0 %v1919_v16  ;;  %3471 = vmatpush1.msra.mxu1 %v2047_v55  ;;  %v1999_v29 = vld [vmem:[#allocation7 + $0xb90] sm:$0xff]  ;;  %v1996_v55 = vld [vmem:[#allocation7 + $0xb78] sm:$0xff] }
 0x2be   :  { %3401 = vmatprep.subr.mxu0 %v1916_v61  ;;  %3472 = vmatprep.subr.mxu1 %v2044_v11  ;;  %v2127_v16 = vld [vmem:[#allocation7 + $0xf90] sm:$0xff]  ;;  %v2124_v61 = vld [vmem:[#allocation7 + $0xf78] sm:$0xff] }
 0x2bf   :  { %3402 = vmatpush1.msra.mxu0 %v1915_v60  ;;  %3473 = vmatpush1.msra.mxu1 %v2043_v21  ;;  %v1995_v11 = vld [vmem:[#allocation7 + $0xb70] sm:$0xff]  ;;  %v1992_v21 = vld [vmem:[#allocation7 + $0xb58] sm:$0xff] }
 0x2c0   :  { %3403 = vmatprep.subr.mxu0 %v1912_v28  ;;  %3474 = vmatprep.subr.mxu1 %v2040_v35  ;;  %v2123_v60 = vld [vmem:[#allocation7 + $0xf70] sm:$0xff]  ;;  %v2120_v28 = vld [vmem:[#allocation7 + $0xf58] sm:$0xff] }
 0x2c1   :  { %3404 = vmatpush1.msra.mxu0 %v1911_v56  ;;  %3475 = vmatpush1.msra.mxu1 %v2039_v44  ;;  %v1991_v35 = vld [vmem:[#allocation7 + $0xb50] sm:$0xff]  ;;  %v1988_v44 = vld [vmem:[#allocation7 + $0xb38] sm:$0xff] }
 0x2c2   :  { %3405 = vmatprep.subr.mxu0 %v1908_v1  ;;  %3476 = vmatprep.subr.mxu1 %v2036_v23  ;;  %v2119_v56 = vld [vmem:[#allocation7 + $0xf50] sm:$0xff]  ;;  %v2116_v1 = vld [vmem:[#allocation7 + $0xf38] sm:$0xff] }
 0x2c3   :  { %3406 = vmatpush1.msra.mxu0 %v1907_v49  ;;  %3477 = vmatpush1.msra.mxu1 %v2035_v2  ;;  %v1987_v23 = vld [vmem:[#allocation7 + $0xb30] sm:$0xff]  ;;  %v1984_v2 = vld [vmem:[#allocation7 + $0xb18] sm:$0xff] }
 0x2c4   :  { %3407 = vmatprep.subr.mxu0 %v1904_v20  ;;  %3478 = vmatprep.subr.mxu1 %v2032_v24  ;;  %v2115_v49 = vld [vmem:[#allocation7 + $0xf30] sm:$0xff]  ;;  %v2112_v20 = vld [vmem:[#allocation7 + $0xf18] sm:$0xff] }
 0x2c5   :  { %3408 = vmatpush1.msra.mxu0 %v1903_v3  ;;  %3479 = vmatpush1.msra.mxu1 %v2031_v0  ;;  %v1983_v24 = vld [vmem:[#allocation7 + $0xb10] sm:$0xff]  ;;  %v1980_v0 = vld [vmem:[#allocation7 + $0xaf8] sm:$0xff] }
 0x2c6   :  { %3409 = vmatprep.subr.mxu0 %v1900_v34  ;;  %3480 = vmatprep.subr.mxu1 %v2028_v42  ;;  %v2111_v3 = vld [vmem:[#allocation7 + $0xf10] sm:$0xff]  ;;  %v2108_v34 = vld [vmem:[#allocation7 + $0xef8] sm:$0xff] }
 0x2c7   :  { %3410 = vmatpush1.msra.mxu0 %v1899_v33  ;;  %3481 = vmatpush1.msra.mxu1 %v2027_v50  ;;  %v1979_v42 = vld [vmem:[#allocation7 + $0xaf0] sm:$0xff]  ;;  %v1976_v50 = vld [vmem:[#allocation7 + $0xad8] sm:$0xff] }
 0x2c8   :  { %3411 = vmatprep.subr.mxu0 %v1896_v51  ;;  %3482 = vmatprep.subr.mxu1 %v2024_v41  ;;  %v2107_v33 = vld [vmem:[#allocation7 + $0xef0] sm:$0xff]  ;;  %v2104_v51 = vld [vmem:[#allocation7 + $0xed8] sm:$0xff] }
 0x2c9   :  { %3412 = vmatpush1.msra.mxu0 %v1895_v57  ;;  %3483 = vmatpush1.msra.mxu1 %v2023_v46  ;;  %v1975_v41 = vld [vmem:[#allocation7 + $0xad0] sm:$0xff]  ;;  %v1972_v46 = vld [vmem:[#allocation7 + $0xab8] sm:$0xff] }
 0x2ca   :  { %3413 = vmatprep.subr.mxu0 %v1892_v36  ;;  %3484 = vmatprep.subr.mxu1 %v2020_v43  ;;  %v2103_v57 = vld [vmem:[#allocation7 + $0xed0] sm:$0xff]  ;;  %v2100_v36 = vld [vmem:[#allocation7 + $0xeb8] sm:$0xff] }
 0x2cb   :  { %3414 = vmatpush1.msra.mxu0 %v1891_v63  ;;  %3485 = vmatpush1.msra.mxu1 %v2019_v8  ;;  %v1971_v43 = vld [vmem:[#allocation7 + $0xab0] sm:$0xff]  ;;  %v1968_v8 = vld [vmem:[#allocation7 + $0xa98] sm:$0xff] }
 0x2cc   :  { %3415 = vmatprep.subr.mxu0 %v1888_v39  ;;  %3486 = vmatprep.subr.mxu1 %v2016_v58  ;;  %v2099_v63 = vld [vmem:[#allocation7 + $0xeb0] sm:$0xff]  ;;  %v2096_v39 = vld [vmem:[#allocation7 + $0xe98] sm:$0xff] }
 0x2cd   :  { %3416 = vmatpush1.msra.mxu0 %v1887_v13  ;;  %3487 = vmatpush1.msra.mxu1 %v2015_v10  ;;  %v1967_v58 = vld [vmem:[#allocation7 + $0xa90] sm:$0xff]  ;;  %v1964_v10 = vld [vmem:[#allocation7 + $0xa78] sm:$0xff] }
 0x2ce   :  { %3417 = vmatprep.subr.mxu0 %v2012_v19  ;;  %3488 = vmatprep.subr.mxu1 %v2140_v37  ;;  %v2095_v13 = vld [vmem:[#allocation7 + $0xe90] sm:$0xff]  ;;  %v2092_v19 = vld [vmem:[#allocation7 + $0xe78] sm:$0xff] }
 0x2cf   :  { %3418 = vmatpush2.msra.mxu0 %v2011_v4  ;;  %3489 = vmatpush2.msra.mxu1 %v2139_v5  ;;  %v1963_v37 = vld [vmem:[#allocation7 + $0xa70] sm:$0xff]  ;;  %v1960_v5 = vld [vmem:[#allocation7 + $0xa58] sm:$0xff] }
 0x2d0   :  { %3419 = vmatprep.subr.mxu0 %v2008_v45  ;;  %3490 = vmatprep.subr.mxu1 %v2136_v53  ;;  %v2091_v4 = vld [vmem:[#allocation7 + $0xe70] sm:$0xff]  ;;  %v2088_v45 = vld [vmem:[#allocation7 + $0xe58] sm:$0xff] }
 0x2d1   :  { %3420 = vmatpush2.msra.mxu0 %v2007_v54  ;;  %3491 = vmatpush2.msra.mxu1 %v2135_v52  ;;  %v1959_v53 = vld [vmem:[#allocation7 + $0xa50] sm:$0xff]  ;;  %v1956_v52 = vld [vmem:[#allocation7 + $0xa38] sm:$0xff] }
 0x2d2   :  { %3421 = vmatprep.subr.mxu0 %v2004_v7  ;;  %3492 = vmatprep.subr.mxu1 %v2132_v40  ;;  %v2087_v54 = vld [vmem:[#allocation7 + $0xe50] sm:$0xff]  ;;  %v2084_v7 = vld [vmem:[#allocation7 + $0xe38] sm:$0xff] }
 0x2d3   :  { %3422 = vmatpush2.msra.mxu0 %v2003_v17  ;;  %3493 = vmatpush2.msra.mxu1 %v2131_v32  ;;  %v1955_v40 = vld [vmem:[#allocation7 + $0xa30] sm:$0xff]  ;;  %v1952_v32 = vld [vmem:[#allocation7 + $0xa18] sm:$0xff] }
 0x2d4   :  { %3423 = vmatprep.subr.mxu0 %v2000_v38  ;;  %3494 = vmatprep.subr.mxu1 %v2128_v26  ;;  %v2083_v17 = vld [vmem:[#allocation7 + $0xe30] sm:$0xff]  ;;  %v2080_v38 = vld [vmem:[#allocation7 + $0xe18] sm:$0xff] }
 0x2d5   :  { %3424 = vmatpush2.msra.mxu0 %v1999_v29  ;;  %3495 = vmatpush2.msra.mxu1 %v2127_v16  ;;  %v1951_v26 = vld [vmem:[#allocation7 + $0xa10] sm:$0xff]  ;;  %v2204_v16 = vld [vmem:[#allocation7 + $0x11f8] sm:$0xff] }
 0x2d6   :  { %3425 = vmatprep.subr.mxu0 %v1996_v55  ;;  %3496 = vmatprep.subr.mxu1 %v2124_v61  ;;  %v2079_v29 = vld [vmem:[#allocation7 + $0xe10] sm:$0xff]  ;;  %v2332_v55 = vld [vmem:[#allocation7 + $0x15f8] sm:$0xff] }
 0x2d7   :  { %3426 = vmatpush2.msra.mxu0 %v1995_v11  ;;  %3497 = vmatpush2.msra.mxu1 %v2123_v60  ;;  %v2203_v61 = vld [vmem:[#allocation7 + $0x11f0] sm:$0xff]  ;;  %v2200_v60 = vld [vmem:[#allocation7 + $0x11d8] sm:$0xff] }
 0x2d8   :  { %3427 = vmatprep.subr.mxu0 %v1992_v21  ;;  %3498 = vmatprep.subr.mxu1 %v2120_v28  ;;  %v2331_v11 = vld [vmem:[#allocation7 + $0x15f0] sm:$0xff]  ;;  %v2328_v21 = vld [vmem:[#allocation7 + $0x15d8] sm:$0xff] }
 0x2d9   :  { %3428 = vmatpush2.msra.mxu0 %v1991_v35  ;;  %3499 = vmatpush2.msra.mxu1 %v2119_v56  ;;  %v2199_v28 = vld [vmem:[#allocation7 + $0x11d0] sm:$0xff]  ;;  %v2196_v56 = vld [vmem:[#allocation7 + $0x11b8] sm:$0xff] }
 0x2da   :  { %3429 = vmatprep.subr.mxu0 %v1988_v44  ;;  %3500 = vmatprep.subr.mxu1 %v2116_v1  ;;  %v2327_v35 = vld [vmem:[#allocation7 + $0x15d0] sm:$0xff]  ;;  %v2324_v44 = vld [vmem:[#allocation7 + $0x15b8] sm:$0xff] }
 0x2db   :  { %3430 = vmatpush2.msra.mxu0 %v1987_v23  ;;  %3501 = vmatpush2.msra.mxu1 %v2115_v49  ;;  %v2323_v1 = vld [vmem:[#allocation7 + $0x15b0] sm:$0xff]  ;;  %v2320_v23 = vld [vmem:[#allocation7 + $0x1598] sm:$0xff] }
 0x2dc   :  { %3431 = vmatprep.subr.mxu0 %v1984_v2  ;;  %3502 = vmatprep.subr.mxu1 %v2112_v20  ;;  %v2191_v49 = vld [vmem:[#allocation7 + $0x1190] sm:$0xff]  ;;  %v2316_v20 = vld [vmem:[#allocation7 + $0x1578] sm:$0xff] }
 0x2dd   :  { %3432 = vmatpush2.msra.mxu0 %v1983_v24  ;;  %3503 = vmatpush2.msra.mxu1 %v2111_v3  ;;  %v2319_v2 = vld [vmem:[#allocation7 + $0x1590] sm:$0xff]  ;;  %v2184_v3 = vld [vmem:[#allocation7 + $0x1158] sm:$0xff] }
 0x2de   :  { %3433 = vmatprep.subr.mxu0 %v1980_v0  ;;  %3504 = vmatprep.subr.mxu1 %v2108_v34  ;;  %v2315_v24 = vld [vmem:[#allocation7 + $0x1570] sm:$0xff]  ;;  %v2312_v0 = vld [vmem:[#allocation7 + $0x1558] sm:$0xff] }
 0x2df   :  { %3434 = vmatpush2.msra.mxu0 %v1979_v42  ;;  %3505 = vmatpush2.msra.mxu1 %v2107_v33  ;;  %v2183_v34 = vld [vmem:[#allocation7 + $0x1150] sm:$0xff]  ;;  %v2180_v33 = vld [vmem:[#allocation7 + $0x1138] sm:$0xff] }
 0x2e0   :  { %3435 = vmatprep.subr.mxu0 %v1976_v50  ;;  %3506 = vmatprep.subr.mxu1 %v2104_v51  ;;  %v2311_v42 = vld [vmem:[#allocation7 + $0x1550] sm:$0xff]  ;;  %v2308_v50 = vld [vmem:[#allocation7 + $0x1538] sm:$0xff] }
 0x2e1   :  { %3436 = vmatpush2.msra.mxu0 %v1975_v41  ;;  %3507 = vmatpush2.msra.mxu1 %v2103_v57  ;;  %v2179_v51 = vld [vmem:[#allocation7 + $0x1130] sm:$0xff]  ;;  %v2176_v57 = vld [vmem:[#allocation7 + $0x1118] sm:$0xff] }
 0x2e2   :  { %3437 = vmatprep.subr.mxu0 %v1972_v46  ;;  %3508 = vmatprep.subr.mxu1 %v2100_v36  ;;  %v2307_v41 = vld [vmem:[#allocation7 + $0x1530] sm:$0xff]  ;;  %v2304_v46 = vld [vmem:[#allocation7 + $0x1518] sm:$0xff] }
 0x2e3   :  { %3438 = vmatpush2.msra.mxu0 %v1971_v43  ;;  %3509 = vmatpush2.msra.mxu1 %v2099_v63  ;;  %v2175_v36 = vld [vmem:[#allocation7 + $0x1110] sm:$0xff]  ;;  %v2172_v63 = vld [vmem:[#allocation7 + $0x10f8] sm:$0xff] }
 0x2e4   :  { %3439 = vmatprep.subr.mxu0 %v1968_v8  ;;  %3510 = vmatprep.subr.mxu1 %v2096_v39  ;;  %v2303_v43 = vld [vmem:[#allocation7 + $0x1510] sm:$0xff]  ;;  %v2300_v8 = vld [vmem:[#allocation7 + $0x14f8] sm:$0xff] }
 0x2e5   :  { %3440 = vmatpush2.msra.mxu0 %v1967_v58  ;;  %3511 = vmatpush2.msra.mxu1 %v2095_v13  ;;  %v2171_v39 = vld [vmem:[#allocation7 + $0x10f0] sm:$0xff]  ;;  %v2168_v13 = vld [vmem:[#allocation7 + $0x10d8] sm:$0xff] }
 0x2e6   :  { %3441 = vmatprep.subr.mxu0 %v1964_v10  ;;  %3512 = vmatprep.subr.mxu1 %v2092_v19  ;;  %v2299_v58 = vld [vmem:[#allocation7 + $0x14f0] sm:$0xff]  ;;  %v2296_v10 = vld [vmem:[#allocation7 + $0x14d8] sm:$0xff] }
 0x2e7   :  { %3442 = vmatpush2.msra.mxu0 %v1963_v37  ;;  %3513 = vmatpush2.msra.mxu1 %v2091_v4  ;;  %v2167_v19 = vld [vmem:[#allocation7 + $0x10d0] sm:$0xff]  ;;  %v2164_v4 = vld [vmem:[#allocation7 + $0x10b8] sm:$0xff] }
 0x2e8   :  { %3443 = vmatprep.subr.mxu0 %v1960_v5  ;;  %3514 = vmatprep.subr.mxu1 %v2088_v45  ;;  %v2295_v37 = vld [vmem:[#allocation7 + $0x14d0] sm:$0xff]  ;;  %v2292_v5 = vld [vmem:[#allocation7 + $0x14b8] sm:$0xff] }
 0x2e9   :  { %3444 = vmatpush2.msra.mxu0 %v1959_v53  ;;  %3515 = vmatpush2.msra.mxu1 %v2087_v54  ;;  %v2163_v45 = vld [vmem:[#allocation7 + $0x10b0] sm:$0xff]  ;;  %v2160_v54 = vld [vmem:[#allocation7 + $0x1098] sm:$0xff] }
 0x2ea   :  { %3445 = vmatprep.subr.mxu0 %v1956_v52  ;;  %3516 = vmatprep.subr.mxu1 %v2084_v7  ;;  %v2291_v53 = vld [vmem:[#allocation7 + $0x14b0] sm:$0xff]  ;;  %v2288_v52 = vld [vmem:[#allocation7 + $0x1498] sm:$0xff] }
 0x2eb   :  { %3446 = vmatpush2.msra.mxu0 %v1955_v40  ;;  %3517 = vmatpush2.msra.mxu1 %v2083_v17  ;;  %v2159_v7 = vld [vmem:[#allocation7 + $0x1090] sm:$0xff]  ;;  %v2156_v17 = vld [vmem:[#allocation7 + $0x1078] sm:$0xff] }
 0x2ec   :  { %3447 = vmatprep.subr.mxu0 %v1952_v32  ;;  %3518 = vmatprep.subr.mxu1 %v2080_v38  ;;  %v2287_v40 = vld [vmem:[#allocation7 + $0x1490] sm:$0xff]  ;;  %v2284_v32 = vld [vmem:[#allocation7 + $0x1478] sm:$0xff] }
 0x2ed   :  { %3448 = vmatpush2.msra.mxu0 %v1951_v26  ;;  %3519 = vmatpush2.msra.mxu1 %v2079_v29  ;;  %v2155_v38 = vld [vmem:[#allocation7 + $0x1070] sm:$0xff]  ;;  %v2152_v29 = vld [vmem:[#allocation7 + $0x1058] sm:$0xff] }
 0x2ee   :  { %3450 = vmatmul.mubr.f32.vlgmr.msra.gmra.mxu0 %v5456_v59  ;;  %3521 = vmatmul.mubr.f32.vlgmr.msra.gmra.mxu1 %v5453_v62  ;;  %v2195_v59 = vld [vmem:[#allocation7 + $0x11b0] sm:$0xff]  ;;  %v2192_v62 = vld [vmem:[#allocation7 + $0x1198] sm:$0xff] }
 0x2ef   :  { %3527 = vmatprep.subr.mxu0 %v2204_v16  ;;  %3598 = vmatprep.subr.mxu1 %v2332_v55  ;;  %v2283_v26 = vld [vmem:[#allocation7 + $0x1470] sm:$0xff]  ;;  %v2280_v16 = vld [vmem:[#allocation7 + $0x1458] sm:$0xff] }
 0x2f0   :  { %3528 = vmatpush1.msra.mxu0 %v2203_v61  ;;  %3591 = vmatprep.mubr.f32.mxu0 %v5469_v9  ;;  %v2188_v9 = vld [vmem:[#allocation7 + $0x1178] sm:$0xff]  ;;  %v2151_v55 = vld [vmem:[#allocation7 + $0x1050] sm:$0xff] }
 0x2f1   :  { %3599 = vmatpush1.msra.mxu1 %v2331_v11  ;;  %3662 = vmatprep.mubr.f32.mxu1 %v5475_v15  ;;  %v2187_v15 = vld [vmem:[#allocation7 + $0x1170] sm:$0xff]  ;;  %v2148_v11 = vld [vmem:[#allocation7 + $0x1038] sm:$0xff] }
 0x2f2   :  { %3529 = vmatprep.subr.mxu0 %v2200_v60  ;;  %3600 = vmatprep.subr.mxu1 %v2328_v21  ;;  %v2279_v61 = vld [vmem:[#allocation7 + $0x1450] sm:$0xff]  ;;  %v2276_v60 = vld [vmem:[#allocation7 + $0x1438] sm:$0xff] }
 0x2f3   :  { %3530 = vmatpush1.msra.mxu0 %v2199_v28  ;;  %3601 = vmatpush1.msra.mxu1 %v2327_v35  ;;  %v2147_v21 = vld [vmem:[#allocation7 + $0x1030] sm:$0xff]  ;;  %v2144_v35 = vld [vmem:[#allocation7 + $0x1018] sm:$0xff] }
 0x2f4   :  { %3531 = vmatprep.subr.mxu0 %v2196_v56  ;;  %3602 = vmatprep.subr.mxu1 %v2324_v44  ;;  %v2275_v28 = vld [vmem:[#allocation7 + $0x1430] sm:$0xff]  ;;  %v2272_v56 = vld [vmem:[#allocation7 + $0x1418] sm:$0xff] }
 0x2f5   :  { %3532 = vmatpush1.msra.mxu0 %v2195_v59  ;;  %3603 = vmatpush1.msra.mxu1 %v2323_v1  ;;  %v2143_v44 = vld [vmem:[#allocation7 + $0x1010] sm:$0xff]  ;;  %v2268_v1 = vld [vmem:[#allocation7 + $0x13f8] sm:$0xff] }
 0x2f6   :  { %3533 = vmatprep.subr.mxu0 %v2192_v62  ;;  %3604 = vmatprep.subr.mxu1 %v2320_v23  ;;  %v2271_v59 = vld [vmem:[#allocation7 + $0x1410] sm:$0xff]  ;;  %v2396_v62 = vld [vmem:[#allocation7 + $0x17f8] sm:$0xff] }
 0x2f7   :  { %3534 = vmatpush1.msra.mxu0 %v2191_v49  ;;  %3605 = vmatpush1.msra.mxu1 %v2319_v2  ;;  %v2267_v23 = vld [vmem:[#allocation7 + $0x13f0] sm:$0xff]  ;;  %v2264_v2 = vld [vmem:[#allocation7 + $0x13d8] sm:$0xff] }
 0x2f8   :  { %3535 = vmatprep.subr.mxu0 %v2188_v9  ;;  %3606 = vmatprep.subr.mxu1 %v2316_v20  ;;  %v2395_v49 = vld [vmem:[#allocation7 + $0x17f0] sm:$0xff]  ;;  %v2392_v9 = vld [vmem:[#allocation7 + $0x17d8] sm:$0xff] }
 0x2f9   :  { %3536 = vmatpush1.msra.mxu0 %v2187_v15  ;;  %3607 = vmatpush1.msra.mxu1 %v2315_v24  ;;  %v2263_v20 = vld [vmem:[#allocation7 + $0x13d0] sm:$0xff]  ;;  %v2260_v24 = vld [vmem:[#allocation7 + $0x13b8] sm:$0xff] }
 0x2fa   :  { %3537 = vmatprep.subr.mxu0 %v2184_v3  ;;  %3608 = vmatprep.subr.mxu1 %v2312_v0  ;;  %v2391_v15 = vld [vmem:[#allocation7 + $0x17d0] sm:$0xff]  ;;  %v2388_v3 = vld [vmem:[#allocation7 + $0x17b8] sm:$0xff] }
 0x2fb   :  { %3538 = vmatpush1.msra.mxu0 %v2183_v34  ;;  %3609 = vmatpush1.msra.mxu1 %v2311_v42  ;;  %v2259_v0 = vld [vmem:[#allocation7 + $0x13b0] sm:$0xff]  ;;  %v2256_v42 = vld [vmem:[#allocation7 + $0x1398] sm:$0xff] }
 0x2fc   :  { %3539 = vmatprep.subr.mxu0 %v2180_v33  ;;  %3610 = vmatprep.subr.mxu1 %v2308_v50  ;;  %v2387_v34 = vld [vmem:[#allocation7 + $0x17b0] sm:$0xff]  ;;  %v2384_v33 = vld [vmem:[#allocation7 + $0x1798] sm:$0xff] }
 0x2fd   :  { %3540 = vmatpush1.msra.mxu0 %v2179_v51  ;;  %3611 = vmatpush1.msra.mxu1 %v2307_v41  ;;  %v2255_v50 = vld [vmem:[#allocation7 + $0x1390] sm:$0xff]  ;;  %v2252_v41 = vld [vmem:[#allocation7 + $0x1378] sm:$0xff] }
 0x2fe   :  { %3541 = vmatprep.subr.mxu0 %v2176_v57  ;;  %3612 = vmatprep.subr.mxu1 %v2304_v46  ;;  %v2383_v51 = vld [vmem:[#allocation7 + $0x1790] sm:$0xff]  ;;  %v2380_v57 = vld [vmem:[#allocation7 + $0x1778] sm:$0xff] }
 0x2ff   :  { %3542 = vmatpush1.msra.mxu0 %v2175_v36  ;;  %3613 = vmatpush1.msra.mxu1 %v2303_v43  ;;  %v2251_v46 = vld [vmem:[#allocation7 + $0x1370] sm:$0xff]  ;;  %v2248_v43 = vld [vmem:[#allocation7 + $0x1358] sm:$0xff] }
 0x300   :  { %3543 = vmatprep.subr.mxu0 %v2172_v63  ;;  %3614 = vmatprep.subr.mxu1 %v2300_v8  ;;  %v2379_v36 = vld [vmem:[#allocation7 + $0x1770] sm:$0xff]  ;;  %v2376_v63 = vld [vmem:[#allocation7 + $0x1758] sm:$0xff] }
 0x301   :  { %3544 = vmatpush1.msra.mxu0 %v2171_v39  ;;  %3615 = vmatpush1.msra.mxu1 %v2299_v58  ;;  %v2247_v8 = vld [vmem:[#allocation7 + $0x1350] sm:$0xff]  ;;  %v2244_v58 = vld [vmem:[#allocation7 + $0x1338] sm:$0xff] }
 0x302   :  { %3545 = vmatprep.subr.mxu0 %v2168_v13  ;;  %3616 = vmatprep.subr.mxu1 %v2296_v10  ;;  %v2375_v39 = vld [vmem:[#allocation7 + $0x1750] sm:$0xff]  ;;  %v2372_v13 = vld [vmem:[#allocation7 + $0x1738] sm:$0xff] }
 0x303   :  { %3546 = vmatpush1.msra.mxu0 %v2167_v19  ;;  %3617 = vmatpush1.msra.mxu1 %v2295_v37  ;;  %v2243_v10 = vld [vmem:[#allocation7 + $0x1330] sm:$0xff]  ;;  %v2240_v37 = vld [vmem:[#allocation7 + $0x1318] sm:$0xff] }
 0x304   :  { %3547 = vmatprep.subr.mxu0 %v2164_v4  ;;  %3618 = vmatprep.subr.mxu1 %v2292_v5  ;;  %v2371_v19 = vld [vmem:[#allocation7 + $0x1730] sm:$0xff]  ;;  %v2368_v4 = vld [vmem:[#allocation7 + $0x1718] sm:$0xff] }
 0x305   :  { %3548 = vmatpush1.msra.mxu0 %v2163_v45  ;;  %3619 = vmatpush1.msra.mxu1 %v2291_v53  ;;  %v2239_v5 = vld [vmem:[#allocation7 + $0x1310] sm:$0xff]  ;;  %v2236_v53 = vld [vmem:[#allocation7 + $0x12f8] sm:$0xff] }
 0x306   :  { %3549 = vmatprep.subr.mxu0 %v2160_v54  ;;  %3620 = vmatprep.subr.mxu1 %v2288_v52  ;;  %v2367_v45 = vld [vmem:[#allocation7 + $0x1710] sm:$0xff]  ;;  %v2364_v54 = vld [vmem:[#allocation7 + $0x16f8] sm:$0xff] }
 0x307   :  { %3550 = vmatpush1.msra.mxu0 %v2159_v7  ;;  %3621 = vmatpush1.msra.mxu1 %v2287_v40  ;;  %v2235_v52 = vld [vmem:[#allocation7 + $0x12f0] sm:$0xff]  ;;  %v2232_v40 = vld [vmem:[#allocation7 + $0x12d8] sm:$0xff] }
 0x308   :  { %3551 = vmatprep.subr.mxu0 %v2156_v17  ;;  %3622 = vmatprep.subr.mxu1 %v2284_v32  ;;  %v2363_v7 = vld [vmem:[#allocation7 + $0x16f0] sm:$0xff]  ;;  %v2360_v17 = vld [vmem:[#allocation7 + $0x16d8] sm:$0xff] }
 0x309   :  { %3552 = vmatpush1.msra.mxu0 %v2155_v38  ;;  %3623 = vmatpush1.msra.mxu1 %v2283_v26  ;;  %v2231_v32 = vld [vmem:[#allocation7 + $0x12d0] sm:$0xff]  ;;  %v2228_v26 = vld [vmem:[#allocation7 + $0x12b8] sm:$0xff] }
 0x30a   :  { %3553 = vmatprep.subr.mxu0 %v2152_v29  ;;  %3624 = vmatprep.subr.mxu1 %v2280_v16  ;;  %v2359_v38 = vld [vmem:[#allocation7 + $0x16d0] sm:$0xff]  ;;  %v2356_v29 = vld [vmem:[#allocation7 + $0x16b8] sm:$0xff] }
 0x30b   :  { %3554 = vmatpush1.msra.mxu0 %v2151_v55  ;;  %3625 = vmatpush1.msra.mxu1 %v2279_v61  ;;  %v2227_v16 = vld [vmem:[#allocation7 + $0x12b0] sm:$0xff]  ;;  %v2224_v61 = vld [vmem:[#allocation7 + $0x1298] sm:$0xff] }
 0x30c   :  { %3555 = vmatprep.subr.mxu0 %v2148_v11  ;;  %3626 = vmatprep.subr.mxu1 %v2276_v60  ;;  %v2355_v55 = vld [vmem:[#allocation7 + $0x16b0] sm:$0xff]  ;;  %v2352_v11 = vld [vmem:[#allocation7 + $0x1698] sm:$0xff] }
 0x30d   :  { %3556 = vmatpush1.msra.mxu0 %v2147_v21  ;;  %3627 = vmatpush1.msra.mxu1 %v2275_v28  ;;  %v2223_v60 = vld [vmem:[#allocation7 + $0x1290] sm:$0xff]  ;;  %v2220_v28 = vld [vmem:[#allocation7 + $0x1278] sm:$0xff] }
 0x30e   :  { %3557 = vmatprep.subr.mxu0 %v2144_v35  ;;  %3628 = vmatprep.subr.mxu1 %v2272_v56  ;;  %v2351_v21 = vld [vmem:[#allocation7 + $0x1690] sm:$0xff]  ;;  %v2348_v35 = vld [vmem:[#allocation7 + $0x1678] sm:$0xff] }
 0x30f   :  { %3558 = vmatpush1.msra.mxu0 %v2143_v44  ;;  %3629 = vmatpush1.msra.mxu1 %v2271_v59  ;;  %v2219_v56 = vld [vmem:[#allocation7 + $0x1270] sm:$0xff]  ;;  %v2216_v59 = vld [vmem:[#allocation7 + $0x1258] sm:$0xff] }
 0x310   :  { %3559 = vmatprep.subr.mxu0 %v2268_v1  ;;  %3630 = vmatprep.subr.mxu1 %v2396_v62  ;;  %v2347_v44 = vld [vmem:[#allocation7 + $0x1670] sm:$0xff]  ;;  %v2344_v1 = vld [vmem:[#allocation7 + $0x1658] sm:$0xff] }
 0x311   :  { %3560 = vmatpush2.msra.mxu0 %v2267_v23  ;;  %3631 = vmatpush2.msra.mxu1 %v2395_v49  ;;  %v2215_v62 = vld [vmem:[#allocation7 + $0x1250] sm:$0xff]  ;;  %v2212_v49 = vld [vmem:[#allocation7 + $0x1238] sm:$0xff] }
 0x312   :  { %3561 = vmatprep.subr.mxu0 %v2264_v2  ;;  %3632 = vmatprep.subr.mxu1 %v2392_v9  ;;  %v2343_v23 = vld [vmem:[#allocation7 + $0x1650] sm:$0xff]  ;;  %v2340_v2 = vld [vmem:[#allocation7 + $0x1638] sm:$0xff] }
 0x313   :  { %3562 = vmatpush2.msra.mxu0 %v2263_v20  ;;  %3633 = vmatpush2.msra.mxu1 %v2391_v15  ;;  %v2211_v9 = vld [vmem:[#allocation7 + $0x1230] sm:$0xff]  ;;  %v2208_v15 = vld [vmem:[#allocation7 + $0x1218] sm:$0xff] }
 0x314   :  { %3563 = vmatprep.subr.mxu0 %v2260_v24  ;;  %3634 = vmatprep.subr.mxu1 %v2388_v3  ;;  %v2339_v20 = vld [vmem:[#allocation7 + $0x1630] sm:$0xff]  ;;  %v2336_v24 = vld [vmem:[#allocation7 + $0x1618] sm:$0xff] }
 0x315   :  { %3564 = vmatpush2.msra.mxu0 %v2259_v0  ;;  %3635 = vmatpush2.msra.mxu1 %v2387_v34  ;;  %v2207_v3 = vld [vmem:[#allocation7 + $0x1210] sm:$0xff]  ;;  %v2460_v34 = vld [vmem:[#allocation7 + $0x19f8] sm:$0xff] }
 0x316   :  { %3565 = vmatprep.subr.mxu0 %v2256_v42  ;;  %3636 = vmatprep.subr.mxu1 %v2384_v33  ;;  %v2335_v0 = vld [vmem:[#allocation7 + $0x1610] sm:$0xff]  ;;  %v2588_v42 = vld [vmem:[#allocation7 + $0x1df8] sm:$0xff] }
 0x317   :  { %3566 = vmatpush2.msra.mxu0 %v2255_v50  ;;  %3637 = vmatpush2.msra.mxu1 %v2383_v51  ;;  %v2459_v33 = vld [vmem:[#allocation7 + $0x19f0] sm:$0xff]  ;;  %v2456_v51 = vld [vmem:[#allocation7 + $0x19d8] sm:$0xff] }
 0x318   :  { %3567 = vmatprep.subr.mxu0 %v2252_v41  ;;  %3638 = vmatprep.subr.mxu1 %v2380_v57  ;;  %v2587_v50 = vld [vmem:[#allocation7 + $0x1df0] sm:$0xff]  ;;  %v2584_v41 = vld [vmem:[#allocation7 + $0x1dd8] sm:$0xff] }
 0x319   :  { %3568 = vmatpush2.msra.mxu0 %v2251_v46  ;;  %3639 = vmatpush2.msra.mxu1 %v2379_v36  ;;  %v2455_v57 = vld [vmem:[#allocation7 + $0x19d0] sm:$0xff]  ;;  %v2452_v36 = vld [vmem:[#allocation7 + $0x19b8] sm:$0xff] }
 0x31a   :  { %3569 = vmatprep.subr.mxu0 %v2248_v43  ;;  %3640 = vmatprep.subr.mxu1 %v2376_v63  ;;  %v2583_v46 = vld [vmem:[#allocation7 + $0x1dd0] sm:$0xff]  ;;  %v2580_v43 = vld [vmem:[#allocation7 + $0x1db8] sm:$0xff] }
 0x31b   :  { %3570 = vmatpush2.msra.mxu0 %v2247_v8  ;;  %3641 = vmatpush2.msra.mxu1 %v2375_v39  ;;  %v2579_v63 = vld [vmem:[#allocation7 + $0x1db0] sm:$0xff]  ;;  %v2576_v8 = vld [vmem:[#allocation7 + $0x1d98] sm:$0xff] }
 0x31c   :  { %3571 = vmatprep.subr.mxu0 %v2244_v58  ;;  %3642 = vmatprep.subr.mxu1 %v2372_v13  ;;  %v2447_v39 = vld [vmem:[#allocation7 + $0x1990] sm:$0xff]  ;;  %v2572_v13 = vld [vmem:[#allocation7 + $0x1d78] sm:$0xff] }
 0x31d   :  { %3572 = vmatpush2.msra.mxu0 %v2243_v10  ;;  %3643 = vmatpush2.msra.mxu1 %v2371_v19  ;;  %v2575_v58 = vld [vmem:[#allocation7 + $0x1d90] sm:$0xff]  ;;  %v2440_v19 = vld [vmem:[#allocation7 + $0x1958] sm:$0xff] }
 0x31e   :  { %3573 = vmatprep.subr.mxu0 %v2240_v37  ;;  %3644 = vmatprep.subr.mxu1 %v2368_v4  ;;  %v2571_v10 = vld [vmem:[#allocation7 + $0x1d70] sm:$0xff]  ;;  %v2568_v37 = vld [vmem:[#allocation7 + $0x1d58] sm:$0xff] }
 0x31f   :  { %3574 = vmatpush2.msra.mxu0 %v2239_v5  ;;  %3645 = vmatpush2.msra.mxu1 %v2367_v45  ;;  %v2439_v4 = vld [vmem:[#allocation7 + $0x1950] sm:$0xff]  ;;  %v2436_v45 = vld [vmem:[#allocation7 + $0x1938] sm:$0xff] }
 0x320   :  { %3575 = vmatprep.subr.mxu0 %v2236_v53  ;;  %3646 = vmatprep.subr.mxu1 %v2364_v54  ;;  %v2567_v5 = vld [vmem:[#allocation7 + $0x1d50] sm:$0xff]  ;;  %v2564_v53 = vld [vmem:[#allocation7 + $0x1d38] sm:$0xff] }
 0x321   :  { %3576 = vmatpush2.msra.mxu0 %v2235_v52  ;;  %3647 = vmatpush2.msra.mxu1 %v2363_v7  ;;  %v2435_v54 = vld [vmem:[#allocation7 + $0x1930] sm:$0xff]  ;;  %v2432_v7 = vld [vmem:[#allocation7 + $0x1918] sm:$0xff] }
 0x322   :  { %3577 = vmatprep.subr.mxu0 %v2232_v40  ;;  %3648 = vmatprep.subr.mxu1 %v2360_v17  ;;  %v2563_v52 = vld [vmem:[#allocation7 + $0x1d30] sm:$0xff]  ;;  %v2560_v40 = vld [vmem:[#allocation7 + $0x1d18] sm:$0xff] }
 0x323   :  { %3578 = vmatpush2.msra.mxu0 %v2231_v32  ;;  %3649 = vmatpush2.msra.mxu1 %v2359_v38  ;;  %v2431_v17 = vld [vmem:[#allocation7 + $0x1910] sm:$0xff]  ;;  %v2428_v38 = vld [vmem:[#allocation7 + $0x18f8] sm:$0xff] }
 0x324   :  { %3579 = vmatprep.subr.mxu0 %v2228_v26  ;;  %3650 = vmatprep.subr.mxu1 %v2356_v29  ;;  %v2559_v32 = vld [vmem:[#allocation7 + $0x1d10] sm:$0xff]  ;;  %v2556_v26 = vld [vmem:[#allocation7 + $0x1cf8] sm:$0xff] }
 0x325   :  { %3580 = vmatpush2.msra.mxu0 %v2227_v16  ;;  %3651 = vmatpush2.msra.mxu1 %v2355_v55  ;;  %v2427_v29 = vld [vmem:[#allocation7 + $0x18f0] sm:$0xff]  ;;  %v2424_v55 = vld [vmem:[#allocation7 + $0x18d8] sm:$0xff] }
 0x326   :  { %3581 = vmatprep.subr.mxu0 %v2224_v61  ;;  %3652 = vmatprep.subr.mxu1 %v2352_v11  ;;  %v2555_v16 = vld [vmem:[#allocation7 + $0x1cf0] sm:$0xff]  ;;  %v2552_v61 = vld [vmem:[#allocation7 + $0x1cd8] sm:$0xff] }
 0x327   :  { %3582 = vmatpush2.msra.mxu0 %v2223_v60  ;;  %3653 = vmatpush2.msra.mxu1 %v2351_v21  ;;  %v2423_v11 = vld [vmem:[#allocation7 + $0x18d0] sm:$0xff]  ;;  %v2420_v21 = vld [vmem:[#allocation7 + $0x18b8] sm:$0xff] }
 0x328   :  { %3583 = vmatprep.subr.mxu0 %v2220_v28  ;;  %3654 = vmatprep.subr.mxu1 %v2348_v35  ;;  %v2551_v60 = vld [vmem:[#allocation7 + $0x1cd0] sm:$0xff]  ;;  %v2548_v28 = vld [vmem:[#allocation7 + $0x1cb8] sm:$0xff] }
 0x329   :  { %3584 = vmatpush2.msra.mxu0 %v2219_v56  ;;  %3655 = vmatpush2.msra.mxu1 %v2347_v44  ;;  %v2419_v35 = vld [vmem:[#allocation7 + $0x18b0] sm:$0xff]  ;;  %v2416_v44 = vld [vmem:[#allocation7 + $0x1898] sm:$0xff] }
 0x32a   :  { %3585 = vmatprep.subr.mxu0 %v2216_v59  ;;  %3656 = vmatprep.subr.mxu1 %v2344_v1  ;;  %v2547_v56 = vld [vmem:[#allocation7 + $0x1cb0] sm:$0xff]  ;;  %v2544_v59 = vld [vmem:[#allocation7 + $0x1c98] sm:$0xff] }
 0x32b   :  { %3586 = vmatpush2.msra.mxu0 %v2215_v62  ;;  %3657 = vmatpush2.msra.mxu1 %v2343_v23  ;;  %v2415_v1 = vld [vmem:[#allocation7 + $0x1890] sm:$0xff]  ;;  %v2412_v23 = vld [vmem:[#allocation7 + $0x1878] sm:$0xff] }
 0x32c   :  { %3587 = vmatprep.subr.mxu0 %v2212_v49  ;;  %3658 = vmatprep.subr.mxu1 %v2340_v2  ;;  %v2543_v62 = vld [vmem:[#allocation7 + $0x1c90] sm:$0xff]  ;;  %v2540_v49 = vld [vmem:[#allocation7 + $0x1c78] sm:$0xff] }
 0x32d   :  { %3588 = vmatpush2.msra.mxu0 %v2211_v9  ;;  %3659 = vmatpush2.msra.mxu1 %v2339_v20  ;;  %v2411_v2 = vld [vmem:[#allocation7 + $0x1870] sm:$0xff]  ;;  %v2408_v20 = vld [vmem:[#allocation7 + $0x1858] sm:$0xff] }
 0x32e   :  { %3589 = vmatprep.subr.mxu0 %v2208_v15  ;;  %3660 = vmatprep.subr.mxu1 %v2336_v24  ;;  %v2539_v9 = vld [vmem:[#allocation7 + $0x1c70] sm:$0xff]  ;;  %v2536_v15 = vld [vmem:[#allocation7 + $0x1c58] sm:$0xff] }
 0x32f   :  { %3590 = vmatpush2.msra.mxu0 %v2207_v3  ;;  %3661 = vmatpush2.msra.mxu1 %v2335_v0  ;;  %v2407_v24 = vld [vmem:[#allocation7 + $0x1850] sm:$0xff]  ;;  %v2404_v0 = vld [vmem:[#allocation7 + $0x1838] sm:$0xff] }
 0x330   :  { %3592 = vmatmul.mubr.f32.vlgmr.msra.gmra.mxu0 %v5485_v31  ;;  %3663 = vmatmul.mubr.f32.vlgmr.msra.gmra.mxu1 %v5477_v48  ;;  %v2451_v31 = vld [vmem:[#allocation7 + $0x19b0] sm:$0xff]  ;;  %v2448_v48 = vld [vmem:[#allocation7 + $0x1998] sm:$0xff] }
 0x331   :  { %3669 = vmatprep.subr.mxu0 %v2460_v34  ;;  %3740 = vmatprep.subr.mxu1 %v2588_v42  ;;  %v2535_v3 = vld [vmem:[#allocation7 + $0x1c50] sm:$0xff]  ;;  %v2532_v34 = vld [vmem:[#allocation7 + $0x1c38] sm:$0xff] }
 0x332   :  { %3670 = vmatpush1.msra.mxu0 %v2459_v33  ;;  %3733 = vmatprep.mubr.f32.mxu0 %v5493_v30  ;;  %v2444_v30 = vld [vmem:[#allocation7 + $0x1978] sm:$0xff]  ;;  %v2403_v42 = vld [vmem:[#allocation7 + $0x1830] sm:$0xff] }
 0x333   :  { %3741 = vmatpush1.msra.mxu1 %v2587_v50  ;;  %3804 = vmatprep.mubr.f32.mxu1 %v5495_v6  ;;  %v2443_v6 = vld [vmem:[#allocation7 + $0x1970] sm:$0xff]  ;;  %v2400_v50 = vld [vmem:[#allocation7 + $0x1818] sm:$0xff] }
 0x334   :  { %3671 = vmatprep.subr.mxu0 %v2456_v51  ;;  %3742 = vmatprep.subr.mxu1 %v2584_v41  ;;  %v2531_v33 = vld [vmem:[#allocation7 + $0x1c30] sm:$0xff]  ;;  %v2528_v51 = vld [vmem:[#allocation7 + $0x1c18] sm:$0xff] }
 0x335   :  { %3672 = vmatpush1.msra.mxu0 %v2455_v57  ;;  %3743 = vmatpush1.msra.mxu1 %v2583_v46  ;;  %v2399_v41 = vld [vmem:[#allocation7 + $0x1810] sm:$0xff]  ;;  %v2524_v46 = vld [vmem:[#allocation7 + $0x1bf8] sm:$0xff] }
 0x336   :  { %3673 = vmatprep.subr.mxu0 %v2452_v36  ;;  %3744 = vmatprep.subr.mxu1 %v2580_v43  ;;  %v2527_v57 = vld [vmem:[#allocation7 + $0x1c10] sm:$0xff]  ;;  %v2652_v36 = vld [vmem:[#allocation7 + $0x1ff8] sm:$0xff] }
 0x337   :  { %3674 = vmatpush1.msra.mxu0 %v2451_v31  ;;  %3745 = vmatpush1.msra.mxu1 %v2579_v63  ;;  %v2523_v43 = vld [vmem:[#allocation7 + $0x1bf0] sm:$0xff]  ;;  %v2520_v63 = vld [vmem:[#allocation7 + $0x1bd8] sm:$0xff] }
 0x338   :  { %3675 = vmatprep.subr.mxu0 %v2448_v48  ;;  %3746 = vmatprep.subr.mxu1 %v2576_v8  ;;  %v2651_v31 = vld [vmem:[#allocation7 + $0x1ff0] sm:$0xff]  ;;  %v2648_v48 = vld [vmem:[#allocation7 + $0x1fd8] sm:$0xff] }
 0x339   :  { %3676 = vmatpush1.msra.mxu0 %v2447_v39  ;;  %3747 = vmatpush1.msra.mxu1 %v2575_v58  ;;  %v2519_v8 = vld [vmem:[#allocation7 + $0x1bd0] sm:$0xff]  ;;  %v2516_v58 = vld [vmem:[#allocation7 + $0x1bb8] sm:$0xff] }
 0x33a   :  { %3677 = vmatprep.subr.mxu0 %v2444_v30  ;;  %3748 = vmatprep.subr.mxu1 %v2572_v13  ;;  %v2647_v39 = vld [vmem:[#allocation7 + $0x1fd0] sm:$0xff]  ;;  %v2644_v30 = vld [vmem:[#allocation7 + $0x1fb8] sm:$0xff] }
 0x33b   :  { %3678 = vmatpush1.msra.mxu0 %v2443_v6  ;;  %3749 = vmatpush1.msra.mxu1 %v2571_v10  ;;  %v2515_v13 = vld [vmem:[#allocation7 + $0x1bb0] sm:$0xff]  ;;  %v2512_v10 = vld [vmem:[#allocation7 + $0x1b98] sm:$0xff] }
 0x33c   :  { %3679 = vmatprep.subr.mxu0 %v2440_v19  ;;  %3750 = vmatprep.subr.mxu1 %v2568_v37  ;;  %v2643_v6 = vld [vmem:[#allocation7 + $0x1fb0] sm:$0xff]  ;;  %v2640_v19 = vld [vmem:[#allocation7 + $0x1f98] sm:$0xff] }
 0x33d   :  { %3680 = vmatpush1.msra.mxu0 %v2439_v4  ;;  %3751 = vmatpush1.msra.mxu1 %v2567_v5  ;;  %v2511_v37 = vld [vmem:[#allocation7 + $0x1b90] sm:$0xff]  ;;  %v2508_v5 = vld [vmem:[#allocation7 + $0x1b78] sm:$0xff] }
 0x33e   :  { %3681 = vmatprep.subr.mxu0 %v2436_v45  ;;  %3752 = vmatprep.subr.mxu1 %v2564_v53  ;;  %v2639_v4 = vld [vmem:[#allocation7 + $0x1f90] sm:$0xff]  ;;  %v2636_v45 = vld [vmem:[#allocation7 + $0x1f78] sm:$0xff] }
 0x33f   :  { %3682 = vmatpush1.msra.mxu0 %v2435_v54  ;;  %3753 = vmatpush1.msra.mxu1 %v2563_v52  ;;  %v2507_v53 = vld [vmem:[#allocation7 + $0x1b70] sm:$0xff]  ;;  %v2504_v52 = vld [vmem:[#allocation7 + $0x1b58] sm:$0xff] }
 0x340   :  { %3683 = vmatprep.subr.mxu0 %v2432_v7  ;;  %3754 = vmatprep.subr.mxu1 %v2560_v40  ;;  %v2635_v54 = vld [vmem:[#allocation7 + $0x1f70] sm:$0xff]  ;;  %v2632_v7 = vld [vmem:[#allocation7 + $0x1f58] sm:$0xff] }
 0x341   :  { %3684 = vmatpush1.msra.mxu0 %v2431_v17  ;;  %3755 = vmatpush1.msra.mxu1 %v2559_v32  ;;  %v2503_v40 = vld [vmem:[#allocation7 + $0x1b50] sm:$0xff]  ;;  %v2500_v32 = vld [vmem:[#allocation7 + $0x1b38] sm:$0xff] }
 0x342   :  { %3685 = vmatprep.subr.mxu0 %v2428_v38  ;;  %3756 = vmatprep.subr.mxu1 %v2556_v26  ;;  %v2631_v17 = vld [vmem:[#allocation7 + $0x1f50] sm:$0xff]  ;;  %v2628_v38 = vld [vmem:[#allocation7 + $0x1f38] sm:$0xff] }
 0x343   :  { %3686 = vmatpush1.msra.mxu0 %v2427_v29  ;;  %3757 = vmatpush1.msra.mxu1 %v2555_v16  ;;  %v2499_v26 = vld [vmem:[#allocation7 + $0x1b30] sm:$0xff]  ;;  %v2496_v16 = vld [vmem:[#allocation7 + $0x1b18] sm:$0xff] }
 0x344   :  { %3687 = vmatprep.subr.mxu0 %v2424_v55  ;;  %3758 = vmatprep.subr.mxu1 %v2552_v61  ;;  %v2627_v29 = vld [vmem:[#allocation7 + $0x1f30] sm:$0xff]  ;;  %v2624_v55 = vld [vmem:[#allocation7 + $0x1f18] sm:$0xff] }
 0x345   :  { %3688 = vmatpush1.msra.mxu0 %v2423_v11  ;;  %3759 = vmatpush1.msra.mxu1 %v2551_v60  ;;  %v2495_v61 = vld [vmem:[#allocation7 + $0x1b10] sm:$0xff]  ;;  %v2492_v60 = vld [vmem:[#allocation7 + $0x1af8] sm:$0xff] }
 0x346   :  { %3689 = vmatprep.subr.mxu0 %v2420_v21  ;;  %3760 = vmatprep.subr.mxu1 %v2548_v28  ;;  %v2623_v11 = vld [vmem:[#allocation7 + $0x1f10] sm:$0xff]  ;;  %v2620_v21 = vld [vmem:[#allocation7 + $0x1ef8] sm:$0xff] }
 0x347   :  { %3690 = vmatpush1.msra.mxu0 %v2419_v35  ;;  %3761 = vmatpush1.msra.mxu1 %v2547_v56  ;;  %v2491_v28 = vld [vmem:[#allocation7 + $0x1af0] sm:$0xff]  ;;  %v2488_v56 = vld [vmem:[#allocation7 + $0x1ad8] sm:$0xff] }
 0x348   :  { %3691 = vmatprep.subr.mxu0 %v2416_v44  ;;  %3762 = vmatprep.subr.mxu1 %v2544_v59  ;;  %v2619_v35 = vld [vmem:[#allocation7 + $0x1ef0] sm:$0xff]  ;;  %v2616_v44 = vld [vmem:[#allocation7 + $0x1ed8] sm:$0xff] }
 0x349   :  { %3692 = vmatpush1.msra.mxu0 %v2415_v1  ;;  %3763 = vmatpush1.msra.mxu1 %v2543_v62  ;;  %v2487_v59 = vld [vmem:[#allocation7 + $0x1ad0] sm:$0xff]  ;;  %v2484_v62 = vld [vmem:[#allocation7 + $0x1ab8] sm:$0xff] }
 0x34a   :  { %3693 = vmatprep.subr.mxu0 %v2412_v23  ;;  %3764 = vmatprep.subr.mxu1 %v2540_v49  ;;  %v2615_v1 = vld [vmem:[#allocation7 + $0x1ed0] sm:$0xff]  ;;  %v2612_v23 = vld [vmem:[#allocation7 + $0x1eb8] sm:$0xff] }
 0x34b   :  { %3694 = vmatpush1.msra.mxu0 %v2411_v2  ;;  %3765 = vmatpush1.msra.mxu1 %v2539_v9  ;;  %v2483_v49 = vld [vmem:[#allocation7 + $0x1ab0] sm:$0xff]  ;;  %v2480_v9 = vld [vmem:[#allocation7 + $0x1a98] sm:$0xff] }
 0x34c   :  { %3695 = vmatprep.subr.mxu0 %v2408_v20  ;;  %3766 = vmatprep.subr.mxu1 %v2536_v15  ;;  %v2611_v2 = vld [vmem:[#allocation7 + $0x1eb0] sm:$0xff]  ;;  %v2608_v20 = vld [vmem:[#allocation7 + $0x1e98] sm:$0xff] }
 0x34d   :  { %3696 = vmatpush1.msra.mxu0 %v2407_v24  ;;  %3767 = vmatpush1.msra.mxu1 %v2535_v3  ;;  %v2479_v15 = vld [vmem:[#allocation7 + $0x1a90] sm:$0xff]  ;;  %v2476_v3 = vld [vmem:[#allocation7 + $0x1a78] sm:$0xff] }
 0x34e   :  { %3697 = vmatprep.subr.mxu0 %v2404_v0  ;;  %3768 = vmatprep.subr.mxu1 %v2532_v34  ;;  %v2607_v24 = vld [vmem:[#allocation7 + $0x1e90] sm:$0xff]  ;;  %v2604_v0 = vld [vmem:[#allocation7 + $0x1e78] sm:$0xff] }
 0x34f   :  { %3698 = vmatpush1.msra.mxu0 %v2403_v42  ;;  %3769 = vmatpush1.msra.mxu1 %v2531_v33  ;;  %v2475_v34 = vld [vmem:[#allocation7 + $0x1a70] sm:$0xff]  ;;  %v2472_v33 = vld [vmem:[#allocation7 + $0x1a58] sm:$0xff] }
 0x350   :  { %3699 = vmatprep.subr.mxu0 %v2400_v50  ;;  %3770 = vmatprep.subr.mxu1 %v2528_v51  ;;  %v2603_v42 = vld [vmem:[#allocation7 + $0x1e70] sm:$0xff]  ;;  %v2600_v50 = vld [vmem:[#allocation7 + $0x1e58] sm:$0xff] }
 0x351   :  { %3700 = vmatpush1.msra.mxu0 %v2399_v41  ;;  %3771 = vmatpush1.msra.mxu1 %v2527_v57  ;;  %v2471_v51 = vld [vmem:[#allocation7 + $0x1a50] sm:$0xff]  ;;  %v2468_v57 = vld [vmem:[#allocation7 + $0x1a38] sm:$0xff] }
 0x352   :  { %3701 = vmatprep.subr.mxu0 %v2524_v46  ;;  %3772 = vmatprep.subr.mxu1 %v2652_v36  ;;  %v2599_v41 = vld [vmem:[#allocation7 + $0x1e50] sm:$0xff]  ;;  %v2596_v46 = vld [vmem:[#allocation7 + $0x1e38] sm:$0xff] }
 0x353   :  { %3702 = vmatpush2.msra.mxu0 %v2523_v43  ;;  %3773 = vmatpush2.msra.mxu1 %v2651_v31  ;;  %v2467_v36 = vld [vmem:[#allocation7 + $0x1a30] sm:$0xff]  ;;  %v2464_v31 = vld [vmem:[#allocation7 + $0x1a18] sm:$0xff] }
 0x354   :  { %3703 = vmatprep.subr.mxu0 %v2520_v63  ;;  %3774 = vmatprep.subr.mxu1 %v2648_v48  ;;  %v2595_v43 = vld [vmem:[#allocation7 + $0x1e30] sm:$0xff]  ;;  %v2592_v63 = vld [vmem:[#allocation7 + $0x1e18] sm:$0xff] }
 0x355   :  { %3704 = vmatpush2.msra.mxu0 %v2519_v8  ;;  %3775 = vmatpush2.msra.mxu1 %v2647_v39  ;;  %v2463_v48 = vld [vmem:[#allocation7 + $0x1a10] sm:$0xff]  ;;  %v2741_v39 = vpop.f32.mrf.mxu0 }
 0x356   :  { %3705 = vmatprep.subr.mxu0 %v2516_v58  ;;  %3776 = vmatprep.subr.mxu1 %v2644_v30  ;;  %v2591_v8 = vld [vmem:[#allocation7 + $0x1e10] sm:$0xff]  ;;  %v2812_v58 = vpop.f32.mrf.mxu1 }
 0x357   :  { %3706 = vmatpush2.msra.mxu0 %v2515_v13  ;;  %3777 = vmatpush2.msra.mxu1 %v2643_v6  ;;  %v2743_v30 = vpop.f32.mrf.mxu0 }
 0x358   :  { %3707 = vmatprep.subr.mxu0 %v2512_v10  ;;  %3778 = vmatprep.subr.mxu1 %v2640_v19  ;;  %v2814_v6 = vpop.f32.mrf.mxu1 }
 0x359   :  { %3708 = vmatpush2.msra.mxu0 %v2511_v37  ;;  %3779 = vmatpush2.msra.mxu1 %v2639_v4  ;;  %v2883_v13 = vpop.f32.mrf.mxu0 }
 0x35a   :  { %3709 = vmatprep.subr.mxu0 %v2508_v5  ;;  %3780 = vmatprep.subr.mxu1 %v2636_v45  ;;  %v2954_v10 = vpop.f32.mrf.mxu1  ;;  %v2653_v5 = vld [vmem:[#allocation8] sm:$0xf] }
 0x35b   :  { %3710 = vmatpush2.msra.mxu0 %v2507_v53  ;;  %3781 = vmatpush2.msra.mxu1 %v2635_v54  ;;  %v2885_v19 = vpop.f32.mrf.mxu0  ;;  %v2662_v54 = vrot.slane %v2653_v5, %v5403_v27 }
 0x35c   :  { %3711 = vmatprep.subr.mxu0 %v2504_v52  ;;  %3782 = vmatprep.subr.mxu1 %v2632_v7  ;;  %v2956_v4 = vpop.f32.mrf.mxu1  ;;  %v2658_v7 = vrot.slane %v2653_v5, %v5409_v47 }
 0x35d   :  { %3712 = vmatpush2.msra.mxu0 %v2503_v40  ;;  %3783 = vmatpush2.msra.mxu1 %v2631_v17  ;;  %v3025_v37 = vpop.f32.mrf.mxu0  ;;  %v2744_v40 = vadd.f32 %v2743_v30, %v2662_v54 }
 0x35e   :  { %3713 = vmatprep.subr.mxu0 %v2500_v32  ;;  %3784 = vmatprep.subr.mxu1 %v2628_v38  ;;  %v3096_v45 = vpop.f32.mrf.mxu1  ;;  %v2742_v32 = vadd.f32 %v2741_v39, %v2658_v7 }
 0x35f   :  { %3714 = vmatpush2.msra.mxu0 %v2499_v26  ;;  %3785 = vmatpush2.msra.mxu1 %v2627_v29  ;;  %v3027_v53 = vpop.f32.mrf.mxu0  ;;  %v2815_v26 = vadd.f32 %v2814_v6, %v2744_v40  ;;  %v2666_v29 = vrot.slane %v2653_v5, %v5400_v25 }
 0x360   :  { %3715 = vmatprep.subr.mxu0 %v2496_v16  ;;  %3786 = vmatprep.subr.mxu1 %v2624_v55  ;;  %v2813_v55 = vadd.f32 %v2812_v58, %v2742_v32  ;;  %v3827_v32 = vld [vmem:[#allocation10] sm:$0xf] }
 0x361   :  { %3716 = vmatpush2.msra.mxu0 %v2495_v61  ;;  %3787 = vmatpush2.msra.mxu1 %v2623_v11  ;;  %v3167_v52 = vpop.f32.mrf.mxu0  ;;  %v2886_v61 = vadd.f32 %v2885_v19, %v2815_v26  ;;  %v2670_v11 = vrot.slane %v2653_v5, %v5406_v14  ;;  %v3836_v26 = vrot.slane %v3827_v32, %v5403_v27 }
 0x362   :  { %3717 = vmatprep.subr.mxu0 %v2492_v60  ;;  %3788 = vmatprep.subr.mxu1 %v2620_v21 }
 0x363   :  { %3718 = vmatpush2.msra.mxu0 %v2491_v28  ;;  %3789 = vmatpush2.msra.mxu1 %v2619_v35  ;;  %v3169_v17 = vpop.f32.mrf.mxu0  ;;  %v2884_v28 = vadd.f32 %v2883_v13, %v2813_v55 }
 0x364   :  { %3719 = vmatprep.subr.mxu0 %v2488_v56  ;;  %3790 = vmatprep.subr.mxu1 %v2616_v44  ;;  %v2957_v44 = vadd.f32 %v2956_v4, %v2886_v61 }
 0x365   :  { %3720 = vmatpush2.msra.mxu0 %v2487_v59  ;;  %3791 = vmatpush2.msra.mxu1 %v2615_v1 }
 0x366   :  { %3721 = vmatprep.subr.mxu0 %v2484_v62  ;;  %3792 = vmatprep.subr.mxu1 %v2612_v23  ;;  %v2955_v62 = vadd.f32 %v2954_v10, %v2884_v28  ;;  %v3028_v23 = vadd.f32 %v3027_v53, %v2957_v44 }
 0x367   :  { %3722 = vmatpush2.msra.mxu0 %v2483_v49  ;;  %3793 = vmatpush2.msra.mxu1 %v2611_v2 }
 0x368   :  { %3723 = vmatprep.subr.mxu0 %v2480_v9  ;;  %3794 = vmatprep.subr.mxu1 %v2608_v20  ;;  %v3026_v20 = vadd.f32 %v3025_v37, %v2955_v62 }
 0x369   :  { %3724 = vmatpush2.msra.mxu0 %v2479_v15  ;;  %3795 = vmatpush2.msra.mxu1 %v2607_v24 }
 0x36a   :  { %3725 = vmatprep.subr.mxu0 %v2476_v3  ;;  %3796 = vmatprep.subr.mxu1 %v2604_v0 }
 0x36b   :  { %3726 = vmatpush2.msra.mxu0 %v2475_v34  ;;  %3797 = vmatpush2.msra.mxu1 %v2603_v42 }
 0x36c   :  { %3727 = vmatprep.subr.mxu0 %v2472_v33  ;;  %3798 = vmatprep.subr.mxu1 %v2600_v50  ;;  %v3309_v38 = vpop.f32.mrf.mxu0  ;;  %v3097_v33 = vadd.f32 %v3096_v45, %v3026_v20 }
 0x36d   :  { %3728 = vmatpush2.msra.mxu0 %v2471_v51  ;;  %3799 = vmatpush2.msra.mxu1 %v2599_v41  ;;  %v3310_v35 = vadd.f32 %v3309_v38, %v2666_v29  ;;  %v3832_v38 = vrot.slane %v3827_v32, %v5409_v47 }
 0x36e   :  { %3729 = vmatprep.subr.mxu0 %v2468_v57  ;;  %3800 = vmatprep.subr.mxu1 %v2596_v46  ;;  %v3311_v21 = vpop.f32.mrf.mxu0  ;;  %v3168_v46 = vadd.f32 %v3167_v52, %v3097_v33 }
 0x36f   :  { %3730 = vmatpush2.msra.mxu0 %v2467_v36  ;;  %3801 = vmatpush2.msra.mxu1 %v2595_v43  ;;  %v3312_v59 = vadd.f32 %v3311_v21, %v2670_v11  ;;  %v3840_v11 = vrot.slane %v3827_v32, %v5400_v25  ;;  %v3844_v21 = vrot.slane %v3827_v32, %v5406_v14 }
 0x370   :  { %3731 = vmatprep.subr.mxu0 %v2464_v31  ;;  %3802 = vmatprep.subr.mxu1 %v2592_v63 }
 0x371   :  { %3732 = vmatpush2.msra.mxu0 %v2463_v48  ;;  %3803 = vmatpush2.msra.mxu1 %v2591_v8 }
 0x372   :  { %3734 = vmatmul.mubr.f32.vlgmr.msra.gmra.mxu0 %v5506_v18  ;;  %3805 = vmatmul.mubr.f32.vlgmr.msra.gmra.mxu1 %v5509_v12  ;;  %v3098_v18 = vpop.f32.mrf.mxu1 }
 0x373   :  { %v3099_v0 = vadd.f32 %v3098_v18, %v3028_v23 }
 0x374   :  { %v3238_v12 = vpop.f32.mrf.mxu1 }
 0x375   :  { %v3170_v50 = vadd.f32 %v3169_v17, %v3099_v0  ;;  %v3239_v8 = vadd.f32 %v3238_v12, %v3168_v46 }
 0x376   :  { %v3240_v16 = vpop.f32.mrf.mxu1 }
 0x377   :  { %v3241_v31 = vadd.f32 %v3240_v16, %v3170_v50  ;;  %v3811_v37 = vmul.f32 %v3239_v8, %v3239_v8 }
 0x378   :  { %v3380_v60 = vpop.f32.mrf.mxu1 }
 0x379   :  { %v3381_v49 = vadd.f32 %v3380_v60, %v3310_v35  ;;  %v3812_v13 = vmul.f32 %v3241_v31, %v3241_v31 }
 0x37a   :  { %v3382_v1 = vpop.f32.mrf.mxu1 }
 0x37b   :  { %v3383_v15 = vadd.f32 %v3382_v1, %v3312_v59  ;;  %v3815_v52 = vadd.f32 %v3812_v13, %v3811_v37 }
 0x3ae   :  { %v3451_v56 = vpop.f32.mrf.mxu0  ;;  %v3522_v2 = vpop.f32.mrf.mxu1 }
 0x3af   :  { %v3452_v24 = vadd.f32 %v3451_v56, %v3381_v49 }
 0x3b0   :  { %v3453_v9 = vpop.f32.mrf.mxu0  ;;  %v3524_v42 = vpop.f32.mrf.mxu1 }
 0x3b1   :  { %v3454_v34 = vadd.f32 %v3453_v9, %v3383_v15  ;;  %v3523_v51 = vadd.f32 %v3522_v2, %v3452_v24 }
 0x3b3   :  { %v3525_v36 = vadd.f32 %v3524_v42, %v3454_v34 }
 0x3f0   :  { %v3593_v3 = vpop.f32.mrf.mxu0  ;;  %v3664_v41 = vpop.f32.mrf.mxu1 }
 0x3f1   :  { %v3594_v43 = vadd.f32 %v3593_v3, %v3523_v51 }
 0x3f2   :  { %v3595_v57 = vpop.f32.mrf.mxu0  ;;  %v3666_v48 = vpop.f32.mrf.mxu1 }
 0x3f3   :  { %v3596_v63 = vadd.f32 %v3595_v57, %v3525_v36  ;;  %v3665_v39 = vadd.f32 %v3664_v41, %v3594_v43 }
 0x3f5   :  { %v3667_v6 = vadd.f32 %v3666_v48, %v3596_v63 }
 0x432   :  { %v3735_v58 = vpop.f32.mrf.mxu0  ;;  %v3806_v30 = vpop.f32.mrf.mxu1 }
 0x433   :  { %v3736_v10 = vadd.f32 %v3735_v58, %v3665_v39 }
 0x434   :  { %v3737_v19 = vpop.f32.mrf.mxu0  ;;  %v3808_v45 = vpop.f32.mrf.mxu1 }
 0x435   :  { %v3807_v4 = vadd.f32 %v3806_v30, %v3736_v10  ;;  %v3738_v5 = vadd.f32 %v3737_v19, %v3667_v6 }
 0x437   :  { %v3813_v53 = vmul.f32 %v3807_v4, %v3807_v4  ;;  %v3809_v54 = vadd.f32 %v3808_v45, %v3738_v5 }
 0x439   :  { %v3814_v7 = vmul.f32 %v3809_v54, %v3809_v54  ;;  %v3816_v18 = vadd.f32 %v3815_v52, %v3813_v53 }
 0x43b   :  { %v3817_v40 = vadd.f32 %v3816_v18, %v3814_v7 }
 0x43d   :  { %3818 = vadd.xlane.f32.xlu0 %v3817_v40 }
 0x4c6   :  { %v3819_v17 = vpop.xlane.xlu0 %3818 }
 0x4c7   :  { %v3820_v12 = vadd.f32 1e-12, %v3819_v17 }
 0x4c9   :  { %3942 = vrsqrt.f32 %v3820_v12 }
 0x4d6   :  { %v3943_v29 = vpop.eup %3942 }
 0x4d7   :  { %v3822_v16 = vmul.f32 %v3943_v29, %v3239_v8  ;;  %v3823_v55 = vmul.f32 %v3943_v29, %v3241_v31  ;;  %v3824_v61 = vmul.f32 %v3943_v29, %v3807_v4  ;;  %v3825_v60 = vmul.f32 %v3943_v29, %v3809_v54 }
 0x4d9   :  { %v3849_v28 = vmul.f32 %v3832_v38, %v3822_v16  ;;  %v3850_v35 = vmul.f32 %v3836_v26, %v3823_v55  ;;  %3858 = vst [vmem:[#allocation11] sm:$0xff] %v3822_v16  ;;  %3859 = vst [vmem:[#allocation11 + $0x8] sm:$0xff] %v3823_v55  ;;  %v3851_v56 = vmul.f32 %v3840_v11, %v3824_v61 }
 0x4da   :  { %3860 = vst [vmem:[#allocation11 + $0x10] sm:$0xff] %v3824_v61  ;;  %3861 = vst [vmem:[#allocation11 + $0x18] sm:$0xff] %v3825_v60  ;;  %v3852_v47 = vmul.f32 %v3844_v21, %v3825_v60 }
 0x4db   :  { %v3853_v44 = vadd.f32 %v3850_v35, %v3849_v28 }
 0x4dd   :  { %v3854_v59 = vadd.f32 %v3853_v44, %v3851_v56 }
 0x4df   :  { %v3855_v27 = vadd.f32 %v3854_v59, %v3852_v47 }
 0x4e1   :  { %3856 = vadd.xlane.f32.xlu0 %v3855_v27 }
 0x4e2   :  { %4055 = shalt.err (!%p4052_p1)
}
 0x4e3   :  { %3878 = dma.vmem_to_hbm [thread:$0]  %s3876_s8, 512, %s5550_s6, [#allocation4]   ;;  %v3863_v25 = vand.u32 127, %v908_v22  ;;  %v3826_v14 = vmul.f32 %v3943_v29, %v3819_v17 }
 0x4e4   :  { %s4103_s12 = smov [#allocation12]  }
 0x4e5   :  { %vm3865_vm9 = vcmp.eq.s32.totalorder %v3863_v25, 1  ;;  %s3885_s13 = sshll.u32 %s4103_s12, 4  ;;  %vm3864_vm10 = vcmp.eq.s32.totalorder %v3863_v25, 0  ;;  %s3886_s13 = int_to_ptr.vmem [resolvable:$true] %s3885_s13 }
 0x4e6   :  { %s4064_s14 = scalar_lea.vmem %s3886_s13, 128  ;;  %p4069_p3 = scmp.lt.s32.totalorder %s3886_s13, %s3886_s13 }
 0x4e7   :  { %p4065_p2 = scmp.ne.s32.totalorder %s3886_s13, %s4064_s14  ;;  %p4070_p4 = scmp.lt.s32.totalorder %s4064_s14, %s4064_s14 }
 0x4e9   :  { %p4071_p5 = por %p4070_p4, %p4069_p3 }
 0x4eb   :  { %p4072_p6 = pnand %p4071_p5, %p4065_p2 }
 0x56a   :  { %v3857_v1 = vpop.xlane.xlu0 %3856 }
 0x56b   :  { %v3866_v62 = vsel %vm3865_vm9, %v3857_v1, 0.0 }
 0x56c   :  { %v3867_v23 = vsel %vm3864_vm10, %v3826_v14, %v3866_v62 }
 0x56d   :  { %3868 = vst [vmem:[#allocation12] sm:$0xff] %v3867_v23 }
 0x56e   :  { %4075 = shalt.err (!%p4072_p6)
}
 0x56f   :  { %3888 = dma.vmem_to_hbm [thread:$0]  %s3886_s13, 128, %s5551_s7, [#allocation13]  }
 0x570   :  { %4090 = dma.done.wait [#allocation4], 512  }
 0x571   :  { %4091 = vsyncadd [#allocation4], 4294966784 }
 0x572   :  { %4092 = dma.done.wait [#allocation13], 128  }
 0x573   :  { %4093 = vsyncadd [#allocation13], 4294967168 }
 0x574   :  { %3895 = vsyncpa [#allocation3], 1 }
 0x575   :  { %3896 = vsyncpa [#allocation6], 1 }
 0x576   :  { %3897 = vsyncpa [#allocation9], 1 }
 0x577   :  { %3898 = vsyncpa [#allocation4], 1 }
 0x578   :  { %3899 = vsyncpa [#allocation13], 1 }

</bundles_post_ra>
